<compile_context>
chip_gen: v5e
topology: v5e:2x2
jax: 0.10.0
libtpu: 0.0.40
codegen_flags: <defaults>
</compile_context>

<pallas_src>
import jax
import jax.numpy as jnp
import numpy as np
from jax.experimental import pallas as pl
from jax.experimental.pallas import tpu as pltpu

# ------------------------- model hyper-parameters ---------------------------
INPUT_DIM = 32          # must equal OUTPUT_DIM (see note above)
OUTPUT_DIM = 32
N_STEPS = 5
N_SHARED = 2
N_INDEPENDENT = 2
VIRTUAL_BATCH_SIZE = 128  # GhostBatchNorm == plain BN in eval mode; unused here
BATCH = 256
TILE_B = 128            # batch tile -> lane width (lane-dense stores)
BN_EPS = 1e-5

N_FT_BLOCKS = N_SHARED + N_STEPS * N_INDEPENDENT   # 12 GLU blocks total


# ------------------------------- Pallas kernel ------------------------------
def tabnet_encoder_kernel(x_ref, bn_s_ref, bn_t_ref,
                          ftW_ref, ftB_ref, atW_ref, atB_ref, out_ref):
    """Feature-major tiles: x_ref/out_ref are (D, TB); weights are column-major.

    ftW_ref: (N_FT_BLOCKS, 2D, D) bf16  -- rows [:D] = GLU value, [D:] = gate
    ftB_ref: (N_FT_BLOCKS, 2D, 1) f32
    atW_ref: (N_STEPS,     D,  D) bf16
    atB_ref: (N_STEPS,     D,  1) f32
    """
    D = OUTPUT_DIM

    # initial BatchNorm1d (folded to affine scale/shift), f32
    x = x_ref[...] * bn_s_ref[...] + bn_t_ref[...]          # (D, TB)

    prior = jnp.ones_like(x)
    masked_x = x
    acc = jnp.zeros_like(x)

    def glu_block(act, idx):
        # one MXU matmul (2D x D) @ (D x TB); bf16 operands, f32 accumulate
        z = jnp.dot(ftW_ref[idx], act.astype(jnp.bfloat16),
                    preferred_element_type=jnp.float32) + ftB_ref[idx]
        # sublane split at row D (vreg-aligned) -> free
        return z[:D, :] * jax.nn.sigmoid(z[D:, :])

    for step in range(N_STEPS):
        out = masked_x
        # shared feature transformer blocks: Linear(+folded BN) -> GLU
        for i in range(N_SHARED):
            out = glu_block(out, i)
        # step-specific (independent) feature transformer blocks
        for i in range(N_INDEPENDENT):
            out = glu_block(out, N_SHARED + step * N_INDEPENDENT + i)

        acc = acc + out

        if step < N_STEPS - 1:
            # attentive transformer: Linear(+folded BN) * prior -> softmax
            # TODO(synk): the AttentiveTransformer class body was not provided;
            # canonical TabNet uses sparsemax, softmax is used as the normalizer.
            a = jnp.dot(atW_ref[step], out.astype(jnp.bfloat16),
                        preferred_element_type=jnp.float32) + atB_ref[step]
            a = a * prior
            a = a - jnp.max(a, axis=0, keepdims=True)        # reduce over features
            e = jnp.exp(a)
            inv = pl.reciprocal(jnp.sum(e, axis=0, keepdims=True), approx=True)
            mask = e * inv
            masked_x = mask * x
            prior = prior * (1.0 - mask + 1e-5)

    out_ref[...] = acc.astype(out_ref.dtype)                 # lane-dense store


# ------------------------------ wrapper (glue) -------------------------------
def tabnet_encoder(x, params, tb=TILE_B):
    B, D = x.shape
    assert B % tb == 0, "batch must be a multiple of the batch tile"
    xT = x.T                                                  # (D, B) feature-major
    grid = (B // tb,)

    out_T = pl.pallas_call(
        tabnet_encoder_kernel,
        out_shape=jax.ShapeDtypeStruct((D, B), jnp.float32),
        grid=grid,
        in_specs=[
            pl.BlockSpec((D, tb), lambda i: (0, i)),                       # x tile
            pl.BlockSpec(params["bn_s"].shape, lambda i: (0, 0)),          # (D,1)
            pl.BlockSpec(params["bn_t"].shape, lambda i: (0, 0)),          # (D,1)
            pl.BlockSpec(params["ftW"].shape, lambda i: (0, 0, 0)),        # (12,2D,D)
            pl.BlockSpec(params["ftB"].shape, lambda i: (0, 0, 0)),        # (12,2D,1)
            pl.BlockSpec(params["atW"].shape, lambda i: (0, 0, 0)),        # (5,D,D)
            pl.BlockSpec(params["atB"].shape, lambda i: (0, 0, 0)),        # (5,D,1)
        ],
        out_specs=pl.BlockSpec((D, tb), lambda i: (0, i)),
        compiler_params=pltpu.CompilerParams(
            dimension_semantics=("parallel",)),
    )(xT, params["bn_s"], params["bn_t"],
      params["ftW"], params["ftB"], params["atW"], params["atB"])

    return out_T.T


# ------------------------ deterministic parameter init -----------------------
def _fold_linear_bn(key, in_dim, out_dim):
    """Linear(in_dim, out_dim) followed by BatchNorm1d(out_dim), eval mode,
    folded into row-major (W_f[in_dim, out_dim], b_f[out_dim])."""
    k_w, k_b, k_g, k_be, k_m, k_v = jax.random.split(key, 6)
    w = jax.random.normal(k_w, (out_dim, in_dim), jnp.float32) * 0.1   # torch layout
    b = jax.random.normal(k_b, (out_dim,), jnp.float32) * 0.1
    gamma = 1.0 + 0.1 * jax.random.normal(k_g, (out_dim,), jnp.float32)
    beta = 0.1 * jax.random.normal(k_be, (out_dim,), jnp.float32)
    mean = 0.1 * jax.random.normal(k_m, (out_dim,), jnp.float32)
    var = 1.0 + 0.1 * jnp.abs(jax.random.normal(k_v, (out_dim,), jnp.float32))
    scale = gamma / jnp.sqrt(var + BN_EPS)
    w_f = w.T * scale[None, :]                      # (in_dim, out_dim)
    b_f = b * scale + beta - mean * scale
    return w_f, b_f


def make_params(key):
    keys = jax.random.split(key, 3)

    # initial BatchNorm1d(input_dim), eval mode -> affine (feature-major (D,1))
    k_g, k_b, k_m, k_v = jax.random.split(keys[0], 4)
    gamma = 1.0 + 0.1 * jax.random.normal(k_g, (INPUT_DIM,), jnp.float32)
    beta = 0.1 * jax.random.normal(k_b, (INPUT_DIM,), jnp.float32)
    mean = 0.1 * jax.random.normal(k_m, (INPUT_DIM,), jnp.float32)
    var = 1.0 + 0.1 * jnp.abs(jax.random.normal(k_v, (INPUT_DIM,), jnp.float32))
    s = gamma / jnp.sqrt(var + BN_EPS)
    bn_s = s.reshape(INPUT_DIM, 1)
    bn_t = (beta - mean * s).reshape(INPUT_DIM, 1)

    # all GLU feature-transformer blocks packed into one stack:
    #   [shared_0, shared_1, step0_ind_0, step0_ind_1, step1_ind_0, ...]
    ft_keys = jax.random.split(keys[1], N_FT_BLOCKS)
    ftW, ftB = [], []
    for k in ft_keys:
        w, b = _fold_linear_bn(k, INPUT_DIM, 2 * OUTPUT_DIM)
        ftW.append(w.T)                                  # column-major (2D, D)
        ftB.append(b.reshape(2 * OUTPUT_DIM, 1))
    ftW = jnp.stack(ftW).astype(jnp.bfloat16)            # (12, 2D, D) bf16
    ftB = jnp.stack(ftB).astype(jnp.float32)             # (12, 2D, 1) f32

    # attentive transformers: Linear(output_dim, input_dim)+BN
    at_keys = jax.random.split(keys[2], N_STEPS)
    atW, atB = [], []
    for k in at_keys:
        w, b = _fold_linear_bn(k, OUTPUT_DIM, INPUT_DIM)
        atW.append(w.T)                                  # column-major (D, D)
        atB.append(b.reshape(INPUT_DIM, 1))
    atW = jnp.stack(atW).astype(jnp.bfloat16)            # (5, D, D) bf16
    atB = jnp.stack(atB).astype(jnp.float32)             # (5, D, 1) f32

    return dict(bn_s=bn_s, bn_t=bn_t, ftW=ftW, ftB=ftB, atW=atW, atB=atB)


# ------------------------- pure-JAX reference (check) ------------------------
def tabnet_encoder_ref(x, p):
    """Same mixed precision (bf16 MXU operands, f32 accumulate / elementwise)
    as the kernel, feature-major math, exact softmax divide."""
    D = OUTPUT_DIM
    h = x.T * p["bn_s"] + p["bn_t"]                      # (D, B)
    prior = jnp.ones_like(h)
    masked = h
    acc = jnp.zeros_like(h)

    def glu(act, idx):
        z = jnp.dot(p["ftW"][idx], act.astype(jnp.bfloat16),
                    preferred_element_type=jnp.float32) + p["ftB"][idx]
        return z[:D] * jax.nn.sigmoid(z[D:])

    for step in range(N_STEPS):
        out = masked
        for i in range(N_SHARED):
            out = glu(out, i)
        for i in range(N_INDEPENDENT):
            out = glu(out, N_SHARED + step * N_INDEPENDENT + i)
        acc = acc + out
        if step < N_STEPS - 1:
            a = (jnp.dot(p["atW"][step], out.astype(jnp.bfloat16),
                         preferred_element_type=jnp.float32) + p["atB"][step]) * prior
            mask = jax.nn.softmax(a, axis=0)
            masked = mask * h
            prior = prior * (1.0 - mask + 1e-5)
    return acc.T


# ----------------------------------- main ------------------------------------
if __name__ == "__main__":
    key = jax.random.PRNGKey(0)
    k_x, k_p = jax.random.split(key)
    x = jax.random.normal(k_x, (BATCH, INPUT_DIM), jnp.float32)
    params = make_params(k_p)

    out = tabnet_encoder(x, params)
    out = jax.block_until_ready(out)

    ref = jax.block_until_ready(tabnet_encoder_ref(x, params))
    assert out.shape == (BATCH, OUTPUT_DIM)
    # only difference vs. the reference is the approx EUP reciprocal in the
    # softmax normalizer -> tolerance 1e-2 comfortably covers it while still
    # catching any layout / indexing bug.
    assert np.allclose(np.asarray(out), np.asarray(ref), rtol=1e-2, atol=1e-2), \
        "Pallas kernel does not match reference"
    print("KERNEL_OK")
</pallas_src>

<mosaic_0001>
module attributes {stable_mosaic.version = 11 : i64} {
  func.func @tabnet_encoder_kernel(%arg0: i32, %arg1: memref<32x128xf32, #tpu.memory_space<vmem>>, %arg2: memref<32x1xf32, #tpu.memory_space<vmem>>, %arg3: memref<32x1xf32, #tpu.memory_space<vmem>>, %arg4: memref<12x64x32xbf16, #tpu.memory_space<vmem>>, %arg5: memref<12x64x1xf32, #tpu.memory_space<vmem>>, %arg6: memref<5x32x32xbf16, #tpu.memory_space<vmem>>, %arg7: memref<5x32x1xf32, #tpu.memory_space<vmem>>, %arg8: memref<32x128xf32, #tpu.memory_space<vmem>>) attributes {dimension_semantics = [#tpu.dimension_semantics<parallel>], iteration_bounds = array<i64: 2>, scalar_prefetch = 0 : i64, scratch_operands = 0 : i64, tpu.core_type = #tpu.core_type<tc>, window_params = [{transform_indices = @transform_0, window_bounds = array<i64: 32, 128>}, {pipeline_mode = #tpu.pipeline_mode<synchronous>, transform_indices = @transform_1, window_bounds = array<i64: 32, 1>}, {pipeline_mode = #tpu.pipeline_mode<synchronous>, transform_indices = @transform_2, window_bounds = array<i64: 32, 1>}, {pipeline_mode = #tpu.pipeline_mode<synchronous>, transform_indices = @transform_3, window_bounds = array<i64: 12, 64, 32>}, {pipeline_mode = #tpu.pipeline_mode<synchronous>, transform_indices = @transform_4, window_bounds = array<i64: 12, 64, 1>}, {pipeline_mode = #tpu.pipeline_mode<synchronous>, transform_indices = @transform_5, window_bounds = array<i64: 5, 32, 32>}, {pipeline_mode = #tpu.pipeline_mode<synchronous>, transform_indices = @transform_6, window_bounds = array<i64: 5, 32, 1>}, {transform_indices = @transform_7, window_bounds = array<i64: 32, 128>}]} {
    %c0 = arith.constant 0 : index
    %c0_0 = arith.constant 0 : index
    %0 = vector.load %arg1[%c0, %c0_0] : memref<32x128xf32, #tpu.memory_space<vmem>>, vector<32x128xf32>
    %c0_1 = arith.constant 0 : index
    %c0_2 = arith.constant 0 : index
    %1 = vector.load %arg2[%c0_1, %c0_2] : memref<32x1xf32, #tpu.memory_space<vmem>>, vector<32x1xf32>
    %2 = vector.broadcast %1 : vector<32x1xf32> to vector<32x128xf32>
    %3 = arith.mulf %0, %2 : vector<32x128xf32>
    %c0_3 = arith.constant 0 : index
    %c0_4 = arith.constant 0 : index
    %4 = vector.load %arg3[%c0_3, %c0_4] : memref<32x1xf32, #tpu.memory_space<vmem>>, vector<32x1xf32>
    %5 = vector.broadcast %4 : vector<32x1xf32> to vector<32x128xf32>
    %6 = arith.addf %3, %5 : vector<32x128xf32>
    %cst = arith.constant 1.000000e+00 : f32
    %7 = vector.broadcast %cst : f32 to vector<32x128xf32>
    %cst_5 = arith.constant 0.000000e+00 : f32
    %8 = vector.broadcast %cst_5 : f32 to vector<32x128xf32>
    %c0_6 = arith.constant 0 : index
    %c0_7 = arith.constant 0 : index
    %c0_8 = arith.constant 0 : index
    %9 = vector.load %arg4[%c0_6, %c0_7, %c0_8] : memref<12x64x32xbf16, #tpu.memory_space<vmem>>, vector<1x64x32xbf16>
    %10 = vector.shape_cast %9 : vector<1x64x32xbf16> to vector<64x32xbf16>
    %11 = arith.truncf %6 : vector<32x128xf32> to vector<32x128xbf16>
    %cst_9 = arith.constant dense<0.000000e+00> : vector<64x128xf32>
    %12 = tpu.matmul %10, %11, %cst_9 {dimension_numbers = #tpu.dot_dimension_numbers<[1], [0], [0], [1], [0, 0, 1, 1], [], []>} : vector<64x32xbf16>, vector<32x128xbf16>, vector<64x128xf32> -> vector<64x128xf32>
    %c0_10 = arith.constant 0 : index
    %c0_11 = arith.constant 0 : index
    %c0_12 = arith.constant 0 : index
    %13 = vector.load %arg5[%c0_10, %c0_11, %c0_12] : memref<12x64x1xf32, #tpu.memory_space<vmem>>, vector<1x64x1xf32>
    %14 = vector.shape_cast %13 : vector<1x64x1xf32> to vector<64x1xf32>
    %15 = vector.broadcast %14 : vector<64x1xf32> to vector<64x128xf32>
    %16 = arith.addf %12, %15 : vector<64x128xf32>
    %17 = vector.extract_strided_slice %16 {offsets = [0, 0], sizes = [32, 128], strides = [1, 1]} : vector<64x128xf32> to vector<32x128xf32>
    %18 = vector.extract_strided_slice %16 {offsets = [32, 0], sizes = [32, 128], strides = [1, 1]} : vector<64x128xf32> to vector<32x128xf32>
    %19 = arith.negf %18 : vector<32x128xf32>
    %20 = math.exp %19 : vector<32x128xf32>
    %cst_13 = arith.constant 1.000000e+00 : f32
    %21 = vector.broadcast %cst_13 : f32 to vector<32x128xf32>
    %22 = arith.addf %21, %20 : vector<32x128xf32>
    %23 = arith.divf %21, %22 : vector<32x128xf32>
    %24 = arith.mulf %17, %23 : vector<32x128xf32>
    %c1 = arith.constant 1 : index
    %c0_14 = arith.constant 0 : index
    %c0_15 = arith.constant 0 : index
    %25 = vector.load %arg4[%c1, %c0_14, %c0_15] : memref<12x64x32xbf16, #tpu.memory_space<vmem>>, vector<1x64x32xbf16>
    %26 = vector.shape_cast %25 : vector<1x64x32xbf16> to vector<64x32xbf16>
    %27 = arith.truncf %24 : vector<32x128xf32> to vector<32x128xbf16>
    %cst_16 = arith.constant dense<0.000000e+00> : vector<64x128xf32>
    %28 = tpu.matmul %26, %27, %cst_16 {dimension_numbers = #tpu.dot_dimension_numbers<[1], [0], [0], [1], [0, 0, 1, 1], [], []>} : vector<64x32xbf16>, vector<32x128xbf16>, vector<64x128xf32> -> vector<64x128xf32>
    %c1_17 = arith.constant 1 : index
    %c0_18 = arith.constant 0 : index
    %c0_19 = arith.constant 0 : index
    %29 = vector.load %arg5[%c1_17, %c0_18, %c0_19] : memref<12x64x1xf32, #tpu.memory_space<vmem>>, vector<1x64x1xf32>
    %30 = vector.shape_cast %29 : vector<1x64x1xf32> to vector<64x1xf32>
    %31 = vector.broadcast %30 : vector<64x1xf32> to vector<64x128xf32>
    %32 = arith.addf %28, %31 : vector<64x128xf32>
    %33 = vector.extract_strided_slice %32 {offsets = [0, 0], sizes = [32, 128], strides = [1, 1]} : vector<64x128xf32> to vector<32x128xf32>
    %34 = vector.extract_strided_slice %32 {offsets = [32, 0], sizes = [32, 128], strides = [1, 1]} : vector<64x128xf32> to vector<32x128xf32>
    %35 = arith.negf %34 : vector<32x128xf32>
    %36 = math.exp %35 : vector<32x128xf32>
    %cst_20 = arith.constant 1.000000e+00 : f32
    %37 = vector.broadcast %cst_20 : f32 to vector<32x128xf32>
    %38 = arith.addf %37, %36 : vector<32x128xf32>
    %39 = arith.divf %37, %38 : vector<32x128xf32>
    %40 = arith.mulf %33, %39 : vector<32x128xf32>
    %c2 = arith.constant 2 : index
    %c0_21 = arith.constant 0 : index
    %c0_22 = arith.constant 0 : index
    %41 = vector.load %arg4[%c2, %c0_21, %c0_22] : memref<12x64x32xbf16, #tpu.memory_space<vmem>>, vector<1x64x32xbf16>
    %42 = vector.shape_cast %41 : vector<1x64x32xbf16> to vector<64x32xbf16>
    %43 = arith.truncf %40 : vector<32x128xf32> to vector<32x128xbf16>
    %cst_23 = arith.constant dense<0.000000e+00> : vector<64x128xf32>
    %44 = tpu.matmul %42, %43, %cst_23 {dimension_numbers = #tpu.dot_dimension_numbers<[1], [0], [0], [1], [0, 0, 1, 1], [], []>} : vector<64x32xbf16>, vector<32x128xbf16>, vector<64x128xf32> -> vector<64x128xf32>
    %c2_24 = arith.constant 2 : index
    %c0_25 = arith.constant 0 : index
    %c0_26 = arith.constant 0 : index
    %45 = vector.load %arg5[%c2_24, %c0_25, %c0_26] : memref<12x64x1xf32, #tpu.memory_space<vmem>>, vector<1x64x1xf32>
    %46 = vector.shape_cast %45 : vector<1x64x1xf32> to vector<64x1xf32>
    %47 = vector.broadcast %46 : vector<64x1xf32> to vector<64x128xf32>
    %48 = arith.addf %44, %47 : vector<64x128xf32>
    %49 = vector.extract_strided_slice %48 {offsets = [0, 0], sizes = [32, 128], strides = [1, 1]} : vector<64x128xf32> to vector<32x128xf32>
    %50 = vector.extract_strided_slice %48 {offsets = [32, 0], sizes = [32, 128], strides = [1, 1]} : vector<64x128xf32> to vector<32x128xf32>
    %51 = arith.negf %50 : vector<32x128xf32>
    %52 = math.exp %51 : vector<32x128xf32>
    %cst_27 = arith.constant 1.000000e+00 : f32
    %53 = vector.broadcast %cst_27 : f32 to vector<32x128xf32>
    %54 = arith.addf %53, %52 : vector<32x128xf32>
    %55 = arith.divf %53, %54 : vector<32x128xf32>
    %56 = arith.mulf %49, %55 : vector<32x128xf32>
    %c3 = arith.constant 3 : index
    %c0_28 = arith.constant 0 : index
    %c0_29 = arith.constant 0 : index
    %57 = vector.load %arg4[%c3, %c0_28, %c0_29] : memref<12x64x32xbf16, #tpu.memory_space<vmem>>, vector<1x64x32xbf16>
    %58 = vector.shape_cast %57 : vector<1x64x32xbf16> to vector<64x32xbf16>
    %59 = arith.truncf %56 : vector<32x128xf32> to vector<32x128xbf16>
    %cst_30 = arith.constant dense<0.000000e+00> : vector<64x128xf32>
    %60 = tpu.matmul %58, %59, %cst_30 {dimension_numbers = #tpu.dot_dimension_numbers<[1], [0], [0], [1], [0, 0, 1, 1], [], []>} : vector<64x32xbf16>, vector<32x128xbf16>, vector<64x128xf32> -> vector<64x128xf32>
    %c3_31 = arith.constant 3 : index
    %c0_32 = arith.constant 0 : index
    %c0_33 = arith.constant 0 : index
    %61 = vector.load %arg5[%c3_31, %c0_32, %c0_33] : memref<12x64x1xf32, #tpu.memory_space<vmem>>, vector<1x64x1xf32>
    %62 = vector.shape_cast %61 : vector<1x64x1xf32> to vector<64x1xf32>
    %63 = vector.broadcast %62 : vector<64x1xf32> to vector<64x128xf32>
    %64 = arith.addf %60, %63 : vector<64x128xf32>
    %65 = vector.extract_strided_slice %64 {offsets = [0, 0], sizes = [32, 128], strides = [1, 1]} : vector<64x128xf32> to vector<32x128xf32>
    %66 = vector.extract_strided_slice %64 {offsets = [32, 0], sizes = [32, 128], strides = [1, 1]} : vector<64x128xf32> to vector<32x128xf32>
    %67 = arith.negf %66 : vector<32x128xf32>
    %68 = math.exp %67 : vector<32x128xf32>
    %cst_34 = arith.constant 1.000000e+00 : f32
    %69 = vector.broadcast %cst_34 : f32 to vector<32x128xf32>
    %70 = arith.addf %69, %68 : vector<32x128xf32>
    %71 = arith.divf %69, %70 : vector<32x128xf32>
    %72 = arith.mulf %65, %71 : vector<32x128xf32>
    %73 = arith.addf %8, %72 : vector<32x128xf32>
    %c0_35 = arith.constant 0 : index
    %c0_36 = arith.constant 0 : index
    %c0_37 = arith.constant 0 : index
    %74 = vector.load %arg6[%c0_35, %c0_36, %c0_37] : memref<5x32x32xbf16, #tpu.memory_space<vmem>>, vector<1x32x32xbf16>
    %75 = vector.shape_cast %74 : vector<1x32x32xbf16> to vector<32x32xbf16>
    %76 = arith.truncf %72 : vector<32x128xf32> to vector<32x128xbf16>
    %cst_38 = arith.constant dense<0.000000e+00> : vector<32x128xf32>
    %77 = tpu.matmul %75, %76, %cst_38 {dimension_numbers = #tpu.dot_dimension_numbers<[1], [0], [0], [1], [0, 0, 1, 1], [], []>} : vector<32x32xbf16>, vector<32x128xbf16>, vector<32x128xf32> -> vector<32x128xf32>
    %c0_39 = arith.constant 0 : index
    %c0_40 = arith.constant 0 : index
    %c0_41 = arith.constant 0 : index
    %78 = vector.load %arg7[%c0_39, %c0_40, %c0_41] : memref<5x32x1xf32, #tpu.memory_space<vmem>>, vector<1x32x1xf32>
    %79 = vector.shape_cast %78 : vector<1x32x1xf32> to vector<32x1xf32>
    %80 = vector.broadcast %79 : vector<32x1xf32> to vector<32x128xf32>
    %81 = arith.addf %77, %80 : vector<32x128xf32>
    %82 = arith.mulf %81, %7 : vector<32x128xf32>
    %cst_42 = arith.constant dense<0xFF800000> : vector<128xf32>
    %83 = vector.multi_reduction <maximumf>, %82, %cst_42 [0] : vector<32x128xf32> to vector<128xf32>
    %84 = vector.shape_cast %83 : vector<128xf32> to vector<1x128xf32>
    %85 = vector.broadcast %84 : vector<1x128xf32> to vector<32x128xf32>
    %86 = arith.subf %82, %85 : vector<32x128xf32>
    %87 = math.exp %86 : vector<32x128xf32>
    %cst_43 = arith.constant dense<0.000000e+00> : vector<128xf32>
    %88 = vector.multi_reduction <add>, %87, %cst_43 [0] : vector<32x128xf32> to vector<128xf32>
    %89 = vector.shape_cast %88 : vector<128xf32> to vector<1x128xf32>
    %90 = tpu.reciprocal %89 {approx = true} : vector<1x128xf32> -> vector<1x128xf32>
    %91 = vector.broadcast %90 : vector<1x128xf32> to vector<32x128xf32>
    %92 = arith.mulf %87, %91 : vector<32x128xf32>
    %93 = arith.mulf %92, %6 : vector<32x128xf32>
    %cst_44 = arith.constant 1.000000e+00 : f32
    %94 = vector.broadcast %cst_44 : f32 to vector<32x128xf32>
    %95 = arith.subf %94, %92 : vector<32x128xf32>
    %cst_45 = arith.constant 9.99999974E-6 : f32
    %96 = vector.broadcast %cst_45 : f32 to vector<32x128xf32>
    %97 = arith.addf %95, %96 : vector<32x128xf32>
    %98 = arith.mulf %7, %97 : vector<32x128xf32>
    %c0_46 = arith.constant 0 : index
    %c0_47 = arith.constant 0 : index
    %c0_48 = arith.constant 0 : index
    %99 = vector.load %arg4[%c0_46, %c0_47, %c0_48] : memref<12x64x32xbf16, #tpu.memory_space<vmem>>, vector<1x64x32xbf16>
    %100 = vector.shape_cast %99 : vector<1x64x32xbf16> to vector<64x32xbf16>
    %101 = arith.truncf %93 : vector<32x128xf32> to vector<32x128xbf16>
    %cst_49 = arith.constant dense<0.000000e+00> : vector<64x128xf32>
    %102 = tpu.matmul %100, %101, %cst_49 {dimension_numbers = #tpu.dot_dimension_numbers<[1], [0], [0], [1], [0, 0, 1, 1], [], []>} : vector<64x32xbf16>, vector<32x128xbf16>, vector<64x128xf32> -> vector<64x128xf32>
    %c0_50 = arith.constant 0 : index
    %c0_51 = arith.constant 0 : index
    %c0_52 = arith.constant 0 : index
    %103 = vector.load %arg5[%c0_50, %c0_51, %c0_52] : memref<12x64x1xf32, #tpu.memory_space<vmem>>, vector<1x64x1xf32>
    %104 = vector.shape_cast %103 : vector<1x64x1xf32> to vector<64x1xf32>
    %105 = vector.broadcast %104 : vector<64x1xf32> to vector<64x128xf32>
    %106 = arith.addf %102, %105 : vector<64x128xf32>
    %107 = vector.extract_strided_slice %106 {offsets = [0, 0], sizes = [32, 128], strides = [1, 1]} : vector<64x128xf32> to vector<32x128xf32>
    %108 = vector.extract_strided_slice %106 {offsets = [32, 0], sizes = [32, 128], strides = [1, 1]} : vector<64x128xf32> to vector<32x128xf32>
    %109 = arith.negf %108 : vector<32x128xf32>
    %110 = math.exp %109 : vector<32x128xf32>
    %cst_53 = arith.constant 1.000000e+00 : f32
    %111 = vector.broadcast %cst_53 : f32 to vector<32x128xf32>
    %112 = arith.addf %111, %110 : vector<32x128xf32>
    %113 = arith.divf %111, %112 : vector<32x128xf32>
    %114 = arith.mulf %107, %113 : vector<32x128xf32>
    %c1_54 = arith.constant 1 : index
    %c0_55 = arith.constant 0 : index
    %c0_56 = arith.constant 0 : index
    %115 = vector.load %arg4[%c1_54, %c0_55, %c0_56] : memref<12x64x32xbf16, #tpu.memory_space<vmem>>, vector<1x64x32xbf16>
    %116 = vector.shape_cast %115 : vector<1x64x32xbf16> to vector<64x32xbf16>
    %117 = arith.truncf %114 : vector<32x128xf32> to vector<32x128xbf16>
    %cst_57 = arith.constant dense<0.000000e+00> : vector<64x128xf32>
    %118 = tpu.matmul %116, %117, %cst_57 {dimension_numbers = #tpu.dot_dimension_numbers<[1], [0], [0], [1], [0, 0, 1, 1], [], []>} : vector<64x32xbf16>, vector<32x128xbf16>, vector<64x128xf32> -> vector<64x128xf32>
    %c1_58 = arith.constant 1 : index
    %c0_59 = arith.constant 0 : index
    %c0_60 = arith.constant 0 : index
    %119 = vector.load %arg5[%c1_58, %c0_59, %c0_60] : memref<12x64x1xf32, #tpu.memory_space<vmem>>, vector<1x64x1xf32>
    %120 = vector.shape_cast %119 : vector<1x64x1xf32> to vector<64x1xf32>
    %121 = vector.broadcast %120 : vector<64x1xf32> to vector<64x128xf32>
    %122 = arith.addf %118, %121 : vector<64x128xf32>
    %123 = vector.extract_strided_slice %122 {offsets = [0, 0], sizes = [32, 128], strides = [1, 1]} : vector<64x128xf32> to vector<32x128xf32>
    %124 = vector.extract_strided_slice %122 {offsets = [32, 0], sizes = [32, 128], strides = [1, 1]} : vector<64x128xf32> to vector<32x128xf32>
    %125 = arith.negf %124 : vector<32x128xf32>
    %126 = math.exp %125 : vector<32x128xf32>
    %cst_61 = arith.constant 1.000000e+00 : f32
    %127 = vector.broadcast %cst_61 : f32 to vector<32x128xf32>
    %128 = arith.addf %127, %126 : vector<32x128xf32>
    %129 = arith.divf %127, %128 : vector<32x128xf32>
    %130 = arith.mulf %123, %129 : vector<32x128xf32>
    %c4 = arith.constant 4 : index
    %c0_62 = arith.constant 0 : index
    %c0_63 = arith.constant 0 : index
    %131 = vector.load %arg4[%c4, %c0_62, %c0_63] : memref<12x64x32xbf16, #tpu.memory_space<vmem>>, vector<1x64x32xbf16>
    %132 = vector.shape_cast %131 : vector<1x64x32xbf16> to vector<64x32xbf16>
    %133 = arith.truncf %130 : vector<32x128xf32> to vector<32x128xbf16>
    %cst_64 = arith.constant dense<0.000000e+00> : vector<64x128xf32>
    %134 = tpu.matmul %132, %133, %cst_64 {dimension_numbers = #tpu.dot_dimension_numbers<[1], [0], [0], [1], [0, 0, 1, 1], [], []>} : vector<64x32xbf16>, vector<32x128xbf16>, vector<64x128xf32> -> vector<64x128xf32>
    %c4_65 = arith.constant 4 : index
    %c0_66 = arith.constant 0 : index
    %c0_67 = arith.constant 0 : index
    %135 = vector.load %arg5[%c4_65, %c0_66, %c0_67] : memref<12x64x1xf32, #tpu.memory_space<vmem>>, vector<1x64x1xf32>
    %136 = vector.shape_cast %135 : vector<1x64x1xf32> to vector<64x1xf32>
    %137 = vector.broadcast %136 : vector<64x1xf32> to vector<64x128xf32>
    %138 = arith.addf %134, %137 : vector<64x128xf32>
    %139 = vector.extract_strided_slice %138 {offsets = [0, 0], sizes = [32, 128], strides = [1, 1]} : vector<64x128xf32> to vector<32x128xf32>
    %140 = vector.extract_strided_slice %138 {offsets = [32, 0], sizes = [32, 128], strides = [1, 1]} : vector<64x128xf32> to vector<32x128xf32>
    %141 = arith.negf %140 : vector<32x128xf32>
    %142 = math.exp %141 : vector<32x128xf32>
    %cst_68 = arith.constant 1.000000e+00 : f32
    %143 = vector.broadcast %cst_68 : f32 to vector<32x128xf32>
    %144 = arith.addf %143, %142 : vector<32x128xf32>
    %145 = arith.divf %143, %144 : vector<32x128xf32>
    %146 = arith.mulf %139, %145 : vector<32x128xf32>
    %c5 = arith.constant 5 : index
    %c0_69 = arith.constant 0 : index
    %c0_70 = arith.constant 0 : index
    %147 = vector.load %arg4[%c5, %c0_69, %c0_70] : memref<12x64x32xbf16, #tpu.memory_space<vmem>>, vector<1x64x32xbf16>
    %148 = vector.shape_cast %147 : vector<1x64x32xbf16> to vector<64x32xbf16>
    %149 = arith.truncf %146 : vector<32x128xf32> to vector<32x128xbf16>
    %cst_71 = arith.constant dense<0.000000e+00> : vector<64x128xf32>
    %150 = tpu.matmul %148, %149, %cst_71 {dimension_numbers = #tpu.dot_dimension_numbers<[1], [0], [0], [1], [0, 0, 1, 1], [], []>} : vector<64x32xbf16>, vector<32x128xbf16>, vector<64x128xf32> -> vector<64x128xf32>
    %c5_72 = arith.constant 5 : index
    %c0_73 = arith.constant 0 : index
    %c0_74 = arith.constant 0 : index
    %151 = vector.load %arg5[%c5_72, %c0_73, %c0_74] : memref<12x64x1xf32, #tpu.memory_space<vmem>>, vector<1x64x1xf32>
    %152 = vector.shape_cast %151 : vector<1x64x1xf32> to vector<64x1xf32>
    %153 = vector.broadcast %152 : vector<64x1xf32> to vector<64x128xf32>
    %154 = arith.addf %150, %153 : vector<64x128xf32>
    %155 = vector.extract_strided_slice %154 {offsets = [0, 0], sizes = [32, 128], strides = [1, 1]} : vector<64x128xf32> to vector<32x128xf32>
    %156 = vector.extract_strided_slice %154 {offsets = [32, 0], sizes = [32, 128], strides = [1, 1]} : vector<64x128xf32> to vector<32x128xf32>
    %157 = arith.negf %156 : vector<32x128xf32>
    %158 = math.exp %157 : vector<32x128xf32>
    %cst_75 = arith.constant 1.000000e+00 : f32
    %159 = vector.broadcast %cst_75 : f32 to vector<32x128xf32>
    %160 = arith.addf %159, %158 : vector<32x128xf32>
    %161 = arith.divf %159, %160 : vector<32x128xf32>
    %162 = arith.mulf %155, %161 : vector<32x128xf32>
    %163 = arith.addf %73, %162 : vector<32x128xf32>
    %c1_76 = arith.constant 1 : index
    %c0_77 = arith.constant 0 : index
    %c0_78 = arith.constant 0 : index
    %164 = vector.load %arg6[%c1_76, %c0_77, %c0_78] : memref<5x32x32xbf16, #tpu.memory_space<vmem>>, vector<1x32x32xbf16>
    %165 = vector.shape_cast %164 : vector<1x32x32xbf16> to vector<32x32xbf16>
    %166 = arith.truncf %162 : vector<32x128xf32> to vector<32x128xbf16>
    %cst_79 = arith.constant dense<0.000000e+00> : vector<32x128xf32>
    %167 = tpu.matmul %165, %166, %cst_79 {dimension_numbers = #tpu.dot_dimension_numbers<[1], [0], [0], [1], [0, 0, 1, 1], [], []>} : vector<32x32xbf16>, vector<32x128xbf16>, vector<32x128xf32> -> vector<32x128xf32>
    %c1_80 = arith.constant 1 : index
    %c0_81 = arith.constant 0 : index
    %c0_82 = arith.constant 0 : index
    %168 = vector.load %arg7[%c1_80, %c0_81, %c0_82] : memref<5x32x1xf32, #tpu.memory_space<vmem>>, vector<1x32x1xf32>
    %169 = vector.shape_cast %168 : vector<1x32x1xf32> to vector<32x1xf32>
    %170 = vector.broadcast %169 : vector<32x1xf32> to vector<32x128xf32>
    %171 = arith.addf %167, %170 : vector<32x128xf32>
    %172 = arith.mulf %171, %98 : vector<32x128xf32>
    %cst_83 = arith.constant dense<0xFF800000> : vector<128xf32>
    %173 = vector.multi_reduction <maximumf>, %172, %cst_83 [0] : vector<32x128xf32> to vector<128xf32>
    %174 = vector.shape_cast %173 : vector<128xf32> to vector<1x128xf32>
    %175 = vector.broadcast %174 : vector<1x128xf32> to vector<32x128xf32>
    %176 = arith.subf %172, %175 : vector<32x128xf32>
    %177 = math.exp %176 : vector<32x128xf32>
    %cst_84 = arith.constant dense<0.000000e+00> : vector<128xf32>
    %178 = vector.multi_reduction <add>, %177, %cst_84 [0] : vector<32x128xf32> to vector<128xf32>
    %179 = vector.shape_cast %178 : vector<128xf32> to vector<1x128xf32>
    %180 = tpu.reciprocal %179 {approx = true} : vector<1x128xf32> -> vector<1x128xf32>
    %181 = vector.broadcast %180 : vector<1x128xf32> to vector<32x128xf32>
    %182 = arith.mulf %177, %181 : vector<32x128xf32>
    %183 = arith.mulf %182, %6 : vector<32x128xf32>
    %cst_85 = arith.constant 1.000000e+00 : f32
    %184 = vector.broadcast %cst_85 : f32 to vector<32x128xf32>
    %185 = arith.subf %184, %182 : vector<32x128xf32>
    %cst_86 = arith.constant 9.99999974E-6 : f32
    %186 = vector.broadcast %cst_86 : f32 to vector<32x128xf32>
    %187 = arith.addf %185, %186 : vector<32x128xf32>
    %188 = arith.mulf %98, %187 : vector<32x128xf32>
    %c0_87 = arith.constant 0 : index
    %c0_88 = arith.constant 0 : index
    %c0_89 = arith.constant 0 : index
    %189 = vector.load %arg4[%c0_87, %c0_88, %c0_89] : memref<12x64x32xbf16, #tpu.memory_space<vmem>>, vector<1x64x32xbf16>
    %190 = vector.shape_cast %189 : vector<1x64x32xbf16> to vector<64x32xbf16>
    %191 = arith.truncf %183 : vector<32x128xf32> to vector<32x128xbf16>
    %cst_90 = arith.constant dense<0.000000e+00> : vector<64x128xf32>
    %192 = tpu.matmul %190, %191, %cst_90 {dimension_numbers = #tpu.dot_dimension_numbers<[1], [0], [0], [1], [0, 0, 1, 1], [], []>} : vector<64x32xbf16>, vector<32x128xbf16>, vector<64x128xf32> -> vector<64x128xf32>
    %c0_91 = arith.constant 0 : index
    %c0_92 = arith.constant 0 : index
    %c0_93 = arith.constant 0 : index
    %193 = vector.load %arg5[%c0_91, %c0_92, %c0_93] : memref<12x64x1xf32, #tpu.memory_space<vmem>>, vector<1x64x1xf32>
    %194 = vector.shape_cast %193 : vector<1x64x1xf32> to vector<64x1xf32>
    %195 = vector.broadcast %194 : vector<64x1xf32> to vector<64x128xf32>
    %196 = arith.addf %192, %195 : vector<64x128xf32>
    %197 = vector.extract_strided_slice %196 {offsets = [0, 0], sizes = [32, 128], strides = [1, 1]} : vector<64x128xf32> to vector<32x128xf32>
    %198 = vector.extract_strided_slice %196 {offsets = [32, 0], sizes = [32, 128], strides = [1, 1]} : vector<64x128xf32> to vector<32x128xf32>
    %199 = arith.negf %198 : vector<32x128xf32>
    %200 = math.exp %199 : vector<32x128xf32>
    %cst_94 = arith.constant 1.000000e+00 : f32
    %201 = vector.broadcast %cst_94 : f32 to vector<32x128xf32>
    %202 = arith.addf %201, %200 : vector<32x128xf32>
    %203 = arith.divf %201, %202 : vector<32x128xf32>
    %204 = arith.mulf %197, %203 : vector<32x128xf32>
    %c1_95 = arith.constant 1 : index
    %c0_96 = arith.constant 0 : index
    %c0_97 = arith.constant 0 : index
    %205 = vector.load %arg4[%c1_95, %c0_96, %c0_97] : memref<12x64x32xbf16, #tpu.memory_space<vmem>>, vector<1x64x32xbf16>
    %206 = vector.shape_cast %205 : vector<1x64x32xbf16> to vector<64x32xbf16>
    %207 = arith.truncf %204 : vector<32x128xf32> to vector<32x128xbf16>
    %cst_98 = arith.constant dense<0.000000e+00> : vector<64x128xf32>
    %208 = tpu.matmul %206, %207, %cst_98 {dimension_numbers = #tpu.dot_dimension_numbers<[1], [0], [0], [1], [0, 0, 1, 1], [], []>} : vector<64x32xbf16>, vector<32x128xbf16>, vector<64x128xf32> -> vector<64x128xf32>
    %c1_99 = arith.constant 1 : index
    %c0_100 = arith.constant 0 : index
    %c0_101 = arith.constant 0 : index
    %209 = vector.load %arg5[%c1_99, %c0_100, %c0_101] : memref<12x64x1xf32, #tpu.memory_space<vmem>>, vector<1x64x1xf32>
    %210 = vector.shape_cast %209 : vector<1x64x1xf32> to vector<64x1xf32>
    %211 = vector.broadcast %210 : vector<64x1xf32> to vector<64x128xf32>
    %212 = arith.addf %208, %211 : vector<64x128xf32>
    %213 = vector.extract_strided_slice %212 {offsets = [0, 0], sizes = [32, 128], strides = [1, 1]} : vector<64x128xf32> to vector<32x128xf32>
    %214 = vector.extract_strided_slice %212 {offsets = [32, 0], sizes = [32, 128], strides = [1, 1]} : vector<64x128xf32> to vector<32x128xf32>
    %215 = arith.negf %214 : vector<32x128xf32>
    %216 = math.exp %215 : vector<32x128xf32>
    %cst_102 = arith.constant 1.000000e+00 : f32
    %217 = vector.broadcast %cst_102 : f32 to vector<32x128xf32>
    %218 = arith.addf %217, %216 : vector<32x128xf32>
    %219 = arith.divf %217, %218 : vector<32x128xf32>
    %220 = arith.mulf %213, %219 : vector<32x128xf32>
    %c6 = arith.constant 6 : index
    %c0_103 = arith.constant 0 : index
    %c0_104 = arith.constant 0 : index
    %221 = vector.load %arg4[%c6, %c0_103, %c0_104] : memref<12x64x32xbf16, #tpu.memory_space<vmem>>, vector<1x64x32xbf16>
    %222 = vector.shape_cast %221 : vector<1x64x32xbf16> to vector<64x32xbf16>
    %223 = arith.truncf %220 : vector<32x128xf32> to vector<32x128xbf16>
    %cst_105 = arith.constant dense<0.000000e+00> : vector<64x128xf32>
    %224 = tpu.matmul %222, %223, %cst_105 {dimension_numbers = #tpu.dot_dimension_numbers<[1], [0], [0], [1], [0, 0, 1, 1], [], []>} : vector<64x32xbf16>, vector<32x128xbf16>, vector<64x128xf32> -> vector<64x128xf32>
    %c6_106 = arith.constant 6 : index
    %c0_107 = arith.constant 0 : index
    %c0_108 = arith.constant 0 : index
    %225 = vector.load %arg5[%c6_106, %c0_107, %c0_108] : memref<12x64x1xf32, #tpu.memory_space<vmem>>, vector<1x64x1xf32>
    %226 = vector.shape_cast %225 : vector<1x64x1xf32> to vector<64x1xf32>
    %227 = vector.broadcast %226 : vector<64x1xf32> to vector<64x128xf32>
    %228 = arith.addf %224, %227 : vector<64x128xf32>
    %229 = vector.extract_strided_slice %228 {offsets = [0, 0], sizes = [32, 128], strides = [1, 1]} : vector<64x128xf32> to vector<32x128xf32>
    %230 = vector.extract_strided_slice %228 {offsets = [32, 0], sizes = [32, 128], strides = [1, 1]} : vector<64x128xf32> to vector<32x128xf32>
    %231 = arith.negf %230 : vector<32x128xf32>
    %232 = math.exp %231 : vector<32x128xf32>
    %cst_109 = arith.constant 1.000000e+00 : f32
    %233 = vector.broadcast %cst_109 : f32 to vector<32x128xf32>
    %234 = arith.addf %233, %232 : vector<32x128xf32>
    %235 = arith.divf %233, %234 : vector<32x128xf32>
    %236 = arith.mulf %229, %235 : vector<32x128xf32>
    %c7 = arith.constant 7 : index
    %c0_110 = arith.constant 0 : index
    %c0_111 = arith.constant 0 : index
    %237 = vector.load %arg4[%c7, %c0_110, %c0_111] : memref<12x64x32xbf16, #tpu.memory_space<vmem>>, vector<1x64x32xbf16>
    %238 = vector.shape_cast %237 : vector<1x64x32xbf16> to vector<64x32xbf16>
    %239 = arith.truncf %236 : vector<32x128xf32> to vector<32x128xbf16>
    %cst_112 = arith.constant dense<0.000000e+00> : vector<64x128xf32>
    %240 = tpu.matmul %238, %239, %cst_112 {dimension_numbers = #tpu.dot_dimension_numbers<[1], [0], [0], [1], [0, 0, 1, 1], [], []>} : vector<64x32xbf16>, vector<32x128xbf16>, vector<64x128xf32> -> vector<64x128xf32>
    %c7_113 = arith.constant 7 : index
    %c0_114 = arith.constant 0 : index
    %c0_115 = arith.constant 0 : index
    %241 = vector.load %arg5[%c7_113, %c0_114, %c0_115] : memref<12x64x1xf32, #tpu.memory_space<vmem>>, vector<1x64x1xf32>
    %242 = vector.shape_cast %241 : vector<1x64x1xf32> to vector<64x1xf32>
    %243 = vector.broadcast %242 : vector<64x1xf32> to vector<64x128xf32>
    %244 = arith.addf %240, %243 : vector<64x128xf32>
    %245 = vector.extract_strided_slice %244 {offsets = [0, 0], sizes = [32, 128], strides = [1, 1]} : vector<64x128xf32> to vector<32x128xf32>
    %246 = vector.extract_strided_slice %244 {offsets = [32, 0], sizes = [32, 128], strides = [1, 1]} : vector<64x128xf32> to vector<32x128xf32>
    %247 = arith.negf %246 : vector<32x128xf32>
    %248 = math.exp %247 : vector<32x128xf32>
    %cst_116 = arith.constant 1.000000e+00 : f32
    %249 = vector.broadcast %cst_116 : f32 to vector<32x128xf32>
    %250 = arith.addf %249, %248 : vector<32x128xf32>
    %251 = arith.divf %249, %250 : vector<32x128xf32>
    %252 = arith.mulf %245, %251 : vector<32x128xf32>
    %253 = arith.addf %163, %252 : vector<32x128xf32>
    %c2_117 = arith.constant 2 : index
    %c0_118 = arith.constant 0 : index
    %c0_119 = arith.constant 0 : index
    %254 = vector.load %arg6[%c2_117, %c0_118, %c0_119] : memref<5x32x32xbf16, #tpu.memory_space<vmem>>, vector<1x32x32xbf16>
    %255 = vector.shape_cast %254 : vector<1x32x32xbf16> to vector<32x32xbf16>
    %256 = arith.truncf %252 : vector<32x128xf32> to vector<32x128xbf16>
    %cst_120 = arith.constant dense<0.000000e+00> : vector<32x128xf32>
    %257 = tpu.matmul %255, %256, %cst_120 {dimension_numbers = #tpu.dot_dimension_numbers<[1], [0], [0], [1], [0, 0, 1, 1], [], []>} : vector<32x32xbf16>, vector<32x128xbf16>, vector<32x128xf32> -> vector<32x128xf32>
    %c2_121 = arith.constant 2 : index
    %c0_122 = arith.constant 0 : index
    %c0_123 = arith.constant 0 : index
    %258 = vector.load %arg7[%c2_121, %c0_122, %c0_123] : memref<5x32x1xf32, #tpu.memory_space<vmem>>, vector<1x32x1xf32>
    %259 = vector.shape_cast %258 : vector<1x32x1xf32> to vector<32x1xf32>
    %260 = vector.broadcast %259 : vector<32x1xf32> to vector<32x128xf32>
    %261 = arith.addf %257, %260 : vector<32x128xf32>
    %262 = arith.mulf %261, %188 : vector<32x128xf32>
    %cst_124 = arith.constant dense<0xFF800000> : vector<128xf32>
    %263 = vector.multi_reduction <maximumf>, %262, %cst_124 [0] : vector<32x128xf32> to vector<128xf32>
    %264 = vector.shape_cast %263 : vector<128xf32> to vector<1x128xf32>
    %265 = vector.broadcast %264 : vector<1x128xf32> to vector<32x128xf32>
    %266 = arith.subf %262, %265 : vector<32x128xf32>
    %267 = math.exp %266 : vector<32x128xf32>
    %cst_125 = arith.constant dense<0.000000e+00> : vector<128xf32>
    %268 = vector.multi_reduction <add>, %267, %cst_125 [0] : vector<32x128xf32> to vector<128xf32>
    %269 = vector.shape_cast %268 : vector<128xf32> to vector<1x128xf32>
    %270 = tpu.reciprocal %269 {approx = true} : vector<1x128xf32> -> vector<1x128xf32>
    %271 = vector.broadcast %270 : vector<1x128xf32> to vector<32x128xf32>
    %272 = arith.mulf %267, %271 : vector<32x128xf32>
    %273 = arith.mulf %272, %6 : vector<32x128xf32>
    %cst_126 = arith.constant 1.000000e+00 : f32
    %274 = vector.broadcast %cst_126 : f32 to vector<32x128xf32>
    %275 = arith.subf %274, %272 : vector<32x128xf32>
    %cst_127 = arith.constant 9.99999974E-6 : f32
    %276 = vector.broadcast %cst_127 : f32 to vector<32x128xf32>
    %277 = arith.addf %275, %276 : vector<32x128xf32>
    %278 = arith.mulf %188, %277 : vector<32x128xf32>
    %c0_128 = arith.constant 0 : index
    %c0_129 = arith.constant 0 : index
    %c0_130 = arith.constant 0 : index
    %279 = vector.load %arg4[%c0_128, %c0_129, %c0_130] : memref<12x64x32xbf16, #tpu.memory_space<vmem>>, vector<1x64x32xbf16>
    %280 = vector.shape_cast %279 : vector<1x64x32xbf16> to vector<64x32xbf16>
    %281 = arith.truncf %273 : vector<32x128xf32> to vector<32x128xbf16>
    %cst_131 = arith.constant dense<0.000000e+00> : vector<64x128xf32>
    %282 = tpu.matmul %280, %281, %cst_131 {dimension_numbers = #tpu.dot_dimension_numbers<[1], [0], [0], [1], [0, 0, 1, 1], [], []>} : vector<64x32xbf16>, vector<32x128xbf16>, vector<64x128xf32> -> vector<64x128xf32>
    %c0_132 = arith.constant 0 : index
    %c0_133 = arith.constant 0 : index
    %c0_134 = arith.constant 0 : index
    %283 = vector.load %arg5[%c0_132, %c0_133, %c0_134] : memref<12x64x1xf32, #tpu.memory_space<vmem>>, vector<1x64x1xf32>
    %284 = vector.shape_cast %283 : vector<1x64x1xf32> to vector<64x1xf32>
    %285 = vector.broadcast %284 : vector<64x1xf32> to vector<64x128xf32>
    %286 = arith.addf %282, %285 : vector<64x128xf32>
    %287 = vector.extract_strided_slice %286 {offsets = [0, 0], sizes = [32, 128], strides = [1, 1]} : vector<64x128xf32> to vector<32x128xf32>
    %288 = vector.extract_strided_slice %286 {offsets = [32, 0], sizes = [32, 128], strides = [1, 1]} : vector<64x128xf32> to vector<32x128xf32>
    %289 = arith.negf %288 : vector<32x128xf32>
    %290 = math.exp %289 : vector<32x128xf32>
    %cst_135 = arith.constant 1.000000e+00 : f32
    %291 = vector.broadcast %cst_135 : f32 to vector<32x128xf32>
    %292 = arith.addf %291, %290 : vector<32x128xf32>
    %293 = arith.divf %291, %292 : vector<32x128xf32>
    %294 = arith.mulf %287, %293 : vector<32x128xf32>
    %c1_136 = arith.constant 1 : index
    %c0_137 = arith.constant 0 : index
    %c0_138 = arith.constant 0 : index
    %295 = vector.load %arg4[%c1_136, %c0_137, %c0_138] : memref<12x64x32xbf16, #tpu.memory_space<vmem>>, vector<1x64x32xbf16>
    %296 = vector.shape_cast %295 : vector<1x64x32xbf16> to vector<64x32xbf16>
    %297 = arith.truncf %294 : vector<32x128xf32> to vector<32x128xbf16>
    %cst_139 = arith.constant dense<0.000000e+00> : vector<64x128xf32>
    %298 = tpu.matmul %296, %297, %cst_139 {dimension_numbers = #tpu.dot_dimension_numbers<[1], [0], [0], [1], [0, 0, 1, 1], [], []>} : vector<64x32xbf16>, vector<32x128xbf16>, vector<64x128xf32> -> vector<64x128xf32>
    %c1_140 = arith.constant 1 : index
    %c0_141 = arith.constant 0 : index
    %c0_142 = arith.constant 0 : index
    %299 = vector.load %arg5[%c1_140, %c0_141, %c0_142] : memref<12x64x1xf32, #tpu.memory_space<vmem>>, vector<1x64x1xf32>
    %300 = vector.shape_cast %299 : vector<1x64x1xf32> to vector<64x1xf32>
    %301 = vector.broadcast %300 : vector<64x1xf32> to vector<64x128xf32>
    %302 = arith.addf %298, %301 : vector<64x128xf32>
    %303 = vector.extract_strided_slice %302 {offsets = [0, 0], sizes = [32, 128], strides = [1, 1]} : vector<64x128xf32> to vector<32x128xf32>
    %304 = vector.extract_strided_slice %302 {offsets = [32, 0], sizes = [32, 128], strides = [1, 1]} : vector<64x128xf32> to vector<32x128xf32>
    %305 = arith.negf %304 : vector<32x128xf32>
    %306 = math.exp %305 : vector<32x128xf32>
    %cst_143 = arith.constant 1.000000e+00 : f32
    %307 = vector.broadcast %cst_143 : f32 to vector<32x128xf32>
    %308 = arith.addf %307, %306 : vector<32x128xf32>
    %309 = arith.divf %307, %308 : vector<32x128xf32>
    %310 = arith.mulf %303, %309 : vector<32x128xf32>
    %c8 = arith.constant 8 : index
    %c0_144 = arith.constant 0 : index
    %c0_145 = arith.constant 0 : index
    %311 = vector.load %arg4[%c8, %c0_144, %c0_145] : memref<12x64x32xbf16, #tpu.memory_space<vmem>>, vector<1x64x32xbf16>
    %312 = vector.shape_cast %311 : vector<1x64x32xbf16> to vector<64x32xbf16>
    %313 = arith.truncf %310 : vector<32x128xf32> to vector<32x128xbf16>
    %cst_146 = arith.constant dense<0.000000e+00> : vector<64x128xf32>
    %314 = tpu.matmul %312, %313, %cst_146 {dimension_numbers = #tpu.dot_dimension_numbers<[1], [0], [0], [1], [0, 0, 1, 1], [], []>} : vector<64x32xbf16>, vector<32x128xbf16>, vector<64x128xf32> -> vector<64x128xf32>
    %c8_147 = arith.constant 8 : index
    %c0_148 = arith.constant 0 : index
    %c0_149 = arith.constant 0 : index
    %315 = vector.load %arg5[%c8_147, %c0_148, %c0_149] : memref<12x64x1xf32, #tpu.memory_space<vmem>>, vector<1x64x1xf32>
    %316 = vector.shape_cast %315 : vector<1x64x1xf32> to vector<64x1xf32>
    %317 = vector.broadcast %316 : vector<64x1xf32> to vector<64x128xf32>
    %318 = arith.addf %314, %317 : vector<64x128xf32>
    %319 = vector.extract_strided_slice %318 {offsets = [0, 0], sizes = [32, 128], strides = [1, 1]} : vector<64x128xf32> to vector<32x128xf32>
    %320 = vector.extract_strided_slice %318 {offsets = [32, 0], sizes = [32, 128], strides = [1, 1]} : vector<64x128xf32> to vector<32x128xf32>
    %321 = arith.negf %320 : vector<32x128xf32>
    %322 = math.exp %321 : vector<32x128xf32>
    %cst_150 = arith.constant 1.000000e+00 : f32
    %323 = vector.broadcast %cst_150 : f32 to vector<32x128xf32>
    %324 = arith.addf %323, %322 : vector<32x128xf32>
    %325 = arith.divf %323, %324 : vector<32x128xf32>
    %326 = arith.mulf %319, %325 : vector<32x128xf32>
    %c9 = arith.constant 9 : index
    %c0_151 = arith.constant 0 : index
    %c0_152 = arith.constant 0 : index
    %327 = vector.load %arg4[%c9, %c0_151, %c0_152] : memref<12x64x32xbf16, #tpu.memory_space<vmem>>, vector<1x64x32xbf16>
    %328 = vector.shape_cast %327 : vector<1x64x32xbf16> to vector<64x32xbf16>
    %329 = arith.truncf %326 : vector<32x128xf32> to vector<32x128xbf16>
    %cst_153 = arith.constant dense<0.000000e+00> : vector<64x128xf32>
    %330 = tpu.matmul %328, %329, %cst_153 {dimension_numbers = #tpu.dot_dimension_numbers<[1], [0], [0], [1], [0, 0, 1, 1], [], []>} : vector<64x32xbf16>, vector<32x128xbf16>, vector<64x128xf32> -> vector<64x128xf32>
    %c9_154 = arith.constant 9 : index
    %c0_155 = arith.constant 0 : index
    %c0_156 = arith.constant 0 : index
    %331 = vector.load %arg5[%c9_154, %c0_155, %c0_156] : memref<12x64x1xf32, #tpu.memory_space<vmem>>, vector<1x64x1xf32>
    %332 = vector.shape_cast %331 : vector<1x64x1xf32> to vector<64x1xf32>
    %333 = vector.broadcast %332 : vector<64x1xf32> to vector<64x128xf32>
    %334 = arith.addf %330, %333 : vector<64x128xf32>
    %335 = vector.extract_strided_slice %334 {offsets = [0, 0], sizes = [32, 128], strides = [1, 1]} : vector<64x128xf32> to vector<32x128xf32>
    %336 = vector.extract_strided_slice %334 {offsets = [32, 0], sizes = [32, 128], strides = [1, 1]} : vector<64x128xf32> to vector<32x128xf32>
    %337 = arith.negf %336 : vector<32x128xf32>
    %338 = math.exp %337 : vector<32x128xf32>
    %cst_157 = arith.constant 1.000000e+00 : f32
    %339 = vector.broadcast %cst_157 : f32 to vector<32x128xf32>
    %340 = arith.addf %339, %338 : vector<32x128xf32>
    %341 = arith.divf %339, %340 : vector<32x128xf32>
    %342 = arith.mulf %335, %341 : vector<32x128xf32>
    %343 = arith.addf %253, %342 : vector<32x128xf32>
    %c3_158 = arith.constant 3 : index
    %c0_159 = arith.constant 0 : index
    %c0_160 = arith.constant 0 : index
    %344 = vector.load %arg6[%c3_158, %c0_159, %c0_160] : memref<5x32x32xbf16, #tpu.memory_space<vmem>>, vector<1x32x32xbf16>
    %345 = vector.shape_cast %344 : vector<1x32x32xbf16> to vector<32x32xbf16>
    %346 = arith.truncf %342 : vector<32x128xf32> to vector<32x128xbf16>
    %cst_161 = arith.constant dense<0.000000e+00> : vector<32x128xf32>
    %347 = tpu.matmul %345, %346, %cst_161 {dimension_numbers = #tpu.dot_dimension_numbers<[1], [0], [0], [1], [0, 0, 1, 1], [], []>} : vector<32x32xbf16>, vector<32x128xbf16>, vector<32x128xf32> -> vector<32x128xf32>
    %c3_162 = arith.constant 3 : index
    %c0_163 = arith.constant 0 : index
    %c0_164 = arith.constant 0 : index
    %348 = vector.load %arg7[%c3_162, %c0_163, %c0_164] : memref<5x32x1xf32, #tpu.memory_space<vmem>>, vector<1x32x1xf32>
    %349 = vector.shape_cast %348 : vector<1x32x1xf32> to vector<32x1xf32>
    %350 = vector.broadcast %349 : vector<32x1xf32> to vector<32x128xf32>
    %351 = arith.addf %347, %350 : vector<32x128xf32>
    %352 = arith.mulf %351, %278 : vector<32x128xf32>
    %cst_165 = arith.constant dense<0xFF800000> : vector<128xf32>
    %353 = vector.multi_reduction <maximumf>, %352, %cst_165 [0] : vector<32x128xf32> to vector<128xf32>
    %354 = vector.shape_cast %353 : vector<128xf32> to vector<1x128xf32>
    %355 = vector.broadcast %354 : vector<1x128xf32> to vector<32x128xf32>
    %356 = arith.subf %352, %355 : vector<32x128xf32>
    %357 = math.exp %356 : vector<32x128xf32>
    %cst_166 = arith.constant dense<0.000000e+00> : vector<128xf32>
    %358 = vector.multi_reduction <add>, %357, %cst_166 [0] : vector<32x128xf32> to vector<128xf32>
    %359 = vector.shape_cast %358 : vector<128xf32> to vector<1x128xf32>
    %360 = tpu.reciprocal %359 {approx = true} : vector<1x128xf32> -> vector<1x128xf32>
    %361 = vector.broadcast %360 : vector<1x128xf32> to vector<32x128xf32>
    %362 = arith.mulf %357, %361 : vector<32x128xf32>
    %363 = arith.mulf %362, %6 : vector<32x128xf32>
    %c0_167 = arith.constant 0 : index
    %c0_168 = arith.constant 0 : index
    %c0_169 = arith.constant 0 : index
    %364 = vector.load %arg4[%c0_167, %c0_168, %c0_169] : memref<12x64x32xbf16, #tpu.memory_space<vmem>>, vector<1x64x32xbf16>
    %365 = vector.shape_cast %364 : vector<1x64x32xbf16> to vector<64x32xbf16>
    %366 = arith.truncf %363 : vector<32x128xf32> to vector<32x128xbf16>
    %cst_170 = arith.constant dense<0.000000e+00> : vector<64x128xf32>
    %367 = tpu.matmul %365, %366, %cst_170 {dimension_numbers = #tpu.dot_dimension_numbers<[1], [0], [0], [1], [0, 0, 1, 1], [], []>} : vector<64x32xbf16>, vector<32x128xbf16>, vector<64x128xf32> -> vector<64x128xf32>
    %c0_171 = arith.constant 0 : index
    %c0_172 = arith.constant 0 : index
    %c0_173 = arith.constant 0 : index
    %368 = vector.load %arg5[%c0_171, %c0_172, %c0_173] : memref<12x64x1xf32, #tpu.memory_space<vmem>>, vector<1x64x1xf32>
    %369 = vector.shape_cast %368 : vector<1x64x1xf32> to vector<64x1xf32>
    %370 = vector.broadcast %369 : vector<64x1xf32> to vector<64x128xf32>
    %371 = arith.addf %367, %370 : vector<64x128xf32>
    %372 = vector.extract_strided_slice %371 {offsets = [0, 0], sizes = [32, 128], strides = [1, 1]} : vector<64x128xf32> to vector<32x128xf32>
    %373 = vector.extract_strided_slice %371 {offsets = [32, 0], sizes = [32, 128], strides = [1, 1]} : vector<64x128xf32> to vector<32x128xf32>
    %374 = arith.negf %373 : vector<32x128xf32>
    %375 = math.exp %374 : vector<32x128xf32>
    %cst_174 = arith.constant 1.000000e+00 : f32
    %376 = vector.broadcast %cst_174 : f32 to vector<32x128xf32>
    %377 = arith.addf %376, %375 : vector<32x128xf32>
    %378 = arith.divf %376, %377 : vector<32x128xf32>
    %379 = arith.mulf %372, %378 : vector<32x128xf32>
    %c1_175 = arith.constant 1 : index
    %c0_176 = arith.constant 0 : index
    %c0_177 = arith.constant 0 : index
    %380 = vector.load %arg4[%c1_175, %c0_176, %c0_177] : memref<12x64x32xbf16, #tpu.memory_space<vmem>>, vector<1x64x32xbf16>
    %381 = vector.shape_cast %380 : vector<1x64x32xbf16> to vector<64x32xbf16>
    %382 = arith.truncf %379 : vector<32x128xf32> to vector<32x128xbf16>
    %cst_178 = arith.constant dense<0.000000e+00> : vector<64x128xf32>
    %383 = tpu.matmul %381, %382, %cst_178 {dimension_numbers = #tpu.dot_dimension_numbers<[1], [0], [0], [1], [0, 0, 1, 1], [], []>} : vector<64x32xbf16>, vector<32x128xbf16>, vector<64x128xf32> -> vector<64x128xf32>
    %c1_179 = arith.constant 1 : index
    %c0_180 = arith.constant 0 : index
    %c0_181 = arith.constant 0 : index
    %384 = vector.load %arg5[%c1_179, %c0_180, %c0_181] : memref<12x64x1xf32, #tpu.memory_space<vmem>>, vector<1x64x1xf32>
    %385 = vector.shape_cast %384 : vector<1x64x1xf32> to vector<64x1xf32>
    %386 = vector.broadcast %385 : vector<64x1xf32> to vector<64x128xf32>
    %387 = arith.addf %383, %386 : vector<64x128xf32>
    %388 = vector.extract_strided_slice %387 {offsets = [0, 0], sizes = [32, 128], strides = [1, 1]} : vector<64x128xf32> to vector<32x128xf32>
    %389 = vector.extract_strided_slice %387 {offsets = [32, 0], sizes = [32, 128], strides = [1, 1]} : vector<64x128xf32> to vector<32x128xf32>
    %390 = arith.negf %389 : vector<32x128xf32>
    %391 = math.exp %390 : vector<32x128xf32>
    %cst_182 = arith.constant 1.000000e+00 : f32
    %392 = vector.broadcast %cst_182 : f32 to vector<32x128xf32>
    %393 = arith.addf %392, %391 : vector<32x128xf32>
    %394 = arith.divf %392, %393 : vector<32x128xf32>
    %395 = arith.mulf %388, %394 : vector<32x128xf32>
    %c10 = arith.constant 10 : index
    %c0_183 = arith.constant 0 : index
    %c0_184 = arith.constant 0 : index
    %396 = vector.load %arg4[%c10, %c0_183, %c0_184] : memref<12x64x32xbf16, #tpu.memory_space<vmem>>, vector<1x64x32xbf16>
    %397 = vector.shape_cast %396 : vector<1x64x32xbf16> to vector<64x32xbf16>
    %398 = arith.truncf %395 : vector<32x128xf32> to vector<32x128xbf16>
    %cst_185 = arith.constant dense<0.000000e+00> : vector<64x128xf32>
    %399 = tpu.matmul %397, %398, %cst_185 {dimension_numbers = #tpu.dot_dimension_numbers<[1], [0], [0], [1], [0, 0, 1, 1], [], []>} : vector<64x32xbf16>, vector<32x128xbf16>, vector<64x128xf32> -> vector<64x128xf32>
    %c10_186 = arith.constant 10 : index
    %c0_187 = arith.constant 0 : index
    %c0_188 = arith.constant 0 : index
    %400 = vector.load %arg5[%c10_186, %c0_187, %c0_188] : memref<12x64x1xf32, #tpu.memory_space<vmem>>, vector<1x64x1xf32>
    %401 = vector.shape_cast %400 : vector<1x64x1xf32> to vector<64x1xf32>
    %402 = vector.broadcast %401 : vector<64x1xf32> to vector<64x128xf32>
    %403 = arith.addf %399, %402 : vector<64x128xf32>
    %404 = vector.extract_strided_slice %403 {offsets = [0, 0], sizes = [32, 128], strides = [1, 1]} : vector<64x128xf32> to vector<32x128xf32>
    %405 = vector.extract_strided_slice %403 {offsets = [32, 0], sizes = [32, 128], strides = [1, 1]} : vector<64x128xf32> to vector<32x128xf32>
    %406 = arith.negf %405 : vector<32x128xf32>
    %407 = math.exp %406 : vector<32x128xf32>
    %cst_189 = arith.constant 1.000000e+00 : f32
    %408 = vector.broadcast %cst_189 : f32 to vector<32x128xf32>
    %409 = arith.addf %408, %407 : vector<32x128xf32>
    %410 = arith.divf %408, %409 : vector<32x128xf32>
    %411 = arith.mulf %404, %410 : vector<32x128xf32>
    %c11 = arith.constant 11 : index
    %c0_190 = arith.constant 0 : index
    %c0_191 = arith.constant 0 : index
    %412 = vector.load %arg4[%c11, %c0_190, %c0_191] : memref<12x64x32xbf16, #tpu.memory_space<vmem>>, vector<1x64x32xbf16>
    %413 = vector.shape_cast %412 : vector<1x64x32xbf16> to vector<64x32xbf16>
    %414 = arith.truncf %411 : vector<32x128xf32> to vector<32x128xbf16>
    %cst_192 = arith.constant dense<0.000000e+00> : vector<64x128xf32>
    %415 = tpu.matmul %413, %414, %cst_192 {dimension_numbers = #tpu.dot_dimension_numbers<[1], [0], [0], [1], [0, 0, 1, 1], [], []>} : vector<64x32xbf16>, vector<32x128xbf16>, vector<64x128xf32> -> vector<64x128xf32>
    %c11_193 = arith.constant 11 : index
    %c0_194 = arith.constant 0 : index
    %c0_195 = arith.constant 0 : index
    %416 = vector.load %arg5[%c11_193, %c0_194, %c0_195] : memref<12x64x1xf32, #tpu.memory_space<vmem>>, vector<1x64x1xf32>
    %417 = vector.shape_cast %416 : vector<1x64x1xf32> to vector<64x1xf32>
    %418 = vector.broadcast %417 : vector<64x1xf32> to vector<64x128xf32>
    %419 = arith.addf %415, %418 : vector<64x128xf32>
    %420 = vector.extract_strided_slice %419 {offsets = [0, 0], sizes = [32, 128], strides = [1, 1]} : vector<64x128xf32> to vector<32x128xf32>
    %421 = vector.extract_strided_slice %419 {offsets = [32, 0], sizes = [32, 128], strides = [1, 1]} : vector<64x128xf32> to vector<32x128xf32>
    %422 = arith.negf %421 : vector<32x128xf32>
    %423 = math.exp %422 : vector<32x128xf32>
    %cst_196 = arith.constant 1.000000e+00 : f32
    %424 = vector.broadcast %cst_196 : f32 to vector<32x128xf32>
    %425 = arith.addf %424, %423 : vector<32x128xf32>
    %426 = arith.divf %424, %425 : vector<32x128xf32>
    %427 = arith.mulf %420, %426 : vector<32x128xf32>
    %428 = arith.addf %343, %427 : vector<32x128xf32>
    %c0_197 = arith.constant 0 : index
    %c0_198 = arith.constant 0 : index
    %429 = vector.load %arg8[%c0_197, %c0_198] : memref<32x128xf32, #tpu.memory_space<vmem>>, vector<32x128xf32>
    tpu.vector_store %arg8[%c0_197, %c0_198], %428 {strides = array<i32>} : memref<32x128xf32, #tpu.memory_space<vmem>>, vector<32x128xf32>,
    return
  }
  func.func @transform_0(%arg0: i32) -> (i32, i32) {
    %c0_i32 = arith.constant 0 : i32
    %c0_i32_0 = arith.constant 0 : i32
    return %c0_i32, %arg0 : i32, i32
  }
  func.func @transform_1(%arg0: i32) -> (i32, i32) {
    %c0_i32 = arith.constant 0 : i32
    %c0_i32_0 = arith.constant 0 : i32
    %c0_i32_1 = arith.constant 0 : i32
    return %c0_i32, %c0_i32_0 : i32, i32
  }
  func.func @transform_2(%arg0: i32) -> (i32, i32) {
    %c0_i32 = arith.constant 0 : i32
    %c0_i32_0 = arith.constant 0 : i32
    %c0_i32_1 = arith.constant 0 : i32
    return %c0_i32, %c0_i32_0 : i32, i32
  }
  func.func @transform_3(%arg0: i32) -> (i32, i32, i32) {
    %c0_i32 = arith.constant 0 : i32
    %c0_i32_0 = arith.constant 0 : i32
    %c0_i32_1 = arith.constant 0 : i32
    %c0_i32_2 = arith.constant 0 : i32
    return %c0_i32, %c0_i32_0, %c0_i32_1 : i32, i32, i32
  }
  func.func @transform_4(%arg0: i32) -> (i32, i32, i32) {
    %c0_i32 = arith.constant 0 : i32
    %c0_i32_0 = arith.constant 0 : i32
    %c0_i32_1 = arith.constant 0 : i32
    %c0_i32_2 = arith.constant 0 : i32
    return %c0_i32, %c0_i32_0, %c0_i32_1 : i32, i32, i32
  }
  func.func @transform_5(%arg0: i32) -> (i32, i32, i32) {
    %c0_i32 = arith.constant 0 : i32
    %c0_i32_0 = arith.constant 0 : i32
    %c0_i32_1 = arith.constant 0 : i32
    %c0_i32_2 = arith.constant 0 : i32
    return %c0_i32, %c0_i32_0, %c0_i32_1 : i32, i32, i32
  }
  func.func @transform_6(%arg0: i32) -> (i32, i32, i32) {
    %c0_i32 = arith.constant 0 : i32
    %c0_i32_0 = arith.constant 0 : i32
    %c0_i32_1 = arith.constant 0 : i32
    %c0_i32_2 = arith.constant 0 : i32
    return %c0_i32, %c0_i32_0, %c0_i32_1 : i32, i32, i32
  }
  func.func @transform_7(%arg0: i32) -> (i32, i32) {
    %c0_i32 = arith.constant 0 : i32
    %c0_i32_0 = arith.constant 0 : i32
    return %c0_i32, %arg0 : i32, i32
  }
}

</mosaic_0001>

<bundles_post_ra>
// kernel: tpu_custom_call.1
= control target key start
LH: loop header
LB: loop body
LE: loop exit
PB: predicated region body
PF: predicated region fallthrough
CT: control target
= control target key end

     0   :  { %12 = vsyncpa [#allocation4], 0  ;;  %s7272_s0 = inlined_call_operand.vmem [shape: f32[32,256], index: 0, kind: input, shape index: {}]   ;;  %s7273_s1 = inlined_call_operand.vmem [shape: f32[32,1], index: 1, kind: input, shape index: {}]   ;;  %s7274_s2 = inlined_call_operand.vmem [shape: f32[32,1], index: 2, kind: input, shape index: {}]   ;;  %s7275_s3 = inlined_call_operand.vmem [shape: bf16[12,64,32], index: 3, kind: input, shape index: {}]   ;;  %s7276_s4 = inlined_call_operand.vmem [shape: f32[12,64,1], index: 4, kind: input, shape index: {}]   ;;  %s7277_s5 = inlined_call_operand.vmem [shape: bf16[5,32,32], index: 5, kind: input, shape index: {}]   ;;  %s7278_s6 = inlined_call_operand.vmem [shape: f32[5,32,1], index: 6, kind: input, shape index: {}]   ;;  %s7279_s7 = inlined_call_operand.hbm [shape: f32[32,256], index: 7, kind: output, shape index: {}]  }
   0x1   :  { %14 = vsyncpa [#allocation4 + $0x1], 0  ;;  %s5463_s24 = smov 0   ;;  %s5465_s25 = smov 0  }
   0x2   :  { %s5467_s26 = smov 0   ;;  %s5469_s27 = smov 0  }
   0x3 LB: > { %s4256_s28 = sadd.s32 4294967295, %s5417_s27   ;;  %s4257_s29 = sadd.s32 4294967294, %s5417_s27   ;;  %s5417_s27 = sphi %s5469_s27, %s7371_s27   ;;  %s5413_s26 = sphi %s5467_s26, %s7370_s26   ;;  %s5409_s25 = sphi %s5465_s25, %s7369_s25   ;;  %s5405_s24 = sphi %s5463_s24, %s7368_s24  }
   0x4   : > { %s5486_s30 = sadd.s32 1, %s5417_s27   ;;  %s27_s8 = sadd.s32 1, %s5413_s26 }
   0x5   : > { %s24_s9 = ssub.s32 %s5417_s27, %s5486_s30  ;;  %p34_p0 = scmp.ne.s32.totalorder %s5413_s26, %s5409_s25 }
   0x6   : > { %p25_p1 = scmp.eq.s32.totalorder %s24_s9, 0  ;;  %p35_p2 = scmp.eq.s32.totalorder %s5417_s27, 0 }
   0x7   : > { %p190_p3 = scmp.eq.s32.totalorder %s4256_s28, 1  ;;  %p195_p4 = scmp.ne.s32.totalorder %s5409_s25, %s5405_s24 }
   0x8   : > { %s5499_s10 = scalar_select %p25_p1, %s5413_s26, %s27_s8  }
   0x9   : > { %p36_p5 = por %p35_p2, %p34_p0  ;;  %p5501_p6 = por %p190_p3, %p34_p0 }
   0xa   : > { %p196_p7 = scmp.eq.s32.totalorder %s4257_s29, 1  ;;  %p4259_p9 = scmp.ge.s32.totalorder %s5417_s27, 2 }
   0xc   : > { %p5505_p8 = por %p196_p7, %p195_p4  ;;  %230 = sbr.rel (%p4259_p9) target bundleno = 25 (0x19), region = 40 }
  0x11   : > { %233 = sbr.rel (!%p36_p5) target bundleno = 25 (0x19), region = 44  ;;  %s235_s13 = sand.u32 (%p36_p5), 1, %s5413_s26  }
  0x12   : > { %s4261_s14 = sshll.u32 (%p36_p5), %s5417_s27, 3  ;;  %s4260_s15 = sshll.u32 (%p36_p5), %s235_s13, 5 }
  0x13   : > { %s239_s18 = scalar_lea.vmem (%p36_p5), %s7272_s0, %s4261_s14  ;;  %s237_s19 = scalar_lea.vmem (%p36_p5), [#allocation2], %s4260_s15 }
  0x14   : > { %v274_v0 = vld [vmem:[%s239_s18] sm:$0xff] (%p36_p5)  ;;  %v276_v1 = vld [vmem:[%s239_s18 + $0x10] sm:$0xff] (%p36_p5) }
  0x15   : > { %v278_v2 = vld [vmem:[%s239_s18 + $0x20] sm:$0xff] (%p36_p5)  ;;  %275 = vst [vmem:[%s237_s19] sm:$0xff] (%p36_p5), %v274_v0  ;;  %v280_v3 = vld [vmem:[%s239_s18 + $0x30] sm:$0xff] (%p36_p5) }
  0x16   : > { %277 = vst [vmem:[%s237_s19 + $0x8] sm:$0xff] %v276_v1 }
  0x17   : > { %279 = vst [vmem:[%s237_s19 + $0x10] sm:$0xff] %v278_v2 }
  0x18   : > { %281 = vst [vmem:[%s237_s19 + $0x18] sm:$0xff] %v280_v3 }
  0x19 PF: > { %p4262_p10 = scmp.ge.s32.totalorder %s5417_s27, 1  ;;  %p286_p11 = scmp.lt.s32.totalorder %s5417_s27, 3 }
  0x1b   : > { %p287_p12 = pnand %p4262_p10, %p286_p11 }
  0x1d   : > { %290 = sbr.rel (%p287_p12) target bundleno = 5583 (0x15cf), region = 82 }
  0x22   : > { %v359_v4 = vld [vmem:[%s7274_s2 + $0x10] sm:$0xff]  ;;  %v329_v6 = vld [vmem:[%s7273_s1] sm:$0xff]  ;;  %v5419_v7 = vmov 0   ;;  %v360_v8 = vld [vmem:[%s7274_s2 + $0x18] sm:$0xff]  ;;  %s293_s22 = sand.u32 1, %s5409_s25   ;;  %vm463_vm0 = vcmask 261120  }
  0x23   : > { %v331_v5 = vld [vmem:[%s7273_s1 + $0x10] sm:$0xff]  ;;  %4962 = vset.pattern.permute.xlu2 %v5419_v7  ;;  %4961 = vset.pattern.permute.xlu1 %v5419_v7  ;;  %v332_v9 = vld [vmem:[%s7273_s1 + $0x18] sm:$0xff]  ;;  %v330_v10 = vld [vmem:[%s7273_s1 + $0x8] sm:$0xff]  ;;  %s5657_s13 = sshll.u32 %s293_s22, 5  ;;  %s4175_s23 = scalar_lea.sflag [#allocation4], %s293_s22 }
  0x24   : > { %4960 = vset.pattern.permute.xlu0 %v5419_v7  ;;  %373 = vperm.xlu1 %4961, %v359_v4   ;;  %v358_v11 = vld [vmem:[%s7274_s2 + $0x8] sm:$0xff]  ;;  %v357_v12 = vld [vmem:[%s7274_s2] sm:$0xff]  ;;  %v401_v13 = vld [vmem:[%s7276_s4 + $0x30] sm:$0xff]  ;;  %s295_s20 = scalar_lea.vmem [#allocation2], %s5657_s13  ;;  %s7224_s17 = scalar_lea.vmem [#allocation3], %s5657_s13 }
  0x25   : > { %345 = vperm.xlu0 %4960, %v331_v5   ;;  %335 = vperm.xlu2 %4962, %v329_v6   ;;  %v399_v14 = vld [vmem:[%s7276_s4 + $0x20] sm:$0xff]  ;;  %v402_v15 = vld [vmem:[%s7276_s4 + $0x38] sm:$0xff]  ;;  %v400_v16 = vld [vmem:[%s7276_s4 + $0x28] sm:$0xff]  ;;  %s4858_s13 = sshll.u32 %s4256_s28, 3  ;;  %s4186_s21 = sshll.u32 %s7224_s17, 4  ;;  %s4187_s21 = int_to_ptr.vmem [resolvable:$true] %s4186_s21 }
  0x26   : > { %v398_v17 = vld [vmem:[%s7276_s4 + $0x18] sm:$0xff]  ;;  %v397_v18 = vld [vmem:[%s7276_s4 + $0x10] sm:$0xff]  ;;  %v395_v19 = vld [vmem:[%s7276_s4] sm:$0xff]  ;;  %s5375_s15 = scalar_lea.hbm %s7279_s7, 64 }
  0x27   : > { %v4303_v20 = vld [vmem:[%s7276_s4 + $0x70] sm:$0xff]  ;;  %v396_v21 = vld [vmem:[%s7276_s4 + $0x8] sm:$0xff]  ;;  %v4304_v22 = vld [vmem:[%s7276_s4 + $0x78] sm:$0xff] }
  0x28   : > { %v4302_v23 = vld [vmem:[%s7276_s4 + $0x68] sm:$0xff]  ;;  %v4301_v24 = vld [vmem:[%s7276_s4 + $0x60] sm:$0xff]  ;;  %v4299_v25 = vld [vmem:[%s7276_s4 + $0x50] sm:$0xff] }
  0x29   : > { %v4297_v26 = vld [vmem:[%s7276_s4 + $0x40] sm:$0xff]  ;;  %v4300_v27 = vld [vmem:[%s7276_s4 + $0x58] sm:$0xff]  ;;  %v4298_v28 = vld [vmem:[%s7276_s4 + $0x48] sm:$0xff] }
  0x2a   : > { %v4344_v29 = vld [vmem:[%s7276_s4 + $0xb8] sm:$0xff]  ;;  %v4343_v30 = vld [vmem:[%s7276_s4 + $0xb0] sm:$0xff]  ;;  %v4341_v31 = vld [vmem:[%s7276_s4 + $0xa0] sm:$0xff] }
  0x2b   : > { %v4339_v32 = vld [vmem:[%s7276_s4 + $0x90] sm:$0xff]  ;;  %v4342_v33 = vld [vmem:[%s7276_s4 + $0xa8] sm:$0xff]  ;;  %v4340_v34 = vld [vmem:[%s7276_s4 + $0x98] sm:$0xff] }
  0x2c   : > { %378 = vperm.xlu1 %4961, %v360_v8   ;;  %v4338_v35 = vld [vmem:[%s7276_s4 + $0x88] sm:$0xff]  ;;  %v4337_v36 = vld [vmem:[%s7276_s4 + $0x80] sm:$0xff]  ;;  %v4383_v37 = vld [vmem:[%s7276_s4 + $0xf0] sm:$0xff] }
  0x2d   : > { %350 = vperm.xlu0 %4960, %v332_v9   ;;  %340 = vperm.xlu2 %4962, %v330_v10   ;;  %v4381_v38 = vld [vmem:[%s7276_s4 + $0xe0] sm:$0xff]  ;;  %v4384_v39 = vld [vmem:[%s7276_s4 + $0xf8] sm:$0xff]  ;;  %v4382_v40 = vld [vmem:[%s7276_s4 + $0xe8] sm:$0xff] }
  0x2e   : > { %v4380_v41 = vld [vmem:[%s7276_s4 + $0xd8] sm:$0xff]  ;;  %v4379_v42 = vld [vmem:[%s7276_s4 + $0xd0] sm:$0xff]  ;;  %v4377_v43 = vld [vmem:[%s7276_s4 + $0xc0] sm:$0xff] }
  0x2f   : > { %v1198_v44 = vld [vmem:[%s7278_s6] sm:$0xff]  ;;  %v4378_v45 = vld [vmem:[%s7276_s4 + $0xc8] sm:$0xff]  ;;  %v1201_v47 = vld [vmem:[%s7278_s6 + $0x18] sm:$0xff] }
  0x30   : > { %v1199_v46 = vld [vmem:[%s7278_s6 + $0x8] sm:$0xff]  ;;  %v1200_v48 = vld [vmem:[%s7278_s6 + $0x10] sm:$0xff]  ;;  %v4447_v52 = vld [vmem:[%s7276_s4 + $0x120] sm:$0xff] }
  0x31   : > { %v4449_v49 = vld [vmem:[%s7276_s4 + $0x130] sm:$0xff]  ;;  %v4450_v54 = vld [vmem:[%s7276_s4 + $0x138] sm:$0xff]  ;;  %v4448_v55 = vld [vmem:[%s7276_s4 + $0x128] sm:$0xff] }
  0x32   : > { %v327_v56 = vld [vmem:[%s295_s20 + $0x10] sm:$0xff]  ;;  %v328_v57 = vld [vmem:[%s295_s20 + $0x18] sm:$0xff]  ;;  %v326_v63 = vld [vmem:[%s295_s20 + $0x8] sm:$0xff] }
  0x33   : > { %v4446_v62 = vld [vmem:[%s7276_s4 + $0x118] sm:$0xff]  ;;  %v4445_v2 = vld [vmem:[%s7276_s4 + $0x110] sm:$0xff]  ;;  %v4443_v3 = vld [vmem:[%s7276_s4 + $0x100] sm:$0xff] }
  0x34   : > { %368 = vperm.xlu1 %4961, %v358_v11   ;;  %v325_v4 = vld [vmem:[%s295_s20] sm:$0xff]  ;;  %s4185_s20 = scalar_lea.hbm %s7279_s7, %s4858_s13 }
  0x35   : > { %363 = vperm.xlu0 %4960, %v357_v12   ;;  %435 = vperm.xlu2 %4962, %v401_v13   ;;  %v4489_v13 = vld [vmem:[%s7276_s4 + $0x170] sm:$0xff]  ;;  %s4188_s28 = sshll.u32 %s4185_s20, 4  ;;  %s4189_s28 = int_to_ptr.hbm [resolvable:$true] %s4188_s28 }
  0x36   : > { %s5369_s29 = sshra.s32 %s4189_s28, 4  ;;  %s5370_s29 = int_to_ptr.hbm [resolvable:$true] %s5369_s29 }
  0x37   : > { %s5371_s8 = scalar_lea.hbm %s5370_s29, 32  ;;  %p5376_p2 = scmp.lt.s32.totalorder %s5370_s29, %s7279_s7 }
  0x38   : > { %p5372_p13 = scmp.ne.s32.totalorder %s5370_s29, %s5371_s8  ;;  %p5377_p3 = scmp.lt.s32.totalorder %s5375_s15, %s5371_s8 }
  0x3a   : > { %p5373_p0 = pnand %p5372_p13, %p5501_p6  ;;  %p5378_p4 = por %p5377_p3, %p5376_p2 }
  0x3c   : > { %425 = vperm.xlu1 %4961, %v399_v14   ;;  %p5374_p1 = pneg %p5373_p0 }
  0x3d   : > { %440 = vperm.xlu0 %4960, %v402_v15   ;;  %430 = vperm.xlu2 %4962, %v400_v16   ;;  %v4444_v15 = vld [vmem:[%s7276_s4 + $0x108] sm:$0xff]  ;;  %v4490_v16 = vld [vmem:[%s7276_s4 + $0x178] sm:$0xff] }
  0x3e   : > { %p5379_p5 = pnand %p5378_p4, %p5374_p1 }
  0x44   : > { %420 = vperm.xlu1 %4961, %v398_v17   ;;  %v4861_v17 = vld [vmem:[%s7275_s3] sm:$0xff] }
  0x45   : > { %415 = vperm.xlu0 %4960, %v397_v18   ;;  %405 = vperm.xlu2 %4962, %v395_v19   ;;  %v4488_v18 = vld [vmem:[%s7276_s4 + $0x168] sm:$0xff]  ;;  %v4487_v19 = vld [vmem:[%s7276_s4 + $0x160] sm:$0xff] }
  0x4c   : > { %637 = vperm.xlu1 %4961, %v4303_v20   ;;  %v4485_v20 = vld [vmem:[%s7276_s4 + $0x150] sm:$0xff] }
  0x4d   : > { %410 = vperm.xlu0 %4960, %v396_v21   ;;  %642 = vperm.xlu2 %4962, %v4304_v22   ;;  %v4483_v21 = vld [vmem:[%s7276_s4 + $0x140] sm:$0xff]  ;;  %v4486_v22 = vld [vmem:[%s7276_s4 + $0x158] sm:$0xff] }
  0x54   : > { %632 = vperm.xlu1 %4961, %v4302_v23   ;;  %v4484_v23 = vld [vmem:[%s7276_s4 + $0x148] sm:$0xff] }
  0x55   : > { %627 = vperm.xlu0 %4960, %v4301_v24   ;;  %617 = vperm.xlu2 %4962, %v4299_v25   ;;  %v4862_v24 = vld [vmem:[%s7275_s3 + $0x8] sm:$0xff] }
  0x56   : > { %v4520_v25 = vld [vmem:[%s7278_s6 + $0x28] sm:$0xff] }
  0x5c   : > { %607 = vperm.xlu1 %4961, %v4297_v26   ;;  %v4519_v26 = vld [vmem:[%s7278_s6 + $0x20] sm:$0xff] }
  0x5d   : > { %622 = vperm.xlu0 %4960, %v4300_v27   ;;  %612 = vperm.xlu2 %4962, %v4298_v28   ;;  %v4521_v27 = vld [vmem:[%s7278_s6 + $0x30] sm:$0xff] }
  0x5e   : > { %v4563_v28 = vld [vmem:[%s7276_s4 + $0x1b0] sm:$0xff] }
  0x64   : > { %843 = vperm.xlu1 %4961, %v4344_v29   ;;  %v4522_v29 = vld [vmem:[%s7278_s6 + $0x38] sm:$0xff] }
  0x65   : > { %838 = vperm.xlu0 %4960, %v4343_v30   ;;  %828 = vperm.xlu2 %4962, %v4341_v31   ;;  %v4564_v30 = vld [vmem:[%s7276_s4 + $0x1b8] sm:$0xff]  ;;  %v4863_v31 = vld [vmem:[%s7275_s3 + $0x10] sm:$0xff] }
  0x6c   : > { %818 = vperm.xlu1 %4961, %v4339_v32   ;;  %v4562_v32 = vld [vmem:[%s7276_s4 + $0x1a8] sm:$0xff] }
  0x6d   : > { %833 = vperm.xlu0 %4960, %v4342_v33   ;;  %823 = vperm.xlu2 %4962, %v4340_v34   ;;  %v4561_v33 = vld [vmem:[%s7276_s4 + $0x1a0] sm:$0xff]  ;;  %v4559_v34 = vld [vmem:[%s7276_s4 + $0x190] sm:$0xff] }
  0x74   : > { %813 = vperm.xlu1 %4961, %v4338_v35   ;;  %v4557_v35 = vld [vmem:[%s7276_s4 + $0x180] sm:$0xff] }
  0x75   : > { %808 = vperm.xlu0 %4960, %v4337_v36   ;;  %1039 = vperm.xlu2 %4962, %v4383_v37   ;;  %v4560_v36 = vld [vmem:[%s7276_s4 + $0x198] sm:$0xff]  ;;  %v4558_v37 = vld [vmem:[%s7276_s4 + $0x188] sm:$0xff] }
  0x7c   : > { %1029 = vperm.xlu1 %4961, %v4381_v38   ;;  %v4864_v38 = vld [vmem:[%s7275_s3 + $0x18] sm:$0xff] }
  0x7d   : > { %1044 = vperm.xlu0 %4960, %v4384_v39   ;;  %1034 = vperm.xlu2 %4962, %v4382_v40   ;;  %v4604_v39 = vld [vmem:[%s7276_s4 + $0x1f8] sm:$0xff]  ;;  %v4603_v40 = vld [vmem:[%s7276_s4 + $0x1f0] sm:$0xff] }
  0x7f   : > { %v336_v53 = vpop.permute.xlu2 %335 }
  0x80   : > { %v353_v8 = vmul.f32 %v336_v53, %v325_v4  ;;  %v4675_v53 = vld [vmem:[%s7276_s4 + $0x220] sm:$0xff] }
  0x81   : > { %v4747_v4 = vld [vmem:[%s7278_s6 + $0x60] sm:$0xff] }
  0x84   : > { %1024 = vperm.xlu1 %4961, %v4380_v41   ;;  %v4601_v41 = vld [vmem:[%s7276_s4 + $0x1e0] sm:$0xff] }
  0x85   : > { %1019 = vperm.xlu0 %4960, %v4379_v42   ;;  %1009 = vperm.xlu2 %4962, %v4377_v43   ;;  %v4599_v42 = vld [vmem:[%s7276_s4 + $0x1d0] sm:$0xff]  ;;  %v4602_v43 = vld [vmem:[%s7276_s4 + $0x1e8] sm:$0xff] }
  0x87   : > { %v341_v5 = vpop.permute.xlu2 %340 }
  0x88   : > { %v354_v7 = vmul.f32 %v341_v5, %v326_v63  ;;  %v4714_v63 = vld [vmem:[%s7276_s4 + $0x258] sm:$0xff]  ;;  %v4712_v5 = vld [vmem:[%s7276_s4 + $0x248] sm:$0xff] }
  0x8c   : > { %1204 = vperm.xlu1 %4961, %v1198_v44   ;;  %v4600_v44 = vld [vmem:[%s7276_s4 + $0x1d8] sm:$0xff] }
  0x8d   : > { %1014 = vperm.xlu0 %4960, %v4378_v45   ;;  %1209 = vperm.xlu2 %4962, %v1199_v46   ;;  %v4598_v45 = vld [vmem:[%s7276_s4 + $0x1c8] sm:$0xff]  ;;  %v4597_v46 = vld [vmem:[%s7276_s4 + $0x1c0] sm:$0xff] }
  0x94   : > { %1219 = vperm.xlu1 %4961, %v1201_v47   ;;  %v4633_v47 = vld [vmem:[%s7278_s6 + $0x40] sm:$0xff] }
  0x95   : > { %1214 = vperm.xlu0 %4960, %v1200_v48   ;;  %1578 = vperm.xlu2 %4962, %v4449_v49   ;;  %v4635_v48 = vld [vmem:[%s7278_s6 + $0x50] sm:$0xff]  ;;  %v4634_v49 = vld [vmem:[%s7278_s6 + $0x48] sm:$0xff] }
  0x96   : > { %v374_v50 = vpop.permute.xlu1 %373 }
  0x97   : > { %v346_v51 = vpop.permute.xlu0 %345 }
  0x98   : > { %v355_v58 = vmul.f32 %v346_v51, %v327_v56  ;;  %v4678_v51 = vld [vmem:[%s7276_s4 + $0x238] sm:$0xff] }
  0x99   : > { %v4674_v56 = vld [vmem:[%s7276_s4 + $0x218] sm:$0xff] }
  0x9a   : > { %v5672_v0 = vadd.f32 %v374_v50, %v355_v58  ;;  %v4636_v50 = vld [vmem:[%s7278_s6 + $0x58] sm:$0xff]  ;;  %v4671_v58 = vld [vmem:[%s7276_s4 + $0x200] sm:$0xff] }
  0x9c   : > { %1568 = vperm.xlu1 %4961, %v4447_v52   ;;  %v4677_v52 = vld [vmem:[%s7276_s4 + $0x230] sm:$0xff] }
  0x9d   : > { %1583 = vperm.xlu0 %4960, %v4450_v54   ;;  %1573 = vperm.xlu2 %4962, %v4448_v55   ;;  %v4673_v54 = vld [vmem:[%s7276_s4 + $0x210] sm:$0xff]  ;;  %v4676_v55 = vld [vmem:[%s7276_s4 + $0x228] sm:$0xff] }
  0x9e   : > { %v379_v59 = vpop.permute.xlu1 %378 }
  0x9f   : > { %v351_v60 = vpop.permute.xlu0 %350 }
  0xa0   : > { %v356_v61 = vmul.f32 %v351_v60, %v328_v57  ;;  %v4672_v57 = vld [vmem:[%s7276_s4 + $0x208] sm:$0xff]  ;;  %v4715_v60 = vld [vmem:[%s7276_s4 + $0x260] sm:$0xff] }
  0xa2   : > { %v5674_v1 = vadd.f32 %v379_v59, %v356_v61  ;;  %v4717_v59 = vld [vmem:[%s7276_s4 + $0x270] sm:$0xff]  ;;  %v4718_v61 = vld [vmem:[%s7276_s4 + $0x278] sm:$0xff] }
  0xa4   : > { %1563 = vperm.xlu1 %4961, %v4446_v62   ;;  %v394_v6 = vpack.c.bf16 %v5674_v1, %v5672_v0  ;;  %v4716_v62 = vld [vmem:[%s7276_s4 + $0x268] sm:$0xff] }
  0xa5   : > { %1558 = vperm.xlu0 %4960, %v4445_v2   ;;  %1548 = vperm.xlu2 %4962, %v4443_v3   ;;  %v4713_v2 = vld [vmem:[%s7276_s4 + $0x250] sm:$0xff]  ;;  %v4711_v3 = vld [vmem:[%s7276_s4 + $0x240] sm:$0xff] }
  0xa6   : > { %482 = vmatpush.bf16.msra.mxu0 %v394_v6  ;;  %v369_v9 = vpop.permute.xlu1 %368  ;;  %v4748_v6 = vld [vmem:[%s7278_s6 + $0x68] sm:$0xff] }
  0xa7   : > { %v5684_v10 = vadd.f32 %v369_v9, %v354_v7  ;;  %v364_v11 = vpop.permute.xlu0 %363  ;;  %v4749_v9 = vld [vmem:[%s7278_s6 + $0x70] sm:$0xff] }
  0xa8   : > { %v5686_v12 = vadd.f32 %v364_v11, %v353_v8  ;;  %v4750_v8 = vld [vmem:[%s7278_s6 + $0x78] sm:$0xff]  ;;  %v4791_v11 = vld [vmem:[%s7276_s4 + $0x2b0] sm:$0xff] }
  0xaa   : > { %v393_v14 = vpack.c.bf16 %v5684_v10, %v5686_v12 }
  0xac   : > { %483 = vmatpush.bf16.msra.mxu0 %v393_v14  ;;  %1779 = vperm.xlu1 %4961, %v4489_v13   ;;  %v4789_v14 = vld [vmem:[%s7276_s4 + $0x2a0] sm:$0xff] }
  0xad   : > { %1553 = vperm.xlu0 %4960, %v4444_v15   ;;  %1784 = vperm.xlu2 %4962, %v4490_v16   ;;  %v4792_v15 = vld [vmem:[%s7276_s4 + $0x2b8] sm:$0xff]  ;;  %v4790_v16 = vld [vmem:[%s7276_s4 + $0x2a8] sm:$0xff] }
  0xaf   : > { %4281 = vmatmul.msk.bf16.vlgmr.msra.gmra.mxu0 %vm463_vm0, %v4861_v17 }
  0xb4   : > { %1774 = vperm.xlu1 %4961, %v4488_v18   ;;  %v4788_v18 = vld [vmem:[%s7276_s4 + $0x298] sm:$0xff] }
  0xb5   : > { %1769 = vperm.xlu0 %4960, %v4487_v19   ;;  %1759 = vperm.xlu2 %4962, %v4485_v20   ;;  %v4787_v19 = vld [vmem:[%s7276_s4 + $0x290] sm:$0xff]  ;;  %v4785_v20 = vld [vmem:[%s7276_s4 + $0x280] sm:$0xff] }
  0xbc   : > { %1749 = vperm.xlu1 %4961, %v4483_v21  }
  0xbd   : > { %1764 = vperm.xlu0 %4960, %v4486_v22   ;;  %1754 = vperm.xlu2 %4962, %v4484_v23   ;;  %v4829_v22 = vld [vmem:[%s7276_s4 + $0x2e0] sm:$0xff]  ;;  %v5897_v23 = vpop.permute.xlu2 %435 }
  0xbf   : > { %4282 = vmatmul.msk.bf16.gmra.mxu0 %vm463_vm0, %v4862_v24  ;;  %v4786_v24 = vld [vmem:[%s7276_s4 + $0x288] sm:$0xff] }
  0xc4   : > { %1951 = vperm.xlu1 %4961, %v4520_v25   ;;  %v4830_v25 = vld [vmem:[%s7276_s4 + $0x2e8] sm:$0xff] }
  0xc5   : > { %1946 = vperm.xlu0 %4960, %v4519_v26   ;;  %1956 = vperm.xlu2 %4962, %v4521_v27   ;;  %v5905_v27 = vpop.permute.xlu1 %425 }
  0xcc   : > { %2328 = vperm.xlu1 %4961, %v4563_v28   ;;  %v4832_v28 = vld [vmem:[%s7276_s4 + $0x2f8] sm:$0xff] }
  0xcd   : > { %1961 = vperm.xlu0 %4960, %v4522_v29   ;;  %2333 = vperm.xlu2 %4962, %v4564_v30   ;;  %v4831_v30 = vld [vmem:[%s7276_s4 + $0x2f0] sm:$0xff] }
  0xcf   : > { %4283 = vmatmul.msk.bf16.gmra.mxu0 %vm463_vm0, %v4863_v31  ;;  %v4825_v31 = vld [vmem:[%s7276_s4 + $0x2c0] sm:$0xff] }
  0xd4   : > { %2323 = vperm.xlu1 %4961, %v4562_v32   ;;  %v5917_v32 = vpop.permute.xlu2 %430 }
  0xd5   : > { %2318 = vperm.xlu0 %4960, %v4561_v33   ;;  %2308 = vperm.xlu2 %4962, %v4559_v34  }
  0xdc   : > { %2298 = vperm.xlu1 %4961, %v4557_v35  }
  0xdd   : > { %2313 = vperm.xlu0 %4960, %v4560_v36   ;;  %2303 = vperm.xlu2 %4962, %v4558_v37   ;;  %v4827_v37 = vld [vmem:[%s7276_s4 + $0x2d0] sm:$0xff] }
  0xdf   : > { %4284 = vmatmul.msk.bf16.gmra.mxu0 %vm463_vm0, %v4864_v38  ;;  %v4826_v38 = vld [vmem:[%s7276_s4 + $0x2c8] sm:$0xff] }
  0xe4   : > { %2534 = vperm.xlu1 %4961, %v4604_v39   ;;  %v4828_v39 = vld [vmem:[%s7276_s4 + $0x2d8] sm:$0xff] }
  0xe5   : > { %2529 = vperm.xlu0 %4960, %v4603_v40   ;;  %2519 = vperm.xlu2 %4962, %v4601_v41  }
  0xec   : > { %2509 = vperm.xlu1 %4961, %v4599_v42  }
  0xed   : > { %2524 = vperm.xlu0 %4960, %v4602_v43   ;;  %2514 = vperm.xlu2 %4962, %v4600_v44  }
  0xf4   : > { %2504 = vperm.xlu1 %4961, %v4598_v45  }
  0xf5   : > { %2499 = vperm.xlu0 %4960, %v4597_v46   ;;  %2696 = vperm.xlu2 %4962, %v4633_v47   ;;  %v5934_v47 = vpop.permute.xlu0 %440 }
  0xfc   : > { %2706 = vperm.xlu1 %4961, %v4635_v48  }
  0xfd   : > { %2701 = vperm.xlu0 %4960, %v4634_v49   ;;  %2711 = vperm.xlu2 %4962, %v4636_v50  }
 0x104   : > { %3083 = vperm.xlu1 %4961, %v4678_v51  }
 0x105   : > { %3078 = vperm.xlu0 %4960, %v4677_v52   ;;  %3068 = vperm.xlu2 %4962, %v4675_v53  }
 0x10c   : > { %3058 = vperm.xlu1 %4961, %v4673_v54  }
 0x10d   : > { %3073 = vperm.xlu0 %4960, %v4676_v55   ;;  %3063 = vperm.xlu2 %4962, %v4674_v56  }
 0x114   : > { %3053 = vperm.xlu1 %4961, %v4672_v57  }
 0x115   : > { %3048 = vperm.xlu0 %4960, %v4671_v58   ;;  %3279 = vperm.xlu2 %4962, %v4717_v59  }
 0x11c   : > { %3269 = vperm.xlu1 %4961, %v4715_v60  }
 0x11d   : > { %3284 = vperm.xlu0 %4960, %v4718_v61   ;;  %3274 = vperm.xlu2 %4962, %v4716_v62  }
 0x124   : > { %3264 = vperm.xlu1 %4961, %v4714_v63  }
 0x125   : > { %3259 = vperm.xlu0 %4960, %v4713_v2   ;;  %3249 = vperm.xlu2 %4962, %v4711_v3  }
 0x12c   : > { %v5859_v7 = vpop.f32.mrf.mxu0  ;;  %3446 = vperm.xlu1 %4961, %v4747_v4  }
 0x12d   : > { %3254 = vperm.xlu0 %4960, %v4712_v5   ;;  %3451 = vperm.xlu2 %4962, %v4748_v6   ;;  %v5948_v5 = vpop.permute.xlu0 %415 }
 0x12e   : > { %7288 = vst [vmem:[#allocation6_spill] sm:$0xff] %v5948_v5 }
 0x134   : > { %v5870_v13 = vpop.f32.mrf.mxu0  ;;  %3461 = vperm.xlu1 %4961, %v4750_v8  }
 0x135   : > { %3456 = vperm.xlu0 %4960, %v4749_v9   ;;  %3816 = vperm.xlu2 %4962, %v4791_v11  }
 0x13c   : > { %v5881_v17 = vpop.f32.mrf.mxu0  ;;  %3806 = vperm.xlu1 %4961, %v4789_v14  }
 0x13d   : > { %3821 = vperm.xlu0 %4960, %v4792_v15   ;;  %3811 = vperm.xlu2 %4962, %v4790_v16   ;;  %v491_v8 = vadd.f32 %v5881_v17, %v5948_v5 }
 0x144   : > { %v5892_v21 = vpop.f32.mrf.mxu0  ;;  %3801 = vperm.xlu1 %4961, %v4788_v18  }
 0x145   : > { %3796 = vperm.xlu0 %4960, %v4787_v19   ;;  %3786 = vperm.xlu2 %4962, %v4785_v20  }
 0x14c   : > { %v495_v26 = vpop.f32.mrf.mxu0  ;;  %4007 = vperm.xlu1 %4961, %v4829_v22  }
 0x14d   : > { %3791 = vperm.xlu0 %4960, %v4786_v24   ;;  %4012 = vperm.xlu2 %4962, %v4830_v25   ;;  %v496_v29 = vadd.f32 %v495_v26, %v5905_v27 }
 0x14f   : > { %v4285_v35 = vmul.f32 -1.442695, %v496_v29 }
 0x154   : > { %v497_v33 = vpop.f32.mrf.mxu0  ;;  %4022 = vperm.xlu1 %4961, %v4832_v28  }
 0x155   : > { %v498_v34 = vadd.f32 %v497_v33, %v5917_v32  ;;  %4017 = vperm.xlu0 %4960, %v4831_v30   ;;  %3987 = vperm.xlu2 %4962, %v4825_v31  }
 0x157   : > { %v4286_v36 = vmul.f32 -1.442695, %v498_v34  ;;  %v5977_v34 = vpop.permute.xlu1 %420 }
 0x159   : > { %4963 = vpow2.f32 %v4286_v36 }
 0x15a   : > { %4965 = vpow2.f32 %v4285_v35 }
 0x15c   : > { %v500_v40 = vpop.f32.mrf.mxu0  ;;  %3997 = vperm.xlu1 %4961, %v4827_v37  }
 0x15d   : > { %v501_v41 = vadd.f32 %v500_v40, %v5897_v23  ;;  %3992 = vperm.xlu0 %4960, %v4826_v38   ;;  %4002 = vperm.xlu2 %4962, %v4828_v39   ;;  %v493_v38 = vadd.f32 %v5892_v21, %v5977_v34 }
 0x15f   : > { %v4964_v42 = vpop.eup %4963  ;;  %v4287_v43 = vmul.f32 -1.442695, %v501_v41 }
 0x160   : > { %v4966_v44 = vpop.eup %4965  ;;  %v5930_v45 = vadd.f32 1.0, %v4964_v42 }
 0x161   : > { %4967 = vpow2.f32 %v4287_v43  ;;  %v5932_v46 = vadd.f32 1.0, %v4966_v44  ;;  %v5994_v44 = vpop.permute.xlu0 %410 }
 0x162   : > { %4969 = vrcp.f32 %v5930_v45  ;;  %vm541_vm3 = vweird.f32 %v5930_v45  ;;  %v545_v22 = vand.u32 2147483647, %v5930_v45  ;;  %v547_v24 = vand.u32 2147483648, %v5930_v45 }
 0x163   : > { %4971 = vrcp.f32 %v5932_v46  ;;  %vm526_vm8 = vweird.f32 %v5932_v46  ;;  %v530_v30 = vand.u32 2147483647, %v5932_v46  ;;  %v532_v31 = vand.u32 2147483648, %v5932_v46 }
 0x164   : > { %v502_v48 = vpop.f32.mrf.mxu0  ;;  %v548_v41 = vor.u32 1.1754944e-38, %v547_v24  ;;  %vm546_vm15 = vcmp.eq.f32.partialorder %v545_v22, 8.507059e+37  ;;  %v488_v21 = vadd.f32 %v5870_v13, %v5994_v44  ;;  %v4866_v13 = vld [vmem:[%s7275_s3 + $0x28] sm:$0xff] }
 0x165   : > { %v503_v49 = vadd.f32 %v502_v48, %v5934_v47 }
 0x167   : > { %v4968_v50 = vpop.eup %4967  ;;  %v4288_v51 = vmul.f32 -1.442695, %v503_v49 }
 0x168   : > { %v519_v52 = vadd.f32 1.0, %v4968_v50  ;;  %v5939_v53 = vpop.eup %4969 }
 0x169   : > { %4973 = vpow2.f32 %v4288_v51  ;;  %v5941_v54 = vpop.eup %4971  ;;  %v537_v56 = vmul.f32 %v5939_v53, %v5930_v45  ;;  %vm542_vm4 = vweird.f32 %v5939_v53  ;;  %v5998_v51 = vpop.permute.xlu2 %405 }
 0x16a   : > { %4975 = vrcp.f32 %v519_v52  ;;  %v522_v59 = vmul.f32 %v5941_v54, %v5932_v46  ;;  %v562_v14 = vand.u32 2147483648, %v519_v52  ;;  %vm527_vm2 = vweird.f32 %v5941_v54  ;;  %vm5973_vm9 = vmor %vm541_vm3, %vm542_vm4 }
 0x16b   : > { %v538_v62 = vsub.f32 1.0, %v537_v56  ;;  %vm556_vm5 = vweird.f32 %v519_v52  ;;  %v560_v15 = vand.u32 2147483647, %v519_v52  ;;  %vm5981_vm12 = vmor %vm526_vm8, %vm527_vm2  ;;  %v533_v46 = vor.u32 1.1754944e-38, %v532_v31 }
 0x16c   : > { %v523_v63 = vsub.f32 1.0, %v522_v59  ;;  %v563_v29 = vor.u32 1.1754944e-38, %v562_v14  ;;  %v4868_v59 = vld [vmem:[%s7275_s3 + $0x38] sm:$0xff] }
 0x16d   : > { %v539_v3 = vmul.f32 %v5939_v53, %v538_v62  ;;  %vm561_vm10 = vcmp.eq.f32.partialorder %v560_v15, 8.507059e+37 }
 0x16e   : > { %v524_v6 = vmul.f32 %v5941_v54, %v523_v63 }
 0x16f   : > { %v4974_v55 = vpop.eup %4973  ;;  %v540_v18 = vadd.f32 %v5939_v53, %v539_v3 }
 0x170   : > { %v4976_v57 = vpop.eup %4975  ;;  %v520_v58 = vadd.f32 1.0, %v4974_v55  ;;  %v525_v20 = vadd.f32 %v5941_v54, %v524_v6 }
 0x171   : > { %v552_v60 = vmul.f32 %v4976_v57, %v519_v52  ;;  %vm557_vm1 = vweird.f32 %v4976_v57  ;;  %v544_v37 = vsel %vm5973_vm9, %v5939_v53, %v540_v18  ;;  %v486_v53 = vadd.f32 %v5859_v7, %v5998_v51  ;;  %v4867_v7 = vld [vmem:[%s7275_s3 + $0x30] sm:$0xff] }
 0x172   : > { %4977 = vrcp.f32 %v520_v58  ;;  %vm5957_vm6 = vmor %vm556_vm5, %vm557_vm1  ;;  %v577_v17 = vand.u32 2147483648, %v520_v58  ;;  %v575_v28 = vand.u32 2147483647, %v520_v58  ;;  %vm571_vm11 = vweird.f32 %v520_v58 }
 0x173   : > { %v553_v61 = vsub.f32 1.0, %v552_v60  ;;  %v529_v43 = vsel %vm5981_vm12, %v5941_v54, %v525_v20  ;;  %v549_v48 = vsel %vm546_vm15, %v548_v41, %v544_v37  ;;  %vm531_vm1 = vcmp.eq.f32.partialorder %v530_v30, 8.507059e+37 }
 0x174   : > { %v578_v40 = vor.u32 1.1754944e-38, %v577_v17  ;;  %vm576_vm14 = vcmp.eq.f32.partialorder %v575_v28, 8.507059e+37  ;;  %v534_v52 = vsel %vm531_vm1, %v533_v46, %v529_v43  ;;  %v582_v54 = vmul.f32 %v549_v48, %v488_v21 }
 0x175   : > { %v554_v2 = vmul.f32 %v4976_v57, %v553_v61  ;;  %v581_v56 = vmul.f32 %v534_v52, %v486_v53 }
 0x177   : > { %v555_v9 = vadd.f32 %v4976_v57, %v554_v2  ;;  %v6024_v2 = vpop.permute.xlu1 %637 }
 0x178   : > { %v4978_v4 = vpop.eup %4977 }
 0x179   : > { %v567_v11 = vmul.f32 %v4978_v4, %v520_v58  ;;  %v559_v25 = vsel %vm5957_vm6, %v4976_v57, %v555_v9  ;;  %vm572_vm7 = vweird.f32 %v4978_v4  ;;  %v594_v57 = vpack.c.bf16 %v582_v54, %v581_v56  ;;  %v4865_v58 = vld [vmem:[%s7275_s3 + $0x20] sm:$0xff] }
 0x17a   : > { %v564_v39 = vsel %vm561_vm10, %v563_v29, %v559_v25  ;;  %vm573_vm13 = vmor %vm571_vm11, %vm572_vm7  ;;  %v6037_v25 = vpop.permute.xlu2 %642 }
 0x17b   : > { %v568_v16 = vsub.f32 1.0, %v567_v11  ;;  %v583_v49 = vmul.f32 %v564_v39, %v491_v8 }
 0x17d   : > { %v569_v26 = vmul.f32 %v4978_v4, %v568_v16 }
 0x17f   : > { %v570_v35 = vadd.f32 %v4978_v4, %v569_v26  ;;  %v6029_v8 = vpop.permute.xlu1 %632 }
 0x181   : > { %v574_v42 = vsel %vm573_vm13, %v4978_v4, %v570_v35  ;;  %v6026_v4 = vpop.permute.xlu0 %627 }
 0x182   : > { %v579_v45 = vsel %vm576_vm14, %v578_v40, %v574_v42 }
 0x183   : > { %v584_v50 = vmul.f32 %v579_v45, %v493_v38 }
 0x185   : > { %v595_v55 = vpack.c.bf16 %v584_v50, %v583_v49  ;;  %v6051_v49 = vpop.permute.xlu2 %617 }
 0x186   : > { %7295 = vst [vmem:[#allocation7_spill] sm:$0xff] %v6051_v49 }
 0x187   : > { %683 = vmatpush.bf16.msra.mxu1 %v595_v55 }
 0x18b   : > { %684 = vmatpush.bf16.msra.mxu1 %v594_v57 }
 0x18e   : > { %4321 = vmatmul.msk.bf16.vlgmr.msra.gmra.mxu1 %vm463_vm0, %v4865_v58 }
 0x19e   : > { %4322 = vmatmul.msk.bf16.gmra.mxu1 %vm463_vm0, %v4866_v13 }
 0x1ae   : > { %4323 = vmatmul.msk.bf16.gmra.mxu1 %vm463_vm0, %v4867_v7 }
 0x1be   : > { %4324 = vmatmul.msk.bf16.gmra.mxu1 %vm463_vm0, %v4868_v59 }
 0x20b   : > { %v6018_v60 = vpop.f32.mrf.mxu1 }
 0x213   : > { %v6020_v61 = vpop.f32.mrf.mxu1 }
 0x21b   : > { %v691_v62 = vpop.f32.mrf.mxu1 }
 0x21c   : > { %v692_v52 = vadd.f32 %v691_v62, %v6051_v49 }
 0x223   : > { %v6022_v63 = vpop.f32.mrf.mxu1 }
 0x22b   : > { %v696_v3 = vpop.f32.mrf.mxu1 }
 0x22c   : > { %v697_v6 = vadd.f32 %v696_v3, %v6026_v4 }
 0x22e   : > { %v4325_v14 = vmul.f32 -1.442695, %v697_v6 }
 0x233   : > { %v698_v9 = vpop.f32.mrf.mxu1 }
 0x234   : > { %v699_v11 = vadd.f32 %v698_v9, %v6029_v8 }
 0x236   : > { %v4326_v15 = vmul.f32 -1.442695, %v699_v11 }
 0x238   : > { %4979 = vpow2.f32 %v4326_v15 }
 0x239   : > { %4981 = vpow2.f32 %v4325_v14 }
 0x23b   : > { %v701_v16 = vpop.f32.mrf.mxu1 }
 0x23c   : > { %v702_v18 = vadd.f32 %v701_v16, %v6024_v2 }
 0x23e   : > { %v4980_v19 = vpop.eup %4979  ;;  %v4327_v17 = vmul.f32 -1.442695, %v702_v18 }
 0x23f   : > { %v4982_v20 = vpop.eup %4981  ;;  %v6033_v22 = vadd.f32 1.0, %v4980_v19  ;;  %v6079_v19 = vpop.permute.xlu0 %622 }
 0x240   : > { %4983 = vpow2.f32 %v4327_v17  ;;  %v6035_v24 = vadd.f32 1.0, %v4982_v20  ;;  %7300 = vst [vmem:[#allocation8_spill] sm:$0xff] %v6079_v19 }
 0x241   : > { %4985 = vrcp.f32 %v6033_v22  ;;  %vm742_vm4 = vweird.f32 %v6033_v22  ;;  %v746_v62 = vand.u32 2147483647, %v6033_v22  ;;  %v748_v3 = vand.u32 2147483648, %v6033_v22 }
 0x242   : > { %4987 = vrcp.f32 %v6035_v24  ;;  %vm727_vm9 = vweird.f32 %v6035_v24  ;;  %v731_v15 = vand.u32 2147483647, %v6035_v24  ;;  %v733_v16 = vand.u32 2147483648, %v6035_v24 }
 0x243   : > { %v703_v26 = vpop.f32.mrf.mxu1  ;;  %vm747_vm1 = vcmp.eq.f32.partialorder %v746_v62, 8.507059e+37 }
 0x244   : > { %v704_v28 = vadd.f32 %v703_v26, %v6037_v25 }
 0x246   : > { %v4984_v29 = vpop.eup %4983  ;;  %v4328_v30 = vmul.f32 -1.442695, %v704_v28 }
 0x247   : > { %v720_v31 = vadd.f32 1.0, %v4984_v29  ;;  %v6042_v33 = vpop.eup %4985  ;;  %v749_v29 = vor.u32 1.1754944e-38, %v748_v3 }
 0x248   : > { %4989 = vpow2.f32 %v4328_v30  ;;  %v6044_v35 = vpop.eup %4987  ;;  %v738_v37 = vmul.f32 %v6042_v33, %v6033_v22  ;;  %vm743_vm5 = vweird.f32 %v6042_v33  ;;  %v694_v22 = vadd.f32 %v6022_v63, %v6079_v19 }
 0x249   : > { %4991 = vrcp.f32 %v720_v31  ;;  %v723_v40 = vmul.f32 %v6044_v35, %v6035_v24  ;;  %v763_v54 = vand.u32 2147483648, %v720_v31  ;;  %vm728_vm3 = vweird.f32 %v6044_v35  ;;  %vm6075_vm10 = vmor %vm742_vm4, %vm743_vm5 }
 0x24a   : > { %v739_v43 = vsub.f32 1.0, %v738_v37  ;;  %vm757_vm6 = vweird.f32 %v720_v31  ;;  %v761_v56 = vand.u32 2147483647, %v720_v31  ;;  %vm6083_vm13 = vmor %vm727_vm9, %vm728_vm3 }
 0x24b   : > { %v724_v45 = vsub.f32 1.0, %v723_v40  ;;  %v764_v14 = vor.u32 1.1754944e-38, %v763_v54 }
 0x24c   : > { %v740_v48 = vmul.f32 %v6042_v33, %v739_v43  ;;  %vm762_vm11 = vcmp.eq.f32.partialorder %v761_v56, 8.507059e+37  ;;  %v839_v56 = vpop.permute.xlu0 %838 }
 0x24d   : > { %v725_v50 = vmul.f32 %v6044_v35, %v724_v45 }
 0x24e   : > { %v4990_v36 = vpop.eup %4989  ;;  %v741_v58 = vadd.f32 %v6042_v33, %v740_v48 }
 0x24f   : > { %v4992_v38 = vpop.eup %4991  ;;  %v721_v39 = vadd.f32 1.0, %v4990_v36  ;;  %v726_v59 = vadd.f32 %v6044_v35, %v725_v50  ;;  %v6096_v36 = vpop.permute.xlu2 %612  ;;  %v4872_v50 = vld [vmem:[%s7275_s3 + $0x58] sm:$0xff] }
 0x250   : > { %v753_v41 = vmul.f32 %v4992_v38, %v720_v31  ;;  %vm758_vm2 = vweird.f32 %v4992_v38  ;;  %v745_v24 = vsel %vm6075_vm10, %v6042_v33, %v741_v58  ;;  %v689_v63 = vadd.f32 %v6020_v61, %v6096_v36  ;;  %v4870_v61 = vld [vmem:[%s7275_s3 + $0x48] sm:$0xff] }
 0x251   : > { %4993 = vrcp.f32 %v721_v39  ;;  %vm6059_vm7 = vmor %vm757_vm6, %vm758_vm2  ;;  %v778_v7 = vand.u32 2147483648, %v721_v39  ;;  %v776_v11 = vand.u32 2147483647, %v721_v39  ;;  %vm772_vm12 = vweird.f32 %v721_v39 }
 0x252   : > { %v754_v42 = vsub.f32 1.0, %v753_v41  ;;  %v730_v31 = vsel %vm6083_vm13, %v6044_v35, %v726_v59  ;;  %v750_v33 = vsel %vm747_vm1, %v749_v29, %v745_v24  ;;  %vm732_vm2 = vcmp.eq.f32.partialorder %v731_v15, 8.507059e+37  ;;  %v6100_v41 = vpop.permute.xlu1 %607 }
 0x253   : > { %v779_v28 = vor.u32 1.1754944e-38, %v778_v7  ;;  %vm777_vm15 = vcmp.eq.f32.partialorder %v776_v11, 8.507059e+37  ;;  %v687_v43 = vadd.f32 %v6018_v60, %v6100_v41  ;;  %v783_v35 = vmul.f32 %v750_v33, %v689_v63  ;;  %v4871_v60 = vld [vmem:[%s7275_s3 + $0x50] sm:$0xff] }
 0x254   : > { %v755_v46 = vmul.f32 %v4992_v38, %v754_v42  ;;  %v834_v7 = vpop.permute.xlu0 %833 }
 0x256   : > { %v756_v53 = vadd.f32 %v4992_v38, %v755_v46 }
 0x257   : > { %v4994_v21 = vpop.eup %4993  ;;  %v829_v58 = vpop.permute.xlu2 %828 }
 0x258   : > { %v768_v55 = vmul.f32 %v4994_v21, %v721_v39  ;;  %v760_v6 = vsel %vm6059_vm7, %v4992_v38, %v756_v53  ;;  %vm773_vm8 = vweird.f32 %v4994_v21  ;;  %v734_v38 = vor.u32 1.1754944e-38, %v733_v16 }
 0x259   : > { %v765_v26 = vsel %vm762_vm11, %v764_v14, %v760_v6  ;;  %vm774_vm14 = vmor %vm772_vm12, %vm773_vm8 }
 0x25a   : > { %v769_v57 = vsub.f32 1.0, %v768_v55  ;;  %v784_v39 = vmul.f32 %v765_v26, %v692_v52  ;;  %v735_v42 = vsel %vm732_vm2, %v734_v38, %v730_v31  ;;  %v844_v20 = vpop.permute.xlu1 %843 }
 0x25b   : > { %v782_v46 = vmul.f32 %v735_v42, %v687_v43 }
 0x25c   : > { %v770_v9 = vmul.f32 %v4994_v21, %v769_v57 }
 0x25d   : > { %v795_v48 = vpack.c.bf16 %v783_v35, %v782_v46 }
 0x25e   : > { %v771_v17 = vadd.f32 %v4994_v21, %v770_v9 }
 0x260   : > { %v775_v30 = vsel %vm774_vm14, %v4994_v21, %v771_v17  ;;  %v4869_v21 = vld [vmem:[%s7275_s3 + $0x40] sm:$0xff] }
 0x261   : > { %v780_v37 = vsel %vm777_vm15, %v779_v28, %v775_v30 }
 0x262   : > { %v785_v40 = vmul.f32 %v780_v37, %v694_v22 }
 0x264   : > { %v796_v45 = vpack.c.bf16 %v785_v40, %v784_v39 }
 0x266   : > { %884 = vmatpush.bf16.msra.mxu2 %v796_v45 }
 0x26a   : > { %885 = vmatpush.bf16.msra.mxu2 %v795_v48 }
 0x26d   : > { %4361 = vmatmul.msk.bf16.vlgmr.msra.gmra.mxu2 %vm463_vm0, %v4869_v21  ;;  %v819_v21 = vpop.permute.xlu1 %818 }
 0x27d   : > { %4362 = vmatmul.msk.bf16.gmra.mxu2 %vm463_vm0, %v4870_v61 }
 0x28d   : > { %4363 = vmatmul.msk.bf16.gmra.mxu2 %vm463_vm0, %v4871_v60 }
 0x29d   : > { %4364 = vmatmul.msk.bf16.gmra.mxu2 %vm463_vm0, %v4872_v50 }
 0x2f0   : > { %v6120_v52 = vpop.f32.mrf.mxu2 }
 0x2f8   : > { %v6122_v53 = vpop.f32.mrf.mxu2 }
 0x300   : > { %v892_v55 = vpop.f32.mrf.mxu2 }
 0x301   : > { %v893_v60 = vadd.f32 %v892_v55, %v819_v21 }
 0x308   : > { %v6124_v54 = vpop.f32.mrf.mxu2 }
 0x310   : > { %v897_v57 = vpop.f32.mrf.mxu2 }
 0x311   : > { %v898_v13 = vadd.f32 %v897_v57, %v829_v58 }
 0x313   : > { %v4365_v3 = vmul.f32 -1.442695, %v898_v13 }
 0x318   : > { %v899_v59 = vpop.f32.mrf.mxu2 }
 0x319   : > { %v900_v62 = vadd.f32 %v899_v59, %v834_v7 }
 0x31b   : > { %v4366_v6 = vmul.f32 -1.442695, %v900_v62 }
 0x31d   : > { %4995 = vpow2.f32 %v4366_v6 }
 0x31e   : > { %4997 = vpow2.f32 %v4365_v3 }
 0x320   : > { %v902_v9 = vpop.f32.mrf.mxu2 }
 0x321   : > { %v903_v11 = vadd.f32 %v902_v9, %v839_v56 }
 0x323   : > { %v4996_v14 = vpop.eup %4995  ;;  %v4367_v15 = vmul.f32 -1.442695, %v903_v11 }
 0x324   : > { %v4998_v16 = vpop.eup %4997  ;;  %v6126_v18 = vadd.f32 1.0, %v4996_v14 }
 0x325   : > { %4999 = vpow2.f32 %v4367_v15  ;;  %v6128_v17 = vadd.f32 1.0, %v4998_v16 }
 0x326   : > { %5001 = vrcp.f32 %v6126_v18  ;;  %vm943_vm5 = vweird.f32 %v6126_v18  ;;  %v947_v3 = vand.u32 2147483647, %v6126_v18  ;;  %v949_v6 = vand.u32 2147483648, %v6126_v18 }
 0x327   : > { %5003 = vrcp.f32 %v6128_v17  ;;  %vm928_vm10 = vweird.f32 %v6128_v17  ;;  %v932_v16 = vand.u32 2147483647, %v6128_v17 }
 0x328   : > { %v904_v24 = vpop.f32.mrf.mxu2  ;;  %vm948_vm2 = vcmp.eq.f32.partialorder %v947_v3, 8.507059e+37 }
 0x329   : > { %v905_v22 = vadd.f32 %v904_v24, %v844_v20  ;;  %v934_v20 = vand.u32 2147483648, %v6128_v17 }
 0x32b   : > { %v5000_v26 = vpop.eup %4999  ;;  %v4368_v28 = vmul.f32 -1.442695, %v905_v22  ;;  %v824_v22 = vpop.permute.xlu2 %823 }
 0x32c   : > { %v921_v29 = vadd.f32 1.0, %v5000_v26  ;;  %v6132_v30 = vpop.eup %5001 }
 0x32d   : > { %5005 = vpow2.f32 %v4368_v28  ;;  %v6134_v31 = vpop.eup %5003  ;;  %v939_v38 = vmul.f32 %v6132_v30, %v6126_v18  ;;  %vm944_vm6 = vweird.f32 %v6132_v30  ;;  %v895_v18 = vadd.f32 %v6124_v54, %v824_v22 }
 0x32e   : > { %5007 = vrcp.f32 %v921_v29  ;;  %v924_v39 = vmul.f32 %v6134_v31, %v6128_v17  ;;  %v964_v57 = vand.u32 2147483648, %v921_v29  ;;  %vm929_vm4 = vweird.f32 %v6134_v31  ;;  %vm6162_vm11 = vmor %vm943_vm5, %vm944_vm6 }
 0x32f   : > { %v940_v43 = vsub.f32 1.0, %v939_v38  ;;  %vm958_vm7 = vweird.f32 %v921_v29  ;;  %v962_v58 = vand.u32 2147483647, %v921_v29  ;;  %vm6168_vm14 = vmor %vm928_vm10, %vm929_vm4  ;;  %v950_v38 = vor.u32 1.1754944e-38, %v949_v6 }
 0x330   : > { %v925_v45 = vsub.f32 1.0, %v924_v39  ;;  %v965_v15 = vor.u32 1.1754944e-38, %v964_v57  ;;  %v814_v39 = vpop.permute.xlu1 %813 }
 0x331   : > { %v941_v46 = vmul.f32 %v6132_v30, %v940_v43  ;;  %vm963_vm12 = vcmp.eq.f32.partialorder %v962_v58, 8.507059e+37 }
 0x332   : > { %v926_v61 = vmul.f32 %v6134_v31, %v925_v45 }
 0x333   : > { %v5006_v37 = vpop.eup %5005  ;;  %v942_v7 = vadd.f32 %v6132_v30, %v941_v46  ;;  %v1040_v59 = vpop.permute.xlu2 %1039 }
 0x334   : > { %v5008_v33 = vpop.eup %5007  ;;  %v922_v63 = vadd.f32 1.0, %v5006_v37  ;;  %v927_v62 = vadd.f32 %v6134_v31, %v926_v61 }
 0x335   : > { %v954_v40 = vmul.f32 %v5008_v33, %v921_v29  ;;  %vm959_vm3 = vweird.f32 %v5008_v33  ;;  %v946_v17 = vsel %vm6162_vm11, %v6132_v30, %v942_v7  ;;  %v890_v30 = vadd.f32 %v6122_v53, %v814_v39  ;;  %v4874_v53 = vld [vmem:[%s7275_s3 + $0x68] sm:$0xff] }
 0x336   : > { %5009 = vrcp.f32 %v922_v63  ;;  %vm6146_vm8 = vmor %vm958_vm7, %vm959_vm3  ;;  %v979_v55 = vand.u32 2147483648, %v922_v63  ;;  %v977_v14 = vand.u32 2147483647, %v922_v63  ;;  %vm973_vm13 = vweird.f32 %v922_v63 }
 0x337   : > { %v955_v42 = vsub.f32 1.0, %v954_v40  ;;  %v951_v43 = vsel %vm948_vm2, %v950_v38, %v946_v17  ;;  %vm933_vm3 = vcmp.eq.f32.partialorder %v932_v16, 8.507059e+37 }
 0x338   : > { %v980_v37 = vor.u32 1.1754944e-38, %v979_v55  ;;  %vm978_vm1 = vcmp.eq.f32.partialorder %v977_v14, 8.507059e+37  ;;  %v984_v61 = vmul.f32 %v951_v43, %v890_v30 }
 0x339   : > { %v956_v35 = vmul.f32 %v5008_v33, %v955_v42  ;;  %v935_v42 = vor.u32 1.1754944e-38, %v934_v20 }
 0x33b   : > { %v957_v50 = vadd.f32 %v5008_v33, %v956_v35  ;;  %v809_v35 = vpop.permute.xlu0 %808  ;;  %v1035_v6 = vpop.permute.xlu2 %1034 }
 0x33c   : > { %v5010_v48 = vpop.eup %5009  ;;  %v888_v21 = vadd.f32 %v6120_v52, %v809_v35  ;;  %v4875_v52 = vld [vmem:[%s7275_s3 + $0x70] sm:$0xff] }
 0x33d   : > { %v969_v56 = vmul.f32 %v5010_v48, %v922_v63  ;;  %v961_v9 = vsel %vm6146_vm8, %v5008_v33, %v957_v50  ;;  %vm974_vm9 = vweird.f32 %v5010_v48  ;;  %v931_v63 = vsel %vm6168_vm14, %v6134_v31, %v927_v62  ;;  %v4873_v31 = vld [vmem:[%s7275_s3 + $0x60] sm:$0xff]  ;;  %v1030_v62 = vpop.permute.xlu1 %1029 }
 0x33e   : > { %v966_v29 = vsel %vm963_vm12, %v965_v15, %v961_v9  ;;  %vm975_vm15 = vmor %vm973_vm13, %vm974_vm9  ;;  %v936_v46 = vsel %vm933_vm3, %v935_v42, %v931_v63 }
 0x33f   : > { %v970_v13 = vsub.f32 1.0, %v969_v56  ;;  %v985_v45 = vmul.f32 %v966_v29, %v893_v60  ;;  %v983_v50 = vmul.f32 %v936_v46, %v888_v21  ;;  %v4876_v60 = vld [vmem:[%s7275_s3 + $0x78] sm:$0xff] }
 0x341   : > { %v971_v11 = vmul.f32 %v5010_v48, %v970_v13  ;;  %v996_v56 = vpack.c.bf16 %v984_v61, %v983_v50 }
 0x343   : > { %v972_v26 = vadd.f32 %v5010_v48, %v971_v11 }
 0x345   : > { %v976_v33 = vsel %vm975_vm15, %v5010_v48, %v972_v26 }
 0x346   : > { %v981_v40 = vsel %vm978_vm1, %v980_v37, %v976_v33 }
 0x347   : > { %v986_v54 = vmul.f32 %v981_v40, %v895_v18  ;;  %v1045_v18 = vpop.permute.xlu0 %1044 }
 0x349   : > { %v997_v48 = vpack.c.bf16 %v986_v54, %v985_v45 }
 0x34b   : > { %1085 = vmatpush.bf16.msra.mxu3 %v997_v48 }
 0x34f   : > { %1086 = vmatpush.bf16.msra.mxu3 %v996_v56 }
 0x352   : > { %4401 = vmatmul.msk.bf16.vlgmr.msra.gmra.mxu3 %vm463_vm0, %v4873_v31  ;;  %v1020_v31 = vpop.permute.xlu0 %1019 }
 0x362   : > { %4402 = vmatmul.msk.bf16.gmra.mxu3 %vm463_vm0, %v4874_v53 }
 0x372   : > { %4403 = vmatmul.msk.bf16.gmra.mxu3 %vm463_vm0, %v4875_v52 }
 0x382   : > { %4404 = vmatmul.msk.bf16.gmra.mxu3 %vm463_vm0, %v4876_v60 }
 0x3d5   : > { %v6198_v57 = vpop.f32.mrf.mxu3 }
 0x3dd   : > { %v6200_v58 = vpop.f32.mrf.mxu3 }
 0x3e5   : > { %v1093_v13 = vpop.f32.mrf.mxu3 }
 0x3e6   : > { %v1094_v52 = vadd.f32 %v1093_v13, %v1020_v31 }
 0x3ed   : > { %v6202_v7 = vpop.f32.mrf.mxu3 }
 0x3f5   : > { %v1098_v55 = vpop.f32.mrf.mxu3 }
 0x3f6   : > { %v1099_v3 = vadd.f32 %v1098_v55, %v1030_v62 }
 0x3f8   : > { %v4405_v14 = vmul.f32 -1.442695, %v1099_v3 }
 0x3fd   : > { %v1100_v9 = vpop.f32.mrf.mxu3 }
 0x3fe   : > { %v1101_v11 = vadd.f32 %v1100_v9, %v1035_v6 }
 0x400   : > { %v4406_v15 = vmul.f32 -1.442695, %v1101_v11 }
 0x402   : > { %5011 = vpow2.f32 %v4406_v15 }
 0x403   : > { %5013 = vpow2.f32 %v4405_v14 }
 0x405   : > { %v1103_v16 = vpop.f32.mrf.mxu3 }
 0x406   : > { %v1104_v20 = vadd.f32 %v1103_v16, %v1040_v59 }
 0x408   : > { %v5012_v24 = vpop.eup %5011  ;;  %v4407_v22 = vmul.f32 -1.442695, %v1104_v20 }
 0x409   : > { %v5014_v26 = vpop.eup %5013  ;;  %v6204_v28 = vadd.f32 1.0, %v5012_v24 }
 0x40a   : > { %5015 = vpow2.f32 %v4407_v22  ;;  %v6206_v17 = vadd.f32 1.0, %v5014_v26 }
 0x40b   : > { %5017 = vrcp.f32 %v6204_v28  ;;  %vm1144_vm6 = vweird.f32 %v6204_v28  ;;  %v1148_v14 = vand.u32 2147483647, %v6204_v28  ;;  %v1150_v15 = vand.u32 2147483648, %v6204_v28 }
 0x40c   : > { %5019 = vrcp.f32 %v6206_v17  ;;  %vm1129_vm11 = vweird.f32 %v6206_v17  ;;  %v1133_v26 = vand.u32 2147483647, %v6206_v17 }
 0x40d   : > { %v1105_v29 = vpop.f32.mrf.mxu3  ;;  %vm1149_vm3 = vcmp.eq.f32.partialorder %v1148_v14, 8.507059e+37 }
 0x40e   : > { %v1106_v37 = vadd.f32 %v1105_v29, %v1045_v18  ;;  %v1135_v18 = vand.u32 2147483648, %v6206_v17 }
 0x410   : > { %v5016_v38 = vpop.eup %5015  ;;  %v4408_v33 = vmul.f32 -1.442695, %v1106_v37  ;;  %v1025_v37 = vpop.permute.xlu1 %1024 }
 0x411   : > { %v1122_v63 = vadd.f32 1.0, %v5016_v38  ;;  %v6210_v39 = vpop.eup %5017 }
 0x412   : > { %5021 = vpow2.f32 %v4408_v33  ;;  %v6212_v40 = vpop.eup %5019  ;;  %v1140_v43 = vmul.f32 %v6210_v39, %v6204_v28  ;;  %vm1145_vm7 = vweird.f32 %v6210_v39  ;;  %v1096_v28 = vadd.f32 %v6202_v7, %v1025_v37 }
 0x413   : > { %5023 = vrcp.f32 %v1122_v63  ;;  %v1125_v54 = vmul.f32 %v6212_v40, %v6206_v17  ;;  %v1165_v55 = vand.u32 2147483648, %v1122_v63  ;;  %vm1130_vm5 = vweird.f32 %v6212_v40  ;;  %vm6240_vm12 = vmor %vm1144_vm6, %vm1145_vm7 }
 0x414   : > { %v1141_v21 = vsub.f32 1.0, %v1140_v43  ;;  %vm1159_vm8 = vweird.f32 %v1122_v63  ;;  %v1163_v62 = vand.u32 2147483647, %v1122_v63  ;;  %vm6246_vm15 = vmor %vm1129_vm11, %vm1130_vm5  ;;  %v1151_v43 = vor.u32 1.1754944e-38, %v1150_v15 }
 0x415   : > { %v1126_v48 = vsub.f32 1.0, %v1125_v54  ;;  %v1166_v22 = vor.u32 1.1754944e-38, %v1165_v55  ;;  %v1015_v54 = vpop.permute.xlu0 %1014 }
 0x416   : > { %v1142_v50 = vmul.f32 %v6210_v39, %v1141_v21  ;;  %vm1164_vm13 = vcmp.eq.f32.partialorder %v1163_v62, 8.507059e+37 }
 0x417   : > { %v1127_v53 = vmul.f32 %v6212_v40, %v1126_v48 }
 0x418   : > { %v5022_v42 = vpop.eup %5021  ;;  %v1143_v6 = vadd.f32 %v6210_v39, %v1142_v50  ;;  %v1205_v55 = vpop.permute.xlu1 %1204 }
 0x419   : > { %v5024_v30 = vpop.eup %5023  ;;  %v1123_v45 = vadd.f32 1.0, %v5022_v42  ;;  %v1128_v11 = vadd.f32 %v6212_v40, %v1127_v53 }
 0x41a   : > { %v1155_v35 = vmul.f32 %v5024_v30, %v1122_v63  ;;  %vm1160_vm4 = vweird.f32 %v5024_v30  ;;  %v1147_v17 = vsel %vm6240_vm12, %v6210_v39, %v1143_v6  ;;  %v1091_v39 = vadd.f32 %v6200_v58, %v1015_v54 }
 0x41b   : > { %5025 = vrcp.f32 %v1123_v45  ;;  %vm6224_vm9 = vmor %vm1159_vm8, %vm1160_vm4  ;;  %v1180_v13 = vand.u32 2147483648, %v1123_v45  ;;  %v1178_v24 = vand.u32 2147483647, %v1123_v45  ;;  %vm1174_vm14 = vweird.f32 %v1123_v45 }
 0x41c   : > { %v1156_v46 = vsub.f32 1.0, %v1155_v35  ;;  %v1152_v21 = vsel %vm1149_vm3, %v1151_v43, %v1147_v17  ;;  %vm1134_vm4 = vcmp.eq.f32.partialorder %v1133_v26, 8.507059e+37 }
 0x41d   : > { %v1181_v42 = vor.u32 1.1754944e-38, %v1180_v13  ;;  %vm1179_vm2 = vcmp.eq.f32.partialorder %v1178_v24, 8.507059e+37  ;;  %v1215_v13 = vpop.permute.xlu0 %1214 }
 0x41e   : > { %v1157_v61 = vmul.f32 %v5024_v30, %v1156_v46  ;;  %v1136_v46 = vor.u32 1.1754944e-38, %v1135_v18 }
 0x420   : > { %v1158_v60 = vadd.f32 %v5024_v30, %v1157_v61  ;;  %v1010_v61 = vpop.permute.xlu2 %1009  ;;  %v1220_v6 = vpop.permute.xlu1 %1219 }
 0x421   : > { %v5026_v56 = vpop.eup %5025 }
 0x422   : > { %v1170_v59 = vmul.f32 %v5026_v56, %v1123_v45  ;;  %v1162_v16 = vsel %vm6224_vm9, %v5024_v30, %v1158_v60  ;;  %vm1175_vm10 = vweird.f32 %v5026_v56  ;;  %v1132_v45 = vsel %vm6246_vm15, %v6212_v40, %v1128_v11 }
 0x423   : > { %v1167_v63 = vsel %vm1164_vm13, %v1166_v22, %v1162_v16  ;;  %vm1176_vm1 = vmor %vm1174_vm14, %vm1175_vm10  ;;  %v1137_v50 = vsel %vm1134_vm4, %v1136_v46, %v1132_v45  ;;  %v6266_v40 = vmul.f32 %v1152_v21, %v1091_v39 }
 0x424   : > { %v1171_v3 = vsub.f32 1.0, %v1170_v59  ;;  %v6259_v48 = vmul.f32 %v1167_v63, %v1094_v52  ;;  %v4877_v52 = vld [vmem:[%s7277_s5] sm:$0xff] }
 0x426   : > { %v1172_v20 = vmul.f32 %v5026_v56, %v1171_v3 }
 0x428   : > { %v1173_v38 = vadd.f32 %v5026_v56, %v1172_v20  ;;  %v1210_v3 = vpop.permute.xlu2 %1209 }
 0x42a   : > { %v1177_v30 = vsel %vm1176_vm1, %v5026_v56, %v1173_v38  ;;  %v1089_v56 = vadd.f32 %v6198_v57, %v1010_v61  ;;  %v4878_v57 = vld [vmem:[%s7277_s5 + $0x8] sm:$0xff] }
 0x42b   : > { %v1182_v35 = vsel %vm1179_vm2, %v1181_v42, %v1177_v30 }
 0x42c   : > { %v6261_v7 = vmul.f32 %v1182_v35, %v1096_v28  ;;  %v6268_v53 = vmul.f32 %v1137_v50, %v1089_v56 }
 0x42e   : > { %v1197_v31 = vpack.c.bf16 %v6261_v7, %v6259_v48  ;;  %v1196_v58 = vpack.c.bf16 %v6266_v40, %v6268_v53 }
 0x430   : > { %1244 = vmatpush.bf16.msrb.mxu0 %v1197_v31 }
 0x434   : > { %1245 = vmatpush.bf16.msrb.mxu0 %v1196_v58 }
 0x437   : > { %4417 = vmatmul.msk.bf16.vlgmr.msrb.gmra.mxu0 %vm463_vm0, %v4877_v52 }
 0x447   : > { %4418 = vmatmul.msk.bf16.gmra.mxu0 %vm463_vm0, %v4878_v57 }
 0x4b4   : > { %v1247_v60 = vpop.f32.mrf.mxu0 }
 0x4b5   : > { %v1248_v14 = vadd.f32 %v1247_v60, %v1205_v55 }
 0x4bc   : > { %v1249_v59 = vpop.f32.mrf.mxu0 }
 0x4bd   : > { %v1250_v9 = vadd.f32 %v1249_v59, %v1210_v3 }
 0x4bf   : > { %v1257_v20 = vmax.f32 %v1248_v14, %v1250_v9 }
 0x4c4   : > { %v1252_v62 = vpop.f32.mrf.mxu0 }
 0x4c5   : > { %v1253_v15 = vadd.f32 %v1252_v62, %v1215_v13 }
 0x4cc   : > { %v1254_v11 = vpop.f32.mrf.mxu0 }
 0x4cd   : > { %v1255_v16 = vadd.f32 %v1254_v11, %v1220_v6 }
 0x4cf   : > { %v1258_v24 = vmax.f32 %v1253_v15, %v1255_v16 }
 0x4d1   : > { %v1259_v22 = vmax.f32 %v1257_v20, %v1258_v24  ;;  %v5323_v24 = vld [vmem:[%s7275_s3] sm:$0xff] }
 0x4d3   : > { %v1260_v26 = vrot.slane %v1259_v22, 4 }
 0x4d5   : > { %v1261_v18 = vmax.f32 %v1259_v22, %v1260_v26  ;;  %v5324_v22 = vld [vmem:[%s7275_s3 + $0x8] sm:$0xff]  ;;  %v5325_v26 = vld [vmem:[%s7275_s3 + $0x10] sm:$0xff] }
 0x4d7   : > { %v1262_v29 = vrot.slane %v1261_v18, 2 }
 0x4d9   : > { %v1263_v37 = vmax.f32 %v1261_v18, %v1262_v29  ;;  %v5326_v18 = vld [vmem:[%s7275_s3 + $0x18] sm:$0xff] }
 0x4db   : > { %v1264_v38 = vrot.slane %v1263_v37, 1 }
 0x4dd   : > { %v1265_v33 = vmax.f32 %v1263_v37, %v1264_v38 }
 0x4df   : > { %v1266_v17 = vsub.f32 %v1248_v14, %v1265_v33  ;;  %v1267_v28 = vsub.f32 %v1250_v9, %v1265_v33  ;;  %v1268_v63 = vsub.f32 %v1253_v15, %v1265_v33  ;;  %v1269_v42 = vsub.f32 %v1255_v16, %v1265_v33 }
 0x4e1   : > { %v1270_v43 = vmul.f32 1.442695, %v1266_v17  ;;  %v1272_v30 = vmul.f32 1.442695, %v1267_v28  ;;  %v1274_v45 = vmul.f32 1.442695, %v1268_v63 }
 0x4e2   : > { %v1276_v54 = vmul.f32 1.442695, %v1269_v42 }
 0x4e3   : > { %5027 = vpow2.f32 %v1270_v43 }
 0x4e4   : > { %5029 = vpow2.f32 %v1272_v30 }
 0x4e5   : > { %5031 = vpow2.f32 %v1274_v45 }
 0x4e6   : > { %5033 = vpow2.f32 %v1276_v54 }
 0x4e9   : > { %v5028_v35 = vpop.eup %5027 }
 0x4ea   : > { %v5030_v46 = vpop.eup %5029 }
 0x4eb   : > { %v1278_v21 = vadd.f32 %v5030_v46, %v5028_v35  ;;  %v5032_v39 = vpop.eup %5031 }
 0x4ec   : > { %v5034_v50 = vpop.eup %5033 }
 0x4ed   : > { %v1279_v61 = vadd.f32 %v5032_v39, %v1278_v21 }
 0x4ef   : > { %v1280_v56 = vadd.f32 %v5034_v50, %v1279_v61 }
 0x4f1   : > { %v1281_v31 = vrot.slane %v1280_v56, 4 }
 0x4f3   : > { %v1282_v58 = vadd.f32 %v1281_v31, %v1280_v56 }
 0x4f5   : > { %v1283_v52 = vrot.slane %v1282_v58, 2 }
 0x4f7   : > { %v1284_v57 = vadd.f32 %v1283_v52, %v1282_v58 }
 0x4f9   : > { %v1285_v60 = vrot.slane %v1284_v57, 1 }
 0x4fb   : > { %v1286_v59 = vadd.f32 %v1285_v60, %v1284_v57 }
 0x4fd   : > { %5035 = vrcp.f32 %v1286_v59 }
 0x503   : > { %v5036_v55 = vpop.eup %5035 }
 0x504   : > { %v6280_v62 = vmul.f32 %v5036_v55, %v5032_v39  ;;  %v6282_v3 = vmul.f32 %v5036_v55, %v5034_v50  ;;  %v6284_v6 = vmul.f32 %v5036_v55, %v5028_v35  ;;  %v6286_v9 = vmul.f32 %v5036_v55, %v5030_v46 }
 0x506   : > { %v1294_v13 = vmul.f32 %v6280_v62, %v5672_v0  ;;  %v1295_v11 = vmul.f32 %v6282_v3, %v5674_v1  ;;  %v1292_v15 = vmul.f32 %v6284_v6, %v5686_v12  ;;  %v1293_v16 = vmul.f32 %v6286_v9, %v5684_v10 }
 0x508   : > { %v1305_v14 = vpack.c.bf16 %v1295_v11, %v1294_v13  ;;  %v1304_v20 = vpack.c.bf16 %v1293_v16, %v1292_v15 }
 0x50a   : > { %1312 = vmatpush.bf16.msrb.mxu1 %v1305_v14 }
 0x50e   : > { %1313 = vmatpush.bf16.msrb.mxu1 %v1304_v20 }
 0x511   : > { %4419 = vmatmul.msk.bf16.vlgmr.msrb.gmra.mxu1 %vm463_vm0, %v5323_v24 }
 0x521   : > { %4420 = vmatmul.msk.bf16.gmra.mxu1 %vm463_vm0, %v5324_v22 }
 0x531   : > { %4421 = vmatmul.msk.bf16.gmra.mxu1 %vm463_vm0, %v5325_v26 }
 0x541   : > { %4422 = vmatmul.msk.bf16.gmra.mxu1 %vm463_vm0, %v5326_v18 }
 0x58e   : > { %v6312_v29 = vpop.f32.mrf.mxu1 }
 0x596   : > { %v6314_v37 = vpop.f32.mrf.mxu1 }
 0x59e   : > { %v1320_v38 = vpop.f32.mrf.mxu1 }
 0x5a6   : > { %v6316_v33 = vpop.f32.mrf.mxu1 }
 0x5ae   : > { %v1325_v17 = vpop.f32.mrf.mxu1 }
 0x5af   : > { %v1326_v28 = vadd.f32 %v1325_v17, %v5905_v27 }
 0x5b1   : > { %v4423_v43 = vmul.f32 -1.442695, %v1326_v28  ;;  %v1321_v28 = vadd.f32 %v1320_v38, %v5948_v5 }
 0x5b6   : > { %v1327_v63 = vpop.f32.mrf.mxu1 }
 0x5b7   : > { %v1328_v42 = vadd.f32 %v1327_v63, %v5917_v32 }
 0x5b9   : > { %v4424_v30 = vmul.f32 -1.442695, %v1328_v42 }
 0x5bb   : > { %5037 = vpow2.f32 %v4424_v30 }
 0x5bc   : > { %5039 = vpow2.f32 %v4423_v43 }
 0x5be   : > { %v1330_v45 = vpop.f32.mrf.mxu1 }
 0x5bf   : > { %v1331_v54 = vadd.f32 %v1330_v45, %v5897_v23 }
 0x5c1   : > { %v5038_v35 = vpop.eup %5037  ;;  %v4425_v46 = vmul.f32 -1.442695, %v1331_v54 }
 0x5c2   : > { %v5040_v21 = vpop.eup %5039  ;;  %v6321_v39 = vadd.f32 1.0, %v5038_v35 }
 0x5c3   : > { %5041 = vpow2.f32 %v4425_v46  ;;  %v6323_v61 = vadd.f32 1.0, %v5040_v21 }
 0x5c4   : > { %5043 = vrcp.f32 %v6321_v39  ;;  %vm1371_vm7 = vweird.f32 %v6321_v39  ;;  %v1375_v21 = vand.u32 2147483647, %v6321_v39 }
 0x5c5   : > { %5045 = vrcp.f32 %v6323_v61  ;;  %vm1356_vm12 = vweird.f32 %v6323_v61 }
 0x5c6   : > { %v1332_v50 = vpop.f32.mrf.mxu1  ;;  %vm1376_vm4 = vcmp.eq.f32.partialorder %v1375_v21, 8.507059e+37 }
 0x5c7   : > { %v1333_v56 = vadd.f32 %v1332_v50, %v5934_v47  ;;  %v1377_v50 = vand.u32 2147483648, %v6321_v39 }
 0x5c9   : > { %v5042_v31 = vpop.eup %5041  ;;  %v4426_v58 = vmul.f32 -1.442695, %v1333_v56 }
 0x5ca   : > { %v1349_v52 = vadd.f32 1.0, %v5042_v31  ;;  %v5044_v57 = vpop.eup %5043 }
 0x5cb   : > { %5047 = vpow2.f32 %v4426_v58  ;;  %v6328_v60 = vpop.eup %5045  ;;  %v1367_v55 = vmul.f32 %v5044_v57, %v6321_v39  ;;  %vm1372_vm8 = vweird.f32 %v5044_v57 }
 0x5cc   : > { %5049 = vrcp.f32 %v1349_v52  ;;  %v1352_v14 = vmul.f32 %v6328_v60, %v6323_v61  ;;  %v1392_v43 = vand.u32 2147483648, %v1349_v52  ;;  %vm1357_vm6 = vweird.f32 %v6328_v60  ;;  %vm6352_vm13 = vmor %vm1371_vm7, %vm1372_vm8 }
 0x5cd   : > { %v1368_v20 = vsub.f32 1.0, %v1367_v55  ;;  %vm1386_vm9 = vweird.f32 %v1349_v52  ;;  %v1390_v30 = vand.u32 2147483647, %v1349_v52  ;;  %v1362_v55 = vand.u32 2147483648, %v6323_v61  ;;  %vm6358_vm1 = vmor %vm1356_vm12, %vm1357_vm6 }
 0x5ce   : > { %v1353_v24 = vsub.f32 1.0, %v1352_v14 }
 0x5cf   : > { %v1369_v26 = vmul.f32 %v5044_v57, %v1368_v20  ;;  %vm1391_vm14 = vcmp.eq.f32.partialorder %v1390_v30, 8.507059e+37  ;;  %v1316_v30 = vadd.f32 %v6312_v29, %v5998_v51  ;;  %v5329_v29 = vld [vmem:[%s7275_s3 + $0x30] sm:$0xff] }
 0x5d0   : > { %v1354_v17 = vmul.f32 %v6328_v60, %v1353_v24  ;;  %v1378_v24 = vor.u32 1.1754944e-38, %v1377_v50 }
 0x5d1   : > { %v5048_v59 = vpop.eup %5047  ;;  %v1370_v54 = vadd.f32 %v5044_v57, %v1369_v26 }
 0x5d2   : > { %v5050_v13 = vpop.eup %5049  ;;  %v1350_v11 = vadd.f32 1.0, %v5048_v59  ;;  %v1355_v38 = vadd.f32 %v6328_v60, %v1354_v17  ;;  %v1360_v59 = vand.u32 2147483647, %v6323_v61  ;;  %v1323_v61 = vadd.f32 %v6316_v33, %v5977_v34 }
 0x5d3   : > { %v1382_v15 = vmul.f32 %v5050_v13, %v1349_v52  ;;  %vm1387_vm5 = vweird.f32 %v5050_v13  ;;  %v1393_v52 = vor.u32 1.1754944e-38, %v1392_v43  ;;  %v1363_v17 = vor.u32 1.1754944e-38, %v1362_v55 }
 0x5d4   : > { %5051 = vrcp.f32 %v1350_v11  ;;  %vm6337_vm10 = vmor %vm1386_vm9, %vm1387_vm5  ;;  %v1407_v46 = vand.u32 2147483648, %v1350_v11  ;;  %v1405_v58 = vand.u32 2147483647, %v1350_v11  ;;  %vm1401_vm15 = vweird.f32 %v1350_v11 }
 0x5d5   : > { %v1383_v16 = vsub.f32 1.0, %v1382_v15  ;;  %vm1361_vm5 = vcmp.eq.f32.partialorder %v1360_v59, 8.507059e+37 }
 0x5d6   : > { %v1408_v20 = vor.u32 1.1754944e-38, %v1407_v46  ;;  %vm1406_vm3 = vcmp.eq.f32.partialorder %v1405_v58, 8.507059e+37 }
 0x5d7   : > { %v1384_v22 = vmul.f32 %v5050_v13, %v1383_v16  ;;  %v1374_v16 = vsel %vm6352_vm13, %v5044_v57, %v1370_v54  ;;  %v1318_v57 = vadd.f32 %v6314_v37, %v5994_v44  ;;  %v5328_v37 = vld [vmem:[%s7275_s3 + $0x28] sm:$0xff] }
 0x5d9   : > { %v1385_v63 = vadd.f32 %v5050_v13, %v1384_v22 }
 0x5da   : > { %v5052_v18 = vpop.eup %5051 }
 0x5db   : > { %v1397_v42 = vmul.f32 %v5052_v18, %v1350_v11  ;;  %v1389_v56 = vsel %vm6337_vm10, %v5050_v13, %v1385_v63  ;;  %vm1402_vm11 = vweird.f32 %v5052_v18  ;;  %v1359_v11 = vsel %vm6358_vm1, %v6328_v60, %v1355_v38  ;;  %v5327_v60 = vld [vmem:[%s7275_s3 + $0x20] sm:$0xff] }
 0x5dc   : > { %v1394_v39 = vsel %vm1391_vm14, %v1393_v52, %v1389_v56  ;;  %vm1403_vm2 = vmor %vm1401_vm15, %vm1402_vm11  ;;  %v1379_v63 = vsel %vm1376_vm4, %v1378_v24, %v1374_v16  ;;  %v1364_v33 = vsel %vm1361_vm5, %v1363_v17, %v1359_v11 }
 0x5dd   : > { %v1398_v45 = vsub.f32 1.0, %v1397_v42  ;;  %v1413_v42 = vmul.f32 %v1394_v39, %v1321_v28  ;;  %v1411_v54 = vmul.f32 %v1364_v33, %v1316_v30  ;;  %v5330_v28 = vld [vmem:[%s7275_s3 + $0x38] sm:$0xff] }
 0x5df   : > { %v1399_v31 = vmul.f32 %v5052_v18, %v1398_v45  ;;  %v1412_v45 = vmul.f32 %v1379_v63, %v1318_v57 }
 0x5e1   : > { %v1400_v15 = vadd.f32 %v5052_v18, %v1399_v31  ;;  %v1415_v35 = vpack.c.bf16 %v1412_v45, %v1411_v54 }
 0x5e3   : > { %v1404_v22 = vsel %vm1403_vm2, %v5052_v18, %v1400_v15 }
 0x5e4   : > { %v1409_v26 = vsel %vm1406_vm3, %v1408_v20, %v1404_v22 }
 0x5e5   : > { %v1414_v43 = vmul.f32 %v1409_v26, %v1323_v61 }
 0x5e7   : > { %v1416_v18 = vpack.c.bf16 %v1414_v43, %v1413_v42 }
 0x5e9   : > { %1423 = vmatpush.bf16.msrb.mxu2 %v1416_v18 }
 0x5ed   : > { %1424 = vmatpush.bf16.msrb.mxu2 %v1415_v35 }
 0x5f0   : > { %4427 = vmatmul.msk.bf16.vlgmr.msrb.gmra.mxu2 %vm463_vm0, %v5327_v60 }
 0x600   : > { %4428 = vmatmul.msk.bf16.gmra.mxu2 %vm463_vm0, %v5328_v37 }
 0x610   : > { %4429 = vmatmul.msk.bf16.gmra.mxu2 %vm463_vm0, %v5329_v29 }
 0x620   : > { %4430 = vmatmul.msk.bf16.gmra.mxu2 %vm463_vm0, %v5330_v28 }
 0x673   : > { %v6389_v46 = vpop.f32.mrf.mxu2 }
 0x67b   : > { %v6391_v38 = vpop.f32.mrf.mxu2 }
 0x683   : > { %v1431_v21 = vpop.f32.mrf.mxu2 }
 0x68b   : > { %v6393_v50 = vpop.f32.mrf.mxu2 }
 0x693   : > { %v1436_v56 = vpop.f32.mrf.mxu2 }
 0x694   : > { %v1437_v31 = vadd.f32 %v1436_v56, %v6026_v4 }
 0x696   : > { %v4431_v59 = vmul.f32 -1.442695, %v1437_v31  ;;  %v1432_v31 = vadd.f32 %v1431_v21, %v6051_v49 }
 0x69b   : > { %v1438_v58 = vpop.f32.mrf.mxu2 }
 0x69c   : > { %v1439_v52 = vadd.f32 %v1438_v58, %v6029_v8 }
 0x69e   : > { %v4432_v55 = vmul.f32 -1.442695, %v1439_v52 }
 0x6a0   : > { %5053 = vpow2.f32 %v4432_v55 }
 0x6a1   : > { %5055 = vpow2.f32 %v4431_v59 }
 0x6a3   : > { %v1441_v14 = vpop.f32.mrf.mxu2 }
 0x6a4   : > { %v1442_v15 = vadd.f32 %v1441_v14, %v6024_v2 }
 0x6a6   : > { %v5054_v13 = vpop.eup %5053  ;;  %v4433_v16 = vmul.f32 -1.442695, %v1442_v15 }
 0x6a7   : > { %v5056_v61 = vpop.eup %5055  ;;  %v6398_v39 = vadd.f32 1.0, %v5054_v13 }
 0x6a8   : > { %5057 = vpow2.f32 %v4433_v16  ;;  %v6400_v20 = vadd.f32 1.0, %v5056_v61 }
 0x6a9   : > { %5059 = vrcp.f32 %v6398_v39  ;;  %vm1482_vm8 = vweird.f32 %v6398_v39  ;;  %v1486_v61 = vand.u32 2147483647, %v6398_v39 }
 0x6aa   : > { %5061 = vrcp.f32 %v6400_v20  ;;  %vm1467_vm13 = vweird.f32 %v6400_v20 }
 0x6ab   : > { %v1443_v24 = vpop.f32.mrf.mxu2  ;;  %vm1487_vm5 = vcmp.eq.f32.partialorder %v1486_v61, 8.507059e+37 }
 0x6ac   : > { %v1444_v22 = vadd.f32 %v1443_v24, %v6037_v25  ;;  %v1488_v24 = vand.u32 2147483648, %v6398_v39 }
 0x6ae   : > { %v5058_v11 = vpop.eup %5057  ;;  %v4434_v26 = vmul.f32 -1.442695, %v1444_v22 }
 0x6af   : > { %v1460_v17 = vadd.f32 1.0, %v5058_v11  ;;  %v5060_v63 = vpop.eup %5059 }
 0x6b0   : > { %5063 = vpow2.f32 %v4434_v26  ;;  %v6405_v57 = vpop.eup %5061  ;;  %v1478_v43 = vmul.f32 %v5060_v63, %v6398_v39  ;;  %vm1483_vm9 = vweird.f32 %v5060_v63 }
 0x6b1   : > { %5065 = vrcp.f32 %v1460_v17  ;;  %v1463_v18 = vmul.f32 %v6405_v57, %v6400_v20  ;;  %v1503_v59 = vand.u32 2147483648, %v1460_v17  ;;  %vm1468_vm7 = vweird.f32 %v6405_v57  ;;  %vm6429_vm14 = vmor %vm1482_vm8, %vm1483_vm9 }
 0x6b2   : > { %v1479_v35 = vsub.f32 1.0, %v1478_v43  ;;  %vm1497_vm10 = vweird.f32 %v1460_v17  ;;  %v1501_v55 = vand.u32 2147483647, %v1460_v17  ;;  %v1473_v43 = vand.u32 2147483648, %v6400_v20  ;;  %vm6435_vm2 = vmor %vm1467_vm13, %vm1468_vm7 }
 0x6b3   : > { %v1464_v60 = vsub.f32 1.0, %v1463_v18 }
 0x6b4   : > { %v1480_v29 = vmul.f32 %v5060_v63, %v1479_v35  ;;  %vm1502_vm15 = vcmp.eq.f32.partialorder %v1501_v55, 8.507059e+37  ;;  %v1427_v55 = vadd.f32 %v6389_v46, %v6100_v41  ;;  %v4881_v46 = vld [vmem:[%s7275_s3 + $0x90] sm:$0xff] }
 0x6b5   : > { %v1465_v56 = vmul.f32 %v6405_v57, %v1464_v60  ;;  %v1489_v60 = vor.u32 1.1754944e-38, %v1488_v24 }
 0x6b6   : > { %v5064_v42 = vpop.eup %5063  ;;  %v1481_v15 = vadd.f32 %v5060_v63, %v1480_v29 }
 0x6b7   : > { %v5066_v33 = vpop.eup %5065  ;;  %v1461_v30 = vadd.f32 1.0, %v5064_v42  ;;  %v1466_v21 = vadd.f32 %v6405_v57, %v1465_v56  ;;  %v1471_v42 = vand.u32 2147483647, %v6400_v20  ;;  %v1434_v20 = vadd.f32 %v6393_v50, %v6079_v19 }
 0x6b8   : > { %v1493_v45 = vmul.f32 %v5066_v33, %v1460_v17  ;;  %vm1498_vm6 = vweird.f32 %v5066_v33  ;;  %v1504_v17 = vor.u32 1.1754944e-38, %v1503_v59  ;;  %v1474_v56 = vor.u32 1.1754944e-38, %v1473_v43 }
 0x6b9   : > { %5067 = vrcp.f32 %v1461_v30  ;;  %vm6414_vm11 = vmor %vm1497_vm10, %vm1498_vm6  ;;  %v1518_v16 = vand.u32 2147483648, %v1461_v30  ;;  %v1516_v26 = vand.u32 2147483647, %v1461_v30  ;;  %vm1512_vm1 = vweird.f32 %v1461_v30 }
 0x6ba   : > { %v1494_v54 = vsub.f32 1.0, %v1493_v45  ;;  %vm1472_vm6 = vcmp.eq.f32.partialorder %v1471_v42, 8.507059e+37 }
 0x6bb   : > { %v1519_v35 = vor.u32 1.1754944e-38, %v1518_v16  ;;  %vm1517_vm4 = vcmp.eq.f32.partialorder %v1516_v26, 8.507059e+37  ;;  %v1569_v26 = vpop.permute.xlu1 %1568 }
 0x6bc   : > { %v1495_v37 = vmul.f32 %v5066_v33, %v1494_v54  ;;  %v1485_v54 = vsel %vm6429_vm14, %v5060_v63, %v1481_v15  ;;  %v1429_v63 = vadd.f32 %v6391_v38, %v6096_v36  ;;  %v4880_v38 = vld [vmem:[%s7275_s3 + $0x88] sm:$0xff] }
 0x6be   : > { %v1496_v58 = vadd.f32 %v5066_v33, %v1495_v37 }
 0x6bf   : > { %v5068_v28 = vpop.eup %5067 }
 0x6c0   : > { %v1508_v52 = vmul.f32 %v5068_v28, %v1461_v30  ;;  %v1500_v22 = vsel %vm6414_vm11, %v5066_v33, %v1496_v58  ;;  %vm1513_vm12 = vweird.f32 %v5068_v28  ;;  %v1470_v30 = vsel %vm6435_vm2, %v6405_v57, %v1466_v21  ;;  %v4879_v57 = vld [vmem:[%s7275_s3 + $0x80] sm:$0xff] }
 0x6c1   : > { %v1505_v39 = vsel %vm1502_vm15, %v1504_v17, %v1500_v22  ;;  %vm1514_vm3 = vmor %vm1512_vm1, %vm1513_vm12  ;;  %v1490_v58 = vsel %vm1487_vm5, %v1489_v60, %v1485_v54  ;;  %v1475_v50 = vsel %vm1472_vm6, %v1474_v56, %v1470_v30  ;;  %v1579_v22 = vpop.permute.xlu2 %1578 }
 0x6c2   : > { %v1509_v14 = vsub.f32 1.0, %v1508_v52  ;;  %v1524_v52 = vmul.f32 %v1505_v39, %v1432_v31  ;;  %v1522_v15 = vmul.f32 %v1475_v50, %v1427_v55  ;;  %v4882_v31 = vld [vmem:[%s7275_s3 + $0x98] sm:$0xff] }
 0x6c4   : > { %v1510_v11 = vmul.f32 %v5068_v28, %v1509_v14  ;;  %v1523_v14 = vmul.f32 %v1490_v58, %v1429_v63 }
 0x6c6   : > { %v1511_v45 = vadd.f32 %v5068_v28, %v1510_v11  ;;  %v1535_v13 = vpack.c.bf16 %v1523_v14, %v1522_v15 }
 0x6c8   : > { %v1515_v37 = vsel %vm1514_vm3, %v5068_v28, %v1511_v45 }
 0x6c9   : > { %v1520_v29 = vsel %vm1517_vm4, %v1519_v35, %v1515_v37  ;;  %v1574_v42 = vpop.permute.xlu2 %1573 }
 0x6ca   : > { %v1525_v59 = vmul.f32 %v1520_v29, %v1434_v20  ;;  %v1584_v29 = vpop.permute.xlu0 %1583 }
 0x6cc   : > { %v1536_v28 = vpack.c.bf16 %v1525_v59, %v1524_v52 }
 0x6ce   : > { %1624 = vmatpush.bf16.msrb.mxu3 %v1536_v28 }
 0x6d2   : > { %1625 = vmatpush.bf16.msrb.mxu3 %v1535_v13 }
 0x6d5   : > { %4467 = vmatmul.msk.bf16.vlgmr.msrb.gmra.mxu3 %vm463_vm0, %v4879_v57 }
 0x6e5   : > { %4468 = vmatmul.msk.bf16.gmra.mxu3 %vm463_vm0, %v4880_v38 }
 0x6f5   : > { %4469 = vmatmul.msk.bf16.gmra.mxu3 %vm463_vm0, %v4881_v46 }
 0x705   : > { %4470 = vmatmul.msk.bf16.gmra.mxu3 %vm463_vm0, %v4882_v31 }
 0x758   : > { %v6466_v16 = vpop.f32.mrf.mxu3 }
 0x760   : > { %v6468_v21 = vpop.f32.mrf.mxu3 }
 0x768   : > { %v1632_v61 = vpop.f32.mrf.mxu3 }
 0x770   : > { %v6470_v24 = vpop.f32.mrf.mxu3 }
 0x778   : > { %v1637_v11 = vpop.f32.mrf.mxu3 }
 0x779   : > { %v1638_v17 = vadd.f32 %v1637_v11, %v1569_v26 }
 0x77b   : > { %v4471_v45 = vmul.f32 -1.442695, %v1638_v17 }
 0x780   : > { %v1639_v43 = vpop.f32.mrf.mxu3 }
 0x781   : > { %v1640_v18 = vadd.f32 %v1639_v43, %v1574_v42  ;;  %v1559_v42 = vpop.permute.xlu0 %1558 }
 0x783   : > { %v4472_v33 = vmul.f32 -1.442695, %v1640_v18  ;;  %v1633_v18 = vadd.f32 %v1632_v61, %v1559_v42 }
 0x785   : > { %5069 = vpow2.f32 %v4472_v33 }
 0x786   : > { %5071 = vpow2.f32 %v4471_v45 }
 0x788   : > { %v1642_v54 = vpop.f32.mrf.mxu3 }
 0x789   : > { %v1643_v20 = vadd.f32 %v1642_v54, %v1579_v22 }
 0x78b   : > { %v5070_v39 = vpop.eup %5069  ;;  %v4473_v35 = vmul.f32 -1.442695, %v1643_v20 }
 0x78c   : > { %v5072_v60 = vpop.eup %5071  ;;  %v6472_v37 = vadd.f32 1.0, %v5070_v39 }
 0x78d   : > { %5073 = vpow2.f32 %v4473_v35  ;;  %v6474_v30 = vadd.f32 1.0, %v5072_v60 }
 0x78e   : > { %5075 = vrcp.f32 %v6472_v37  ;;  %vm1683_vm9 = vweird.f32 %v6472_v37 }
 0x78f   : > { %5077 = vrcp.f32 %v6474_v30  ;;  %vm1668_vm14 = vweird.f32 %v6474_v30 }
 0x790   : > { %v1644_v56 = vpop.f32.mrf.mxu3 }
 0x791   : > { %v1645_v58 = vadd.f32 %v1644_v56, %v1584_v29  ;;  %v1687_v56 = vand.u32 2147483647, %v6472_v37 }
 0x793   : > { %v5074_v63 = vpop.eup %5073  ;;  %v4474_v52 = vmul.f32 -1.442695, %v1645_v58  ;;  %v1689_v58 = vand.u32 2147483648, %v6472_v37  ;;  %vm1688_vm6 = vcmp.eq.f32.partialorder %v1687_v56, 8.507059e+37 }
 0x794   : > { %v1661_v59 = vadd.f32 1.0, %v5074_v63  ;;  %v6478_v50 = vpop.eup %5075 }
 0x795   : > { %5079 = vpow2.f32 %v4474_v52  ;;  %v6480_v55 = vpop.eup %5077  ;;  %v1679_v14 = vmul.f32 %v6478_v50, %v6472_v37  ;;  %vm1684_vm10 = vweird.f32 %v6478_v50 }
 0x796   : > { %5081 = vrcp.f32 %v1661_v59  ;;  %v1664_v13 = vmul.f32 %v6480_v55, %v6474_v30  ;;  %v1704_v54 = vand.u32 2147483648, %v1661_v59  ;;  %vm1669_vm8 = vweird.f32 %v6480_v55  ;;  %vm6508_vm15 = vmor %vm1683_vm9, %vm1684_vm10 }
 0x797   : > { %v1680_v46 = vsub.f32 1.0, %v1679_v14  ;;  %vm1698_vm11 = vweird.f32 %v1661_v59  ;;  %v1702_v39 = vand.u32 2147483647, %v1661_v59  ;;  %v1672_v14 = vand.u32 2147483647, %v6474_v30  ;;  %vm6514_vm3 = vmor %vm1668_vm14, %vm1669_vm8 }
 0x798   : > { %v1665_v22 = vsub.f32 1.0, %v1664_v13  ;;  %v1674_v13 = vand.u32 2147483648, %v6474_v30 }
 0x799   : > { %v1681_v26 = vmul.f32 %v6478_v50, %v1680_v46  ;;  %v1564_v46 = vpop.permute.xlu1 %1563  ;;  %vm1703_vm1 = vcmp.eq.f32.partialorder %v1702_v39, 8.507059e+37  ;;  %v1549_v39 = vpop.permute.xlu2 %1548 }
 0x79a   : > { %v1666_v43 = vmul.f32 %v6480_v55, %v1665_v22  ;;  %v1635_v37 = vadd.f32 %v6470_v24, %v1564_v46  ;;  %v1628_v60 = vadd.f32 %v6466_v16, %v1549_v39  ;;  %v4885_v16 = vld [vmem:[%s7275_s3 + $0xb0] sm:$0xff] }
 0x79b   : > { %v5080_v28 = vpop.eup %5079  ;;  %v1682_v35 = vadd.f32 %v6478_v50, %v1681_v26  ;;  %v1690_v26 = vor.u32 1.1754944e-38, %v1689_v58 }
 0x79c   : > { %v5082_v15 = vpop.eup %5081  ;;  %v1662_v57 = vadd.f32 1.0, %v5080_v28  ;;  %v1667_v29 = vadd.f32 %v6480_v55, %v1666_v43  ;;  %v1554_v43 = vpop.permute.xlu0 %1553 }
 0x79d   : > { %v1694_v38 = vmul.f32 %v5082_v15, %v1661_v59  ;;  %vm1699_vm7 = vweird.f32 %v5082_v15  ;;  %v1705_v59 = vor.u32 1.1754944e-38, %v1704_v54  ;;  %v1686_v30 = vsel %vm6508_vm15, %v6478_v50, %v1682_v35 }
 0x79e   : > { %5083 = vrcp.f32 %v1662_v57  ;;  %vm6492_vm12 = vmor %vm1698_vm11, %vm1699_vm7  ;;  %v1719_v61 = vand.u32 2147483648, %v1662_v57  ;;  %v1717_v28 = vand.u32 2147483647, %v1662_v57  ;;  %vm1713_vm2 = vweird.f32 %v1662_v57 }
 0x79f   : > { %v1695_v31 = vsub.f32 1.0, %v1694_v38  ;;  %v1691_v54 = vsel %vm1688_vm6, %v1690_v26, %v1686_v30  ;;  %v1630_v50 = vadd.f32 %v6468_v21, %v1554_v43  ;;  %vm1673_vm7 = vcmp.eq.f32.partialorder %v1672_v14, 8.507059e+37  ;;  %v4884_v21 = vld [vmem:[%s7275_s3 + $0xa8] sm:$0xff] }
 0x7a0   : > { %vm1718_vm5 = vcmp.eq.f32.partialorder %v1717_v28, 8.507059e+37 }
 0x7a1   : > { %v1696_v11 = vmul.f32 %v5082_v15, %v1695_v31 }
 0x7a3   : > { %v1697_v33 = vadd.f32 %v5082_v15, %v1696_v11  ;;  %v1720_v11 = vor.u32 1.1754944e-38, %v1719_v61  ;;  %v1724_v61 = vmul.f32 %v1691_v54, %v1630_v50 }
 0x7a4   : > { %v5084_v17 = vpop.eup %5083 }
 0x7a5   : > { %v1709_v45 = vmul.f32 %v5084_v17, %v1662_v57  ;;  %v1701_v63 = vsel %vm6492_vm12, %v5082_v15, %v1697_v33  ;;  %vm1714_vm13 = vweird.f32 %v5084_v17  ;;  %v1671_v57 = vsel %vm6514_vm3, %v6480_v55, %v1667_v29  ;;  %v4883_v55 = vld [vmem:[%s7275_s3 + $0xa0] sm:$0xff] }
 0x7a6   : > { %v1706_v22 = vsel %vm1703_vm1, %v1705_v59, %v1701_v63  ;;  %vm1715_vm4 = vmor %vm1713_vm2, %vm1714_vm13  ;;  %v1675_v33 = vor.u32 1.1754944e-38, %v1674_v13  ;;  %v1780_v59 = vpop.permute.xlu1 %1779  ;;  %v1770_v13 = vpop.permute.xlu0 %1769 }
 0x7a7   : > { %v1710_v20 = vsub.f32 1.0, %v1709_v45 }
 0x7a8   : > { %v1676_v35 = vsel %vm1673_vm7, %v1675_v33, %v1671_v57  ;;  %v1785_v33 = vpop.permute.xlu2 %1784 }
 0x7a9   : > { %v1711_v52 = vmul.f32 %v5084_v17, %v1710_v20  ;;  %v1725_v20 = vmul.f32 %v1706_v22, %v1633_v18  ;;  %v1723_v58 = vmul.f32 %v1676_v35, %v1628_v60  ;;  %v4886_v18 = vld [vmem:[%s7275_s3 + $0xb8] sm:$0xff] }
 0x7ab   : > { %v1712_v15 = vadd.f32 %v5084_v17, %v1711_v52  ;;  %v1736_v63 = vpack.c.bf16 %v1724_v61, %v1723_v58 }
 0x7ad   : > { %v1716_v42 = vsel %vm1715_vm4, %v5084_v17, %v1712_v15 }
 0x7ae   : > { %v1721_v45 = vsel %vm1718_vm5, %v1720_v11, %v1716_v42  ;;  %v1775_v46 = vpop.permute.xlu1 %1774 }
 0x7af   : > { %v1726_v24 = vmul.f32 %v1721_v45, %v1635_v37 }
 0x7b1   : > { %v1737_v17 = vpack.c.bf16 %v1726_v24, %v1725_v20 }
 0x7b3   : > { %1825 = vmatpush.bf16.msra.mxu0 %v1737_v17 }
 0x7b7   : > { %1826 = vmatpush.bf16.msra.mxu0 %v1736_v63 }
 0x7ba   : > { %4507 = vmatmul.msk.bf16.vlgmr.msra.gmra.mxu0 %vm463_vm0, %v4883_v55 }
 0x7ca   : > { %4508 = vmatmul.msk.bf16.gmra.mxu0 %vm463_vm0, %v4884_v21 }
 0x7da   : > { %4509 = vmatmul.msk.bf16.gmra.mxu0 %vm463_vm0, %v4885_v16 }
 0x7ea   : > { %4510 = vmatmul.msk.bf16.gmra.mxu0 %vm463_vm0, %v4886_v18 }
 0x837   : > { %v6544_v29 = vpop.f32.mrf.mxu0 }
 0x83f   : > { %v6546_v56 = vpop.f32.mrf.mxu0 }
 0x847   : > { %v1833_v52 = vpop.f32.mrf.mxu0 }
 0x84f   : > { %v6548_v28 = vpop.f32.mrf.mxu0 }
 0x857   : > { %v1838_v14 = vpop.f32.mrf.mxu0 }
 0x858   : > { %v1839_v38 = vadd.f32 %v1838_v14, %v1770_v13 }
 0x85a   : > { %v4511_v30 = vmul.f32 -1.442695, %v1839_v38 }
 0x85f   : > { %v1840_v15 = vpop.f32.mrf.mxu0 }
 0x860   : > { %v1841_v31 = vadd.f32 %v1840_v15, %v1775_v46  ;;  %v1760_v46 = vpop.permute.xlu2 %1759 }
 0x862   : > { %v4512_v37 = vmul.f32 -1.442695, %v1841_v31  ;;  %v1834_v31 = vadd.f32 %v1833_v52, %v1760_v46 }
 0x864   : > { %5085 = vpow2.f32 %v4512_v37 }
 0x865   : > { %5087 = vpow2.f32 %v4511_v30 }
 0x867   : > { %v1843_v22 = vpop.f32.mrf.mxu0 }
 0x868   : > { %v1844_v11 = vadd.f32 %v1843_v22, %v1780_v59 }
 0x86a   : > { %v5086_v26 = vpop.eup %5085  ;;  %v4513_v42 = vmul.f32 -1.442695, %v1844_v11 }
 0x86b   : > { %v5088_v57 = vpop.eup %5087  ;;  %v6550_v43 = vadd.f32 1.0, %v5086_v26 }
 0x86c   : > { %5089 = vpow2.f32 %v4513_v42  ;;  %v6552_v45 = vadd.f32 1.0, %v5088_v57 }
 0x86d   : > { %5091 = vrcp.f32 %v6550_v43  ;;  %vm1884_vm10 = vweird.f32 %v6550_v43 }
 0x86e   : > { %5093 = vrcp.f32 %v6552_v45  ;;  %vm1869_vm15 = vweird.f32 %v6552_v45 }
 0x86f   : > { %v1845_v54 = vpop.f32.mrf.mxu0 }
 0x870   : > { %v1846_v50 = vadd.f32 %v1845_v54, %v1785_v33  ;;  %v1888_v54 = vand.u32 2147483647, %v6550_v43 }
 0x872   : > { %v5090_v20 = vpop.eup %5089  ;;  %v4514_v24 = vmul.f32 -1.442695, %v1846_v50  ;;  %v1890_v50 = vand.u32 2147483648, %v6550_v43  ;;  %vm1889_vm7 = vcmp.eq.f32.partialorder %v1888_v54, 8.507059e+37 }
 0x873   : > { %v1862_v39 = vadd.f32 1.0, %v5090_v20  ;;  %v6556_v35 = vpop.eup %5091 }
 0x874   : > { %5095 = vpow2.f32 %v4514_v24  ;;  %v6558_v60 = vpop.eup %5093  ;;  %v1880_v61 = vmul.f32 %v6556_v35, %v6550_v43  ;;  %vm1885_vm11 = vweird.f32 %v6556_v35 }
 0x875   : > { %5097 = vrcp.f32 %v1862_v39  ;;  %v1865_v63 = vmul.f32 %v6558_v60, %v6552_v45  ;;  %v1905_v22 = vand.u32 2147483648, %v1862_v39  ;;  %vm1870_vm9 = vweird.f32 %v6558_v60  ;;  %vm6586_vm1 = vmor %vm1884_vm10, %vm1885_vm11 }
 0x876   : > { %v1881_v16 = vsub.f32 1.0, %v1880_v61  ;;  %vm1899_vm12 = vweird.f32 %v1862_v39  ;;  %v1903_v26 = vand.u32 2147483647, %v1862_v39  ;;  %v1873_v61 = vand.u32 2147483647, %v6552_v45  ;;  %vm6592_vm4 = vmor %vm1869_vm15, %vm1870_vm9 }
 0x877   : > { %v1866_v59 = vsub.f32 1.0, %v1865_v63  ;;  %v1875_v63 = vand.u32 2147483648, %v6552_v45 }
 0x878   : > { %v1882_v13 = vmul.f32 %v6556_v35, %v1881_v16  ;;  %v1765_v16 = vpop.permute.xlu0 %1764  ;;  %vm1904_vm2 = vcmp.eq.f32.partialorder %v1903_v26, 8.507059e+37  ;;  %v1750_v26 = vpop.permute.xlu1 %1749 }
 0x879   : > { %v1867_v15 = vmul.f32 %v6558_v60, %v1866_v59  ;;  %v1836_v43 = vadd.f32 %v6548_v28, %v1765_v16 }
 0x87a   : > { %v5096_v17 = vpop.eup %5095  ;;  %v1883_v42 = vadd.f32 %v6556_v35, %v1882_v13  ;;  %v1891_v13 = vor.u32 1.1754944e-38, %v1890_v50 }
 0x87b   : > { %v5098_v58 = vpop.eup %5097  ;;  %v1863_v55 = vadd.f32 1.0, %v5096_v17  ;;  %v1868_v33 = vadd.f32 %v6558_v60, %v1867_v15  ;;  %v1755_v15 = vpop.permute.xlu2 %1754 }
 0x87c   : > { %v1895_v21 = vmul.f32 %v5098_v58, %v1862_v39  ;;  %vm1900_vm8 = vweird.f32 %v5098_v58  ;;  %v1906_v39 = vor.u32 1.1754944e-38, %v1905_v22  ;;  %v1887_v45 = vsel %vm6586_vm1, %v6556_v35, %v1883_v42 }
 0x87d   : > { %5099 = vrcp.f32 %v1863_v55  ;;  %vm6570_vm13 = vmor %vm1899_vm12, %vm1900_vm8  ;;  %v1920_v52 = vand.u32 2147483648, %v1863_v55  ;;  %v1918_v17 = vand.u32 2147483647, %v1863_v55  ;;  %vm1914_vm3 = vweird.f32 %v1863_v55 }
 0x87e   : > { %v1896_v18 = vsub.f32 1.0, %v1895_v21  ;;  %v1892_v22 = vsel %vm1889_vm7, %v1891_v13, %v1887_v45  ;;  %v1831_v35 = vadd.f32 %v6546_v56, %v1755_v15  ;;  %vm1874_vm8 = vcmp.eq.f32.partialorder %v1873_v61, 8.507059e+37 }
 0x87f   : > { %vm1919_vm6 = vcmp.eq.f32.partialorder %v1918_v17, 8.507059e+37  ;;  %v1299_v21 = vsub.f32 1.0, %v6282_v3 }
 0x880   : > { %v1897_v14 = vmul.f32 %v5098_v58, %v1896_v18  ;;  %v1947_v50 = vpop.permute.xlu0 %1946  ;;  %v1952_v17 = vpop.permute.xlu1 %1951 }
 0x882   : > { %v1898_v37 = vadd.f32 %v5098_v58, %v1897_v14  ;;  %v1921_v14 = vor.u32 1.1754944e-38, %v1920_v52 }
 0x883   : > { %v5100_v38 = vpop.eup %5099  ;;  %v1957_v16 = vpop.permute.xlu2 %1956 }
 0x884   : > { %v1910_v30 = vmul.f32 %v5100_v38, %v1863_v55  ;;  %v1902_v20 = vsel %vm6570_vm13, %v5098_v58, %v1898_v37  ;;  %vm1915_vm14 = vweird.f32 %v5100_v38  ;;  %v1872_v55 = vsel %vm6592_vm4, %v6558_v60, %v1868_v33 }
 0x885   : > { %v1907_v59 = vsel %vm1904_vm2, %v1906_v39, %v1902_v20  ;;  %vm1916_vm5 = vmor %vm1914_vm3, %vm1915_vm14  ;;  %v1876_v37 = vor.u32 1.1754944e-38, %v1875_v63  ;;  %v6612_v60 = vmul.f32 %v1892_v22, %v1831_v35  ;;  %v1296_v39 = vsub.f32 1.0, %v6284_v6 }
 0x886   : > { %v1911_v11 = vsub.f32 1.0, %v1910_v30  ;;  %v1298_v63 = vsub.f32 1.0, %v6280_v62 }
 0x887   : > { %v1877_v42 = vsel %vm1874_vm8, %v1876_v37, %v1872_v55 }
 0x888   : > { %v1912_v24 = vmul.f32 %v5100_v38, %v1911_v11  ;;  %v6605_v11 = vmul.f32 %v1907_v59, %v1834_v31  ;;  %v4887_v31 = vld [vmem:[%s7277_s5 + $0x10] sm:$0xff]  ;;  %v6632_v59 = vadd.f32 1e-05, %v1296_v39 }
 0x88a   : > { %v1913_v58 = vadd.f32 %v5100_v38, %v1912_v24  ;;  %v1297_v24 = vsub.f32 1.0, %v6286_v9  ;;  %v6635_v9 = vadd.f32 1e-05, %v1298_v63 }
 0x88c   : > { %v1917_v46 = vsel %vm1916_vm5, %v5100_v38, %v1913_v58  ;;  %v1829_v38 = vadd.f32 %v6544_v29, %v1750_v26  ;;  %v4888_v29 = vld [vmem:[%s7277_s5 + $0x18] sm:$0xff]  ;;  %v6630_v18 = vadd.f32 1e-05, %v1297_v24 }
 0x88d   : > { %v1922_v30 = vsel %vm1919_vm6, %v1921_v14, %v1917_v46  ;;  %v1303_v46 = vadd.f32 1e-05, %v1299_v21 }
 0x88e   : > { %v6607_v28 = vmul.f32 %v1922_v30, %v1836_v43  ;;  %v6614_v52 = vmul.f32 %v1877_v42, %v1829_v38  ;;  %v1962_v43 = vpop.permute.xlu0 %1961 }
 0x890   : > { %v1938_v57 = vpack.c.bf16 %v6607_v28, %v6605_v11  ;;  %v1937_v56 = vpack.c.bf16 %v6612_v60, %v6614_v52 }
 0x892   : > { %1986 = vmatpush.bf16.msra.mxu1 %v1938_v57 }
 0x896   : > { %1987 = vmatpush.bf16.msra.mxu1 %v1937_v56 }
 0x899   : > { %4531 = vmatmul.msk.bf16.vlgmr.msra.gmra.mxu1 %vm463_vm0, %v4887_v31 }
 0x8a9   : > { %4532 = vmatmul.msk.bf16.gmra.mxu1 %vm463_vm0, %v4888_v29 }
 0x916   : > { %v1989_v33 = vpop.f32.mrf.mxu1 }
 0x917   : > { %v1990_v58 = vadd.f32 %v1989_v33, %v1947_v50 }
 0x919   : > { %v1999_v55 = vmul.f32 %v1990_v58, %v6632_v59 }
 0x91e   : > { %v1991_v54 = vpop.f32.mrf.mxu1 }
 0x91f   : > { %v1992_v61 = vadd.f32 %v1991_v54, %v1952_v17 }
 0x921   : > { %v2000_v13 = vmul.f32 %v1992_v61, %v6630_v18 }
 0x923   : > { %v2003_v15 = vmax.f32 %v1999_v55, %v2000_v13 }
 0x926   : > { %v1994_v20 = vpop.f32.mrf.mxu1 }
 0x927   : > { %v1995_v45 = vadd.f32 %v1994_v20, %v1957_v16 }
 0x929   : > { %v2001_v62 = vmul.f32 %v1995_v45, %v6635_v9 }
 0x92e   : > { %v1996_v14 = vpop.f32.mrf.mxu1 }
 0x92f   : > { %v1997_v6 = vadd.f32 %v1996_v14, %v1962_v43 }
 0x931   : > { %v2002_v3 = vmul.f32 %v1997_v6, %v1303_v46 }
 0x933   : > { %v2004_v30 = vmax.f32 %v2001_v62, %v2002_v3 }
 0x935   : > { %v2005_v37 = vmax.f32 %v2003_v15, %v2004_v30 }
 0x937   : > { %v2006_v22 = vrot.slane %v2005_v37, 4 }
 0x939   : > { %v2007_v35 = vmax.f32 %v2005_v37, %v2006_v22 }
 0x93b   : > { %v2008_v26 = vrot.slane %v2007_v35, 2 }
 0x93d   : > { %v2009_v42 = vmax.f32 %v2007_v35, %v2008_v26 }
 0x93f   : > { %v2010_v38 = vrot.slane %v2009_v42, 1 }
 0x941   : > { %v2011_v57 = vmax.f32 %v2009_v42, %v2010_v38 }
 0x943   : > { %v2012_v56 = vsub.f32 %v1999_v55, %v2011_v57  ;;  %v2013_v31 = vsub.f32 %v2000_v13, %v2011_v57  ;;  %v2014_v29 = vsub.f32 %v2001_v62, %v2011_v57  ;;  %v2015_v33 = vsub.f32 %v2002_v3, %v2011_v57 }
 0x945   : > { %v2016_v54 = vmul.f32 1.442695, %v2012_v56  ;;  %v2018_v50 = vmul.f32 1.442695, %v2013_v31  ;;  %v2020_v20 = vmul.f32 1.442695, %v2014_v29 }
 0x946   : > { %v2022_v24 = vmul.f32 1.442695, %v2015_v33  ;;  %v5331_v33 = vld [vmem:[%s7275_s3] sm:$0xff] }
 0x947   : > { %5101 = vpow2.f32 %v2016_v54  ;;  %v5332_v54 = vld [vmem:[%s7275_s3 + $0x8] sm:$0xff] }
 0x948   : > { %5103 = vpow2.f32 %v2018_v50  ;;  %v5333_v50 = vld [vmem:[%s7275_s3 + $0x10] sm:$0xff] }
 0x949   : > { %5105 = vpow2.f32 %v2020_v20 }
 0x94a   : > { %5107 = vpow2.f32 %v2022_v24 }
 0x94d   : > { %v5102_v17 = vpop.eup %5101 }
 0x94e   : > { %v5104_v39 = vpop.eup %5103 }
 0x94f   : > { %v2024_v61 = vadd.f32 %v5104_v39, %v5102_v17  ;;  %v5106_v63 = vpop.eup %5105 }
 0x950   : > { %v5108_v16 = vpop.eup %5107 }
 0x951   : > { %v2025_v21 = vadd.f32 %v5106_v63, %v2024_v61 }
 0x953   : > { %v2026_v58 = vadd.f32 %v5108_v16, %v2025_v21 }
 0x955   : > { %v2027_v45 = vrot.slane %v2026_v58, 4 }
 0x957   : > { %v2028_v43 = vadd.f32 %v2027_v45, %v2026_v58 }
 0x959   : > { %v2029_v14 = vrot.slane %v2028_v43, 2 }
 0x95b   : > { %v2030_v13 = vadd.f32 %v2029_v14, %v2028_v43 }
 0x95d   : > { %v2031_v6 = vrot.slane %v2030_v13, 1 }
 0x95f   : > { %v2032_v55 = vadd.f32 %v2031_v6, %v2030_v13 }
 0x961   : > { %5109 = vrcp.f32 %v2032_v55 }
 0x967   : > { %v5110_v62 = vpop.eup %5109 }
 0x968   : > { %v6639_v3 = vmul.f32 %v5110_v62, %v5106_v63  ;;  %v2037_v15 = vmul.f32 %v5110_v62, %v5108_v16  ;;  %v6641_v30 = vmul.f32 %v5110_v62, %v5102_v17  ;;  %v6643_v37 = vmul.f32 %v5110_v62, %v5104_v39 }
 0x96a   : > { %v2040_v22 = vmul.f32 %v6639_v3, %v5672_v0  ;;  %v2041_v35 = vmul.f32 %v2037_v15, %v5674_v1  ;;  %v2045_v26 = vsub.f32 1.0, %v2037_v15  ;;  %v2038_v38 = vmul.f32 %v6641_v30, %v5686_v12 }
 0x96b   : > { %v2039_v57 = vmul.f32 %v6643_v37, %v5684_v10 }
 0x96c   : > { %v2055_v42 = vpack.c.bf16 %v2041_v35, %v2040_v22  ;;  %v2049_v56 = vadd.f32 1e-05, %v2045_v26 }
 0x96d   : > { %v2054_v31 = vpack.c.bf16 %v2039_v57, %v2038_v38 }
 0x96e   : > { %2062 = vmatpush.bf16.msra.mxu2 %v2055_v42  ;;  %v6652_v29 = vmul.f32 %v2049_v56, %v1303_v46  ;;  %v5334_v46 = vld [vmem:[%s7275_s3 + $0x18] sm:$0xff] }
 0x972   : > { %2063 = vmatpush.bf16.msra.mxu2 %v2054_v31 }
 0x975   : > { %4533 = vmatmul.msk.bf16.vlgmr.msra.gmra.mxu2 %vm463_vm0, %v5331_v33 }
 0x985   : > { %4534 = vmatmul.msk.bf16.gmra.mxu2 %vm463_vm0, %v5332_v54 }
 0x995   : > { %4535 = vmatmul.msk.bf16.gmra.mxu2 %vm463_vm0, %v5333_v50 }
 0x9a5   : > { %4536 = vmatmul.msk.bf16.gmra.mxu2 %vm463_vm0, %v5334_v46 }
 0x9f8   : > { %v6670_v20 = vpop.f32.mrf.mxu2 }
 0xa00   : > { %v6672_v24 = vpop.f32.mrf.mxu2 }
 0xa08   : > { %v2070_v17 = vpop.f32.mrf.mxu2 }
 0xa10   : > { %v6674_v39 = vpop.f32.mrf.mxu2 }
 0xa18   : > { %v2075_v61 = vpop.f32.mrf.mxu2 }
 0xa19   : > { %v2076_v63 = vadd.f32 %v2075_v61, %v5905_v27 }
 0xa1b   : > { %v4537_v58 = vmul.f32 -1.442695, %v2076_v63 }
 0xa20   : > { %v2077_v21 = vpop.f32.mrf.mxu2 }
 0xa21   : > { %v2078_v16 = vadd.f32 %v2077_v21, %v5917_v32 }
 0xa23   : > { %v4538_v45 = vmul.f32 -1.442695, %v2078_v16 }
 0xa25   : > { %5111 = vpow2.f32 %v4538_v45 }
 0xa26   : > { %5113 = vpow2.f32 %v4537_v58 }
 0xa28   : > { %v2080_v43 = vpop.f32.mrf.mxu2 }
 0xa29   : > { %v2081_v14 = vadd.f32 %v2080_v43, %v5897_v23 }
 0xa2b   : > { %v5112_v13 = vpop.eup %5111  ;;  %v4539_v6 = vmul.f32 -1.442695, %v2081_v14 }
 0xa2c   : > { %v5114_v55 = vpop.eup %5113  ;;  %v6679_v62 = vadd.f32 1.0, %v5112_v13  ;;  %v2071_v13 = vadd.f32 %v2070_v17, %v5948_v5 }
 0xa2d   : > { %5115 = vpow2.f32 %v4539_v6  ;;  %v6681_v15 = vadd.f32 1.0, %v5114_v55 }
 0xa2e   : > { %5117 = vrcp.f32 %v6679_v62  ;;  %vm2121_vm11 = vweird.f32 %v6679_v62 }
 0xa2f   : > { %5119 = vrcp.f32 %v6681_v15  ;;  %vm2106_vm1 = vweird.f32 %v6681_v15 }
 0xa30   : > { %v2082_v22 = vpop.f32.mrf.mxu2 }
 0xa31   : > { %v2083_v35 = vadd.f32 %v2082_v22, %v5934_v47 }
 0xa33   : > { %v5116_v26 = vpop.eup %5115  ;;  %v4540_v42 = vmul.f32 -1.442695, %v2083_v35 }
 0xa34   : > { %v2099_v38 = vadd.f32 1.0, %v5116_v26  ;;  %v5118_v57 = vpop.eup %5117 }
 0xa35   : > { %5121 = vpow2.f32 %v4540_v42  ;;  %v6686_v56 = vpop.eup %5119  ;;  %v2117_v33 = vmul.f32 %v5118_v57, %v6679_v62  ;;  %vm2122_vm12 = vweird.f32 %v5118_v57 }
 0xa36   : > { %5123 = vrcp.f32 %v2099_v38  ;;  %v2102_v50 = vmul.f32 %v6686_v56, %v6681_v15  ;;  %v2142_v22 = vand.u32 2147483648, %v2099_v38  ;;  %vm2107_vm10 = vweird.f32 %v6686_v56  ;;  %vm6710_vm2 = vmor %vm2121_vm11, %vm2122_vm12 }
 0xa37   : > { %v2118_v63 = vsub.f32 1.0, %v2117_v33  ;;  %vm2136_vm13 = vweird.f32 %v2099_v38  ;;  %v2140_v26 = vand.u32 2147483647, %v2099_v38  ;;  %vm6716_vm5 = vmor %vm2106_vm1, %vm2107_vm10 }
 0xa38   : > { %v2103_v16 = vsub.f32 1.0, %v2102_v50  ;;  %v2125_v50 = vand.u32 2147483647, %v6679_v62 }
 0xa39   : > { %v2119_v45 = vmul.f32 %v5118_v57, %v2118_v63  ;;  %vm2141_vm4 = vcmp.eq.f32.partialorder %v2140_v26, 8.507059e+37 }
 0xa3a   : > { %v2104_v14 = vmul.f32 %v6686_v56, %v2103_v16  ;;  %vm2126_vm8 = vcmp.eq.f32.partialorder %v2125_v50, 8.507059e+37 }
 0xa3b   : > { %v5122_v31 = vpop.eup %5121  ;;  %v2120_v42 = vadd.f32 %v5118_v57, %v2119_v45  ;;  %v2112_v45 = vand.u32 2147483648, %v6681_v15 }
 0xa3c   : > { %v5124_v54 = vpop.eup %5123  ;;  %v2100_v46 = vadd.f32 1.0, %v5122_v31  ;;  %v2105_v17 = vadd.f32 %v6686_v56, %v2104_v14 }
 0xa3d   : > { %v2132_v61 = vmul.f32 %v5124_v54, %v2099_v38  ;;  %vm2137_vm9 = vweird.f32 %v5124_v54  ;;  %v2110_v38 = vand.u32 2147483647, %v6681_v15  ;;  %v2073_v15 = vadd.f32 %v6674_v39, %v5977_v34 }
 0xa3e   : > { %5125 = vrcp.f32 %v2100_v46  ;;  %vm6695_vm14 = vmor %vm2136_vm13, %vm2137_vm9  ;;  %v2157_v33 = vand.u32 2147483648, %v2100_v46  ;;  %v2155_v16 = vand.u32 2147483647, %v2100_v46  ;;  %vm2151_vm3 = vweird.f32 %v2100_v46 }
 0xa3f   : > { %v2133_v21 = vsub.f32 1.0, %v2132_v61  ;;  %v2127_v61 = vand.u32 2147483648, %v6679_v62  ;;  %vm2111_vm9 = vcmp.eq.f32.partialorder %v2110_v38, 8.507059e+37 }
 0xa40   : > { %vm2156_vm7 = vcmp.eq.f32.partialorder %v2155_v16, 8.507059e+37 }
 0xa41   : > { %v2134_v58 = vmul.f32 %v5124_v54, %v2133_v21 }
 0xa43   : > { %v2135_v55 = vadd.f32 %v5124_v54, %v2134_v58  ;;  %v2143_v58 = vor.u32 1.1754944e-38, %v2142_v22  ;;  %v2158_v22 = vor.u32 1.1754944e-38, %v2157_v33  ;;  %v2066_v33 = vadd.f32 %v6670_v20, %v5998_v51  ;;  %v5338_v20 = vld [vmem:[%s7275_s3 + $0x38] sm:$0xff] }
 0xa44   : > { %v5126_v43 = vpop.eup %5125 }
 0xa45   : > { %v2147_v6 = vmul.f32 %v5126_v43, %v2100_v46  ;;  %v2139_v21 = vsel %vm6695_vm14, %v5124_v54, %v2135_v55  ;;  %vm2152_vm15 = vweird.f32 %v5126_v43  ;;  %v2124_v55 = vsel %vm6710_vm2, %v5118_v57, %v2120_v42 }
 0xa46   : > { %v2144_v62 = vsel %vm2141_vm4, %v2143_v58, %v2139_v21  ;;  %vm2153_vm6 = vmor %vm2151_vm3, %vm2152_vm15  ;;  %v2109_v46 = vsel %vm6716_vm5, %v6686_v56, %v2105_v17  ;;  %v2068_v57 = vadd.f32 %v6672_v24, %v5994_v44  ;;  %v5335_v56 = vld [vmem:[%s7275_s3 + $0x20] sm:$0xff]  ;;  %v5336_v24 = vld [vmem:[%s7275_s3 + $0x28] sm:$0xff] }
 0xa47   : > { %v2148_v35 = vsub.f32 1.0, %v2147_v6  ;;  %v2163_v42 = vmul.f32 %v2144_v62, %v2071_v13 }
 0xa49   : > { %v2149_v63 = vmul.f32 %v5126_v43, %v2148_v35  ;;  %v2128_v35 = vor.u32 1.1754944e-38, %v2127_v61 }
 0xa4b   : > { %v2150_v6 = vadd.f32 %v5126_v43, %v2149_v63  ;;  %v2113_v63 = vor.u32 1.1754944e-38, %v2112_v45  ;;  %v2129_v5 = vsel %vm2126_vm8, %v2128_v35, %v2124_v55 }
 0xa4c   : > { %v2162_v61 = vmul.f32 %v2129_v5, %v2068_v57  ;;  %v5337_v5 = vld [vmem:[%s7275_s3 + $0x30] sm:$0xff] }
 0xa4d   : > { %v2154_v31 = vsel %vm2153_vm6, %v5126_v43, %v2150_v6  ;;  %v2114_v39 = vsel %vm2111_vm9, %v2113_v63, %v2109_v46 }
 0xa4e   : > { %v2159_v26 = vsel %vm2156_vm7, %v2158_v22, %v2154_v31  ;;  %v2161_v21 = vmul.f32 %v2114_v39, %v2066_v33 }
 0xa4f   : > { %v2164_v14 = vmul.f32 %v2159_v26, %v2073_v15 }
 0xa50   : > { %v2165_v16 = vpack.c.bf16 %v2162_v61, %v2161_v21 }
 0xa51   : > { %v2166_v43 = vpack.c.bf16 %v2164_v14, %v2163_v42 }
 0xa53   : > { %2173 = vmatpush.bf16.msra.mxu3 %v2166_v43 }
 0xa57   : > { %2174 = vmatpush.bf16.msra.mxu3 %v2165_v16 }
 0xa5a   : > { %4541 = vmatmul.msk.bf16.vlgmr.msra.gmra.mxu3 %vm463_vm0, %v5335_v56 }
 0xa6a   : > { %4542 = vmatmul.msk.bf16.gmra.mxu3 %vm463_vm0, %v5336_v24 }
 0xa7a   : > { %4543 = vmatmul.msk.bf16.gmra.mxu3 %vm463_vm0, %v5337_v5 }
 0xa8a   : > { %4544 = vmatmul.msk.bf16.gmra.mxu3 %vm463_vm0, %v5338_v20 }
 0xadd   : > { %v6747_v13 = vpop.f32.mrf.mxu3 }
 0xae5   : > { %v6749_v17 = vpop.f32.mrf.mxu3 }
 0xaed   : > { %v2181_v50 = vpop.f32.mrf.mxu3 }
 0xaf5   : > { %v6751_v58 = vpop.f32.mrf.mxu3 }
 0xafd   : > { %v2186_v38 = vpop.f32.mrf.mxu3 }
 0xafe   : > { %v2187_v45 = vadd.f32 %v2186_v38, %v6026_v4 }
 0xb00   : > { %v4545_v55 = vmul.f32 -1.442695, %v2187_v45 }
 0xb05   : > { %v2188_v6 = vpop.f32.mrf.mxu3 }
 0xb06   : > { %v2189_v54 = vadd.f32 %v2188_v6, %v6029_v8 }
 0xb08   : > { %v4546_v15 = vmul.f32 -1.442695, %v2189_v54 }
 0xb0a   : > { %5127 = vpow2.f32 %v4546_v15 }
 0xb0b   : > { %5129 = vpow2.f32 %v4545_v55 }
 0xb0d   : > { %v2191_v62 = vpop.f32.mrf.mxu3 }
 0xb0e   : > { %v2192_v22 = vadd.f32 %v2191_v62, %v6024_v2 }
 0xb10   : > { %v5128_v35 = vpop.eup %5127  ;;  %v4547_v31 = vmul.f32 -1.442695, %v2192_v22  ;;  %v2182_v22 = vadd.f32 %v2181_v50, %v6051_v49 }
 0xb11   : > { %v5130_v46 = vpop.eup %5129  ;;  %v6756_v26 = vadd.f32 1.0, %v5128_v35 }
 0xb12   : > { %5131 = vpow2.f32 %v4547_v31  ;;  %v6758_v63 = vadd.f32 1.0, %v5130_v46 }
 0xb13   : > { %5133 = vrcp.f32 %v6756_v26  ;;  %vm2232_vm12 = vweird.f32 %v6756_v26 }
 0xb14   : > { %5135 = vrcp.f32 %v6758_v63  ;;  %vm2217_vm2 = vweird.f32 %v6758_v63 }
 0xb15   : > { %v2193_v57 = vpop.f32.mrf.mxu3 }
 0xb16   : > { %v2194_v42 = vadd.f32 %v2193_v57, %v6037_v25 }
 0xb18   : > { %v5132_v14 = vpop.eup %5131  ;;  %v4548_v39 = vmul.f32 -1.442695, %v2194_v42 }
 0xb19   : > { %v2210_v33 = vadd.f32 1.0, %v5132_v14  ;;  %v5134_v43 = vpop.eup %5133 }
 0xb1a   : > { %5137 = vpow2.f32 %v4548_v39  ;;  %v6763_v61 = vpop.eup %5135  ;;  %v2228_v16 = vmul.f32 %v5134_v43, %v6756_v26  ;;  %vm2233_vm13 = vweird.f32 %v5134_v43 }
 0xb1b   : > { %5139 = vrcp.f32 %v2210_v33  ;;  %v2213_v24 = vmul.f32 %v6763_v61, %v6758_v63  ;;  %v2253_v46 = vand.u32 2147483648, %v2210_v33  ;;  %vm2218_vm11 = vweird.f32 %v6763_v61  ;;  %vm6787_vm3 = vmor %vm2232_vm12, %vm2233_vm13 }
 0xb1c   : > { %v2229_v38 = vsub.f32 1.0, %v2228_v16  ;;  %vm2247_vm14 = vweird.f32 %v2210_v33  ;;  %v2251_v42 = vand.u32 2147483647, %v2210_v33  ;;  %v2236_v16 = vand.u32 2147483647, %v6756_v26  ;;  %vm6793_vm6 = vmor %vm2217_vm2, %vm2218_vm11 }
 0xb1d   : > { %v2214_v6 = vsub.f32 1.0, %v2213_v24  ;;  %v2238_v24 = vand.u32 2147483648, %v6756_v26 }
 0xb1e   : > { %v2230_v55 = vmul.f32 %v5134_v43, %v2229_v38  ;;  %vm2252_vm5 = vcmp.eq.f32.partialorder %v2251_v42, 8.507059e+37  ;;  %vm2237_vm9 = vcmp.eq.f32.partialorder %v2236_v16, 8.507059e+37 }
 0xb1f   : > { %v2215_v62 = vmul.f32 %v6763_v61, %v2214_v6  ;;  %v2254_v6 = vor.u32 1.1754944e-38, %v2253_v46  ;;  %v2239_v46 = vor.u32 1.1754944e-38, %v2238_v24 }
 0xb20   : > { %v5138_v21 = vpop.eup %5137  ;;  %v2231_v14 = vadd.f32 %v5134_v43, %v2230_v55 }
 0xb21   : > { %v5140_v56 = vpop.eup %5139  ;;  %v2211_v5 = vadd.f32 1.0, %v5138_v21  ;;  %v2216_v50 = vadd.f32 %v6763_v61, %v2215_v62 }
 0xb22   : > { %v2243_v20 = vmul.f32 %v5140_v56, %v2210_v33  ;;  %vm2248_vm10 = vweird.f32 %v5140_v56  ;;  %v2221_v33 = vand.u32 2147483647, %v6758_v63 }
 0xb23   : > { %5141 = vrcp.f32 %v2211_v5  ;;  %vm6772_vm15 = vmor %vm2247_vm14, %vm2248_vm10  ;;  %v2268_v21 = vand.u32 2147483648, %v2211_v5  ;;  %vm2262_vm4 = vweird.f32 %v2211_v5 }
 0xb24   : > { %v2244_v45 = vsub.f32 1.0, %v2243_v20  ;;  %vm2222_vm10 = vcmp.eq.f32.partialorder %v2221_v33, 8.507059e+37 }
 0xb26   : > { %v2245_v54 = vmul.f32 %v5140_v56, %v2244_v45  ;;  %v2266_v45 = vand.u32 2147483647, %v2211_v5 }
 0xb28   : > { %v2246_v31 = vadd.f32 %v5140_v56, %v2245_v54  ;;  %v2223_v54 = vand.u32 2147483648, %v6758_v63  ;;  %v2184_v63 = vadd.f32 %v6751_v58, %v6079_v19  ;;  %vm2267_vm8 = vcmp.eq.f32.partialorder %v2266_v45, 8.507059e+37 }
 0xb29   : > { %v5142_v15 = vpop.eup %5141 }
 0xb2a   : > { %v2258_v35 = vmul.f32 %v5142_v15, %v2211_v5  ;;  %v2250_v38 = vsel %vm6772_vm15, %v5140_v56, %v2246_v31  ;;  %vm2263_vm1 = vweird.f32 %v5142_v15  ;;  %v2269_v31 = vor.u32 1.1754944e-38, %v2268_v21 }
 0xb2b   : > { %v2255_v26 = vsel %vm2252_vm5, %v2254_v6, %v2250_v38  ;;  %vm2264_vm7 = vmor %vm2262_vm4, %vm2263_vm1  ;;  %v2220_v5 = vsel %vm6793_vm6, %v6763_v61, %v2216_v50  ;;  %v2224_v39 = vor.u32 1.1754944e-38, %v2223_v54  ;;  %v2177_v21 = vadd.f32 %v6747_v13, %v6100_v41  ;;  %v4889_v61 = vld [vmem:[%s7275_s3 + $0xc0] sm:$0xff]  ;;  %v4891_v13 = vld [vmem:[%s7275_s3 + $0xd0] sm:$0xff]  ;;  %v2329_v54 = vpop.permute.xlu1 %2328 }
 0xb2c   : > { %v2259_v57 = vsub.f32 1.0, %v2258_v35  ;;  %v2235_v35 = vsel %vm6787_vm3, %v5134_v43, %v2231_v14  ;;  %v2179_v43 = vadd.f32 %v6749_v17, %v6096_v36  ;;  %v2274_v14 = vmul.f32 %v2255_v26, %v2182_v22  ;;  %v4890_v17 = vld [vmem:[%s7275_s3 + $0xc8] sm:$0xff]  ;;  %v4892_v22 = vld [vmem:[%s7275_s3 + $0xd8] sm:$0xff] }
 0xb2d   : > { %v2225_v58 = vsel %vm2222_vm10, %v2224_v39, %v2220_v5 }
 0xb2e   : > { %v2260_v20 = vmul.f32 %v5142_v15, %v2259_v57  ;;  %v2272_v38 = vmul.f32 %v2225_v58, %v2177_v21 }
 0xb30   : > { %v2261_v62 = vadd.f32 %v5142_v15, %v2260_v20  ;;  %v2240_v20 = vsel %vm2237_vm9, %v2239_v46, %v2235_v35 }
 0xb31   : > { %v2273_v24 = vmul.f32 %v2240_v20, %v2179_v43  ;;  %v2334_v20 = vpop.permute.xlu2 %2333 }
 0xb32   : > { %v2265_v57 = vsel %vm2264_vm7, %v5142_v15, %v2261_v62  ;;  %v2319_v62 = vpop.permute.xlu0 %2318 }
 0xb33   : > { %v2270_v42 = vsel %vm2267_vm8, %v2269_v31, %v2265_v57  ;;  %v2285_v45 = vpack.c.bf16 %v2273_v24, %v2272_v38  ;;  %v2324_v26 = vpop.permute.xlu1 %2323 }
 0xb34   : > { %v2275_v55 = vmul.f32 %v2270_v42, %v2184_v63 }
 0xb36   : > { %v2286_v15 = vpack.c.bf16 %v2275_v55, %v2274_v14 }
 0xb38   : > { %2374 = vmatpush.bf16.msrb.mxu0 %v2286_v15 }
 0xb3c   : > { %2375 = vmatpush.bf16.msrb.mxu0 %v2285_v45 }
 0xb3f   : > { %4581 = vmatmul.msk.bf16.vlgmr.msrb.gmra.mxu0 %vm463_vm0, %v4889_v61 }
 0xb4f   : > { %4582 = vmatmul.msk.bf16.gmra.mxu0 %vm463_vm0, %v4890_v17 }
 0xb5f   : > { %4583 = vmatmul.msk.bf16.gmra.mxu0 %vm463_vm0, %v4891_v13  ;;  %v6832_v13 = vpop.permute.xlu2 %2308 }
 0xb6f   : > { %4584 = vmatmul.msk.bf16.gmra.mxu0 %vm463_vm0, %v4892_v22 }
 0xbbc   : > { %v6824_v50 = vpop.f32.mrf.mxu0 }
 0xbc4   : > { %v6826_v16 = vpop.f32.mrf.mxu0 }
 0xbcc   : > { %v6828_v6 = vpop.f32.mrf.mxu0 }
 0xbd4   : > { %v6830_v33 = vpop.f32.mrf.mxu0 }
 0xbdc   : > { %v2387_v56 = vpop.f32.mrf.mxu0 }
 0xbdd   : > { %v2388_v35 = vadd.f32 %v2387_v56, %v2319_v62 }
 0xbdf   : > { %v4585_v63 = vmul.f32 -1.442695, %v2388_v35 }
 0xbe1   : > { %5143 = vpow2.f32 %v4585_v63 }
 0xbe4   : > { %v2389_v31 = vpop.f32.mrf.mxu0 }
 0xbe5   : > { %v2390_v46 = vadd.f32 %v2389_v31, %v2324_v26 }
 0xbe7   : > { %v5144_v57 = vpop.eup %5143  ;;  %v4586_v5 = vmul.f32 -1.442695, %v2390_v46 }
 0xbe8   : > { %v2409_v42 = vadd.f32 1.0, %v5144_v57 }
 0xbe9   : > { %5145 = vpow2.f32 %v4586_v5 }
 0xbea   : > { %5147 = vrcp.f32 %v2409_v42  ;;  %v2424_v26 = vand.u32 2147483648, %v2409_v42  ;;  %vm2418_vm12 = vweird.f32 %v2409_v42  ;;  %v2422_v31 = vand.u32 2147483647, %v2409_v42 }
 0xbec   : > { %v2392_v39 = vpop.f32.mrf.mxu0  ;;  %vm2423_vm1 = vcmp.eq.f32.partialorder %v2422_v31, 8.507059e+37 }
 0xbed   : > { %v2393_v43 = vadd.f32 %v2392_v39, %v2329_v54 }
 0xbef   : > { %v5146_v14 = vpop.eup %5145  ;;  %v4587_v55 = vmul.f32 -1.442695, %v2393_v43 }
 0xbf0   : > { %v5148_v58 = vpop.eup %5147  ;;  %v2410_v21 = vadd.f32 1.0, %v5146_v14  ;;  %v2425_v14 = vor.u32 1.1754944e-38, %v2424_v26 }
 0xbf1   : > { %v2414_v15 = vmul.f32 %v5148_v58, %v2409_v42  ;;  %5149 = vpow2.f32 %v4587_v55  ;;  %vm2419_vm11 = vweird.f32 %v5148_v58  ;;  %v2304_v42 = vpop.permute.xlu2 %2303 }
 0xbf2   : > { %5151 = vrcp.f32 %v2410_v21  ;;  %vm6834_vm13 = vmor %vm2418_vm12, %vm2419_vm11  ;;  %v2439_v5 = vand.u32 2147483648, %v2410_v21  ;;  %vm2433_vm15 = vweird.f32 %v2410_v21 }
 0xbf3   : > { %v2415_v24 = vsub.f32 1.0, %v2414_v15 }
 0xbf4   : > { %v2394_v38 = vpop.f32.mrf.mxu0 }
 0xbf5   : > { %v2395_v45 = vadd.f32 %v2394_v38, %v2334_v20  ;;  %v2416_v61 = vmul.f32 %v5148_v58, %v2415_v24  ;;  %v2437_v20 = vand.u32 2147483647, %v2410_v21  ;;  %v2299_v38 = vpop.permute.xlu1 %2298 }
 0xbf7   : > { %v5150_v17 = vpop.eup %5149  ;;  %v4588_v22 = vmul.f32 -1.442695, %v2395_v45  ;;  %v2417_v54 = vadd.f32 %v5148_v58, %v2416_v61  ;;  %vm2438_vm3 = vcmp.eq.f32.partialorder %v2437_v20, 8.507059e+37 }
 0xbf8   : > { %v5152_v62 = vpop.eup %5151  ;;  %v2411_v56 = vadd.f32 1.0, %v5150_v17 }
 0xbf9   : > { %v2429_v35 = vmul.f32 %v5152_v62, %v2410_v21  ;;  %5153 = vpow2.f32 %v4588_v22  ;;  %vm2434_vm14 = vweird.f32 %v5152_v62  ;;  %v2421_v39 = vsel %vm6834_vm13, %v5148_v58, %v2417_v54 }
 0xbfa   : > { %5155 = vrcp.f32 %v2411_v56  ;;  %vm2435_vm2 = vmor %vm2433_vm15, %vm2434_vm14  ;;  %v2426_v61 = vsel %vm2423_vm1, %v2425_v14, %v2421_v39  ;;  %v2440_v22 = vor.u32 1.1754944e-38, %v2439_v5  ;;  %v2454_v49 = vand.u32 2147483648, %v2411_v56 }
 0xbfb   : > { %v2430_v63 = vsub.f32 1.0, %v2429_v35  ;;  %v2378_v35 = vadd.f32 %v6824_v50, %v2299_v38  ;;  %vm2448_vm5 = vweird.f32 %v2411_v56  ;;  %v2452_v5 = vand.u32 2147483647, %v2411_v56 }
 0xbfc   : > { %v2455_v14 = vor.u32 1.1754944e-38, %v2454_v49  ;;  %v4893_v49 = vld [vmem:[%s7275_s3 + $0xe0] sm:$0xff] }
 0xbfd   : > { %v2431_v57 = vmul.f32 %v5152_v62, %v2430_v63  ;;  %v2380_v63 = vadd.f32 %v6826_v16, %v2304_v42  ;;  %v2473_v26 = vmul.f32 %v2426_v61, %v2378_v35  ;;  %vm2453_vm9 = vcmp.eq.f32.partialorder %v2452_v5, 8.507059e+37  ;;  %v2314_v42 = vpop.permute.xlu0 %2313 }
 0xbfe   : > { %v2383_v61 = vadd.f32 %v6828_v6, %v6832_v13  ;;  %v4894_v6 = vld [vmem:[%s7275_s3 + $0xe8] sm:$0xff]  ;;  %v4896_v13 = vld [vmem:[%s7275_s3 + $0xf8] sm:$0xff] }
 0xbff   : > { %v5154_v43 = vpop.eup %5153  ;;  %v2432_v55 = vadd.f32 %v5152_v62, %v2431_v57 }
 0xc00   : > { %v5156_v15 = vpop.eup %5155  ;;  %v2412_v24 = vadd.f32 1.0, %v5154_v43 }
 0xc01   : > { %v2444_v45 = vmul.f32 %v5156_v15, %v2411_v56  ;;  %v2436_v17 = vsel %vm2435_vm2, %v5152_v62, %v2432_v55  ;;  %vm2449_vm4 = vweird.f32 %v5156_v15 }
 0xc02   : > { %5157 = vrcp.f32 %v2412_v24  ;;  %v2441_v54 = vsel %vm2438_vm3, %v2440_v22, %v2436_v17  ;;  %vm2450_vm6 = vmor %vm2448_vm5, %vm2449_vm4  ;;  %v2469_v50 = vand.u32 2147483648, %v2412_v24  ;;  %v2467_v20 = vand.u32 2147483647, %v2412_v24 }
 0xc03   : > { %v2445_v58 = vsub.f32 1.0, %v2444_v45  ;;  %v2474_v21 = vmul.f32 %v2441_v54, %v2380_v63  ;;  %vm2463_vm8 = vweird.f32 %v2412_v24  ;;  %v2385_v17 = vadd.f32 %v6830_v33, %v2314_v42  ;;  %v4895_v33 = vld [vmem:[%s7275_s3 + $0xf0] sm:$0xff] }
 0xc04   : > { %v2470_v45 = vor.u32 1.1754944e-38, %v2469_v50  ;;  %vm2468_vm11 = vcmp.eq.f32.partialorder %v2467_v20, 8.507059e+37 }
 0xc05   : > { %v2446_v46 = vmul.f32 %v5156_v15, %v2445_v58  ;;  %v2486_v57 = vpack.c.bf16 %v2474_v21, %v2473_v26  ;;  %v2530_v26 = vpop.permute.xlu0 %2529  ;;  %v2520_v21 = vpop.permute.xlu2 %2519 }
 0xc07   : > { %v2447_v19 = vadd.f32 %v5156_v15, %v2446_v46 }
 0xc08   : > { %v5158_v31 = vpop.eup %5157 }
 0xc09   : > { %v2459_v43 = vmul.f32 %v5158_v31, %v2412_v24  ;;  %v2451_v16 = vsel %vm2450_vm6, %v5156_v15, %v2447_v19  ;;  %vm2464_vm7 = vweird.f32 %v5158_v31 }
 0xc0a   : > { %v2456_v38 = vsel %vm2453_vm9, %v2455_v14, %v2451_v16  ;;  %vm2465_vm10 = vmor %vm2463_vm8, %vm2464_vm7  ;;  %v2535_v14 = vpop.permute.xlu1 %2534 }
 0xc0b   : > { %v2460_v62 = vsub.f32 1.0, %v2459_v43  ;;  %v2475_v35 = vmul.f32 %v2456_v38, %v2383_v61 }
 0xc0d   : > { %v2461_v39 = vmul.f32 %v5158_v31, %v2460_v62  ;;  %v2525_v43 = vpop.permute.xlu0 %2524 }
 0xc0f   : > { %v2462_v55 = vadd.f32 %v5158_v31, %v2461_v39 }
 0xc11   : > { %v2466_v56 = vsel %vm2465_vm10, %v5158_v31, %v2462_v55 }
 0xc12   : > { %v2471_v22 = vsel %vm2468_vm11, %v2470_v45, %v2466_v56 }
 0xc13   : > { %v2476_v19 = vmul.f32 %v2471_v22, %v2385_v17 }
 0xc15   : > { %v2487_v15 = vpack.c.bf16 %v2476_v19, %v2475_v35 }
 0xc17   : > { %2575 = vmatpush.bf16.msrb.mxu1 %v2487_v15 }
 0xc1b   : > { %2576 = vmatpush.bf16.msrb.mxu1 %v2486_v57 }
 0xc1e   : > { %4621 = vmatmul.msk.bf16.vlgmr.msrb.gmra.mxu1 %vm463_vm0, %v4893_v49 }
 0xc2e   : > { %4622 = vmatmul.msk.bf16.gmra.mxu1 %vm463_vm0, %v4894_v6 }
 0xc3e   : > { %4623 = vmatmul.msk.bf16.gmra.mxu1 %vm463_vm0, %v4895_v33  ;;  %v2510_v33 = vpop.permute.xlu1 %2509 }
 0xc4e   : > { %4624 = vmatmul.msk.bf16.gmra.mxu1 %vm463_vm0, %v4896_v13 }
 0xc9b   : > { %v2578_v24 = vpop.f32.mrf.mxu1 }
 0xca3   : > { %v6861_v63 = vpop.f32.mrf.mxu1 }
 0xcab   : > { %v6863_v58 = vpop.f32.mrf.mxu1 }
 0xcb3   : > { %v6865_v54 = vpop.f32.mrf.mxu1 }
 0xcbb   : > { %v2588_v46 = vpop.f32.mrf.mxu1 }
 0xcbc   : > { %v2589_v57 = vadd.f32 %v2588_v46, %v2520_v21 }
 0xcbe   : > { %v4625_v31 = vmul.f32 -1.442695, %v2589_v57  ;;  %v2500_v57 = vpop.permute.xlu0 %2499 }
 0xcc0   : > { %5159 = vpow2.f32 %v4625_v31 }
 0xcc3   : > { %v2590_v62 = vpop.f32.mrf.mxu1 }
 0xcc4   : > { %v2591_v5 = vadd.f32 %v2590_v62, %v2525_v43 }
 0xcc6   : > { %v5160_v50 = vpop.eup %5159  ;;  %v4626_v39 = vmul.f32 -1.442695, %v2591_v5  ;;  %v2579_v5 = vadd.f32 %v2578_v24, %v2500_v57  ;;  %v2505_v24 = vpop.permute.xlu1 %2504 }
 0xcc7   : > { %v2610_v16 = vadd.f32 1.0, %v5160_v50 }
 0xcc8   : > { %5161 = vpow2.f32 %v4626_v39 }
 0xcc9   : > { %5163 = vrcp.f32 %v2610_v16  ;;  %v2625_v15 = vand.u32 2147483648, %v2610_v16  ;;  %v2623_v49 = vand.u32 2147483647, %v2610_v16  ;;  %vm2619_vm13 = vweird.f32 %v2610_v16 }
 0xccb   : > { %v2593_v20 = vpop.f32.mrf.mxu1  ;;  %v2626_v62 = vor.u32 1.1754944e-38, %v2625_v15  ;;  %vm2624_vm15 = vcmp.eq.f32.partialorder %v2623_v49, 8.507059e+37  ;;  %v2581_v49 = vadd.f32 %v6861_v63, %v2505_v24 }
 0xccc   : > { %v2594_v55 = vadd.f32 %v2593_v20, %v2530_v26  ;;  %v1928_v20 = vadd.f32 %v6614_v52, %v6268_v53 }
 0xcce   : > { %v5162_v42 = vpop.eup %5161  ;;  %v4627_v38 = vmul.f32 -1.442695, %v2594_v55 }
 0xccf   : > { %v5164_v45 = vpop.eup %5163  ;;  %v2611_v61 = vadd.f32 1.0, %v5162_v42 }
 0xcd0   : > { %v2615_v17 = vmul.f32 %v5164_v45, %v2610_v16  ;;  %5165 = vpow2.f32 %v4627_v38  ;;  %vm2620_vm12 = vweird.f32 %v5164_v45 }
 0xcd1   : > { %5167 = vrcp.f32 %v2611_v61  ;;  %vm2621_vm14 = vmor %vm2619_vm13, %vm2620_vm12  ;;  %v2640_v16 = vand.u32 2147483648, %v2611_v61  ;;  %v2638_v42 = vand.u32 2147483647, %v2611_v61  ;;  %vm2634_vm2 = vweird.f32 %v2611_v61 }
 0xcd2   : > { %v2616_v56 = vsub.f32 1.0, %v2615_v17 }
 0xcd3   : > { %v2595_v22 = vpop.f32.mrf.mxu1  ;;  %v2641_v15 = vor.u32 1.1754944e-38, %v2640_v16  ;;  %vm2639_vm4 = vcmp.eq.f32.partialorder %v2638_v42, 8.507059e+37 }
 0xcd4   : > { %v2596_v35 = vadd.f32 %v2595_v22, %v2535_v14  ;;  %v2617_v19 = vmul.f32 %v5164_v45, %v2616_v56 }
 0xcd6   : > { %v5166_v6 = vpop.eup %5165  ;;  %v4628_v13 = vmul.f32 -1.442695, %v2596_v35  ;;  %v2618_v21 = vadd.f32 %v5164_v45, %v2617_v19 }
 0xcd7   : > { %v5168_v26 = vpop.eup %5167  ;;  %v2612_v46 = vadd.f32 1.0, %v5166_v6  ;;  %v1929_v6 = vadd.f32 %v6612_v60, %v6266_v40  ;;  %v1930_v40 = vadd.f32 %v6605_v11, %v6259_v48  ;;  %v1931_v48 = vadd.f32 %v6607_v28, %v6261_v7 }
 0xcd8   : > { %v2630_v31 = vmul.f32 %v5168_v26, %v2611_v61  ;;  %5169 = vpow2.f32 %v4628_v13  ;;  %v2622_v43 = vsel %vm2621_vm14, %v5164_v45, %v2618_v21  ;;  %vm2635_vm1 = vweird.f32 %v5168_v26 }
 0xcd9   : > { %5171 = vrcp.f32 %v2612_v46  ;;  %v2627_v39 = vsel %vm2624_vm15, %v2626_v62, %v2622_v43  ;;  %vm2636_vm3 = vmor %vm2634_vm2, %vm2635_vm1  ;;  %v2655_v13 = vand.u32 2147483648, %v2612_v46  ;;  %v2653_v61 = vand.u32 2147483647, %v2612_v46 }
 0xcda   : > { %v2631_v50 = vsub.f32 1.0, %v2630_v31  ;;  %v2674_v14 = vmul.f32 %v2627_v39, %v2579_v5  ;;  %vm2649_vm6 = vweird.f32 %v2612_v46  ;;  %v2584_v5 = vadd.f32 %v6863_v58, %v2510_v33 }
 0xcdb   : > { %v2656_v63 = vor.u32 1.1754944e-38, %v2655_v13  ;;  %vm2654_vm8 = vcmp.eq.f32.partialorder %v2653_v61, 8.507059e+37 }
 0xcdc   : > { %v2632_v55 = vmul.f32 %v5168_v26, %v2631_v50  ;;  %v6869_v38 = vadd.f32 %v2674_v14, %v1928_v20 }
 0xcde   : > { %v5170_v17 = vpop.eup %5169  ;;  %v2633_v56 = vadd.f32 %v5168_v26, %v2632_v55 }
 0xcdf   : > { %v5172_v45 = vpop.eup %5171  ;;  %v2613_v22 = vadd.f32 1.0, %v5170_v17 }
 0xce0   : > { %v2645_v35 = vmul.f32 %v5172_v45, %v2612_v46  ;;  %v2637_v19 = vsel %vm2636_vm3, %v5168_v26, %v2633_v56  ;;  %vm2650_vm5 = vweird.f32 %v5172_v45  ;;  %v2515_v56 = vpop.permute.xlu2 %2514 }
 0xce1   : > { %5173 = vrcp.f32 %v2613_v22  ;;  %v2642_v52 = vsel %vm2639_vm4, %v2641_v15, %v2637_v19  ;;  %vm2651_vm7 = vmor %vm2649_vm6, %vm2650_vm5  ;;  %v2670_v16 = vand.u32 2147483648, %v2613_v22  ;;  %vm2664_vm10 = vweird.f32 %v2613_v22 }
 0xce2   : > { %v2646_v53 = vsub.f32 1.0, %v2645_v35  ;;  %v2675_v21 = vmul.f32 %v2642_v52, %v2581_v49  ;;  %v2586_v33 = vadd.f32 %v6865_v54, %v2515_v56  ;;  %v4898_v54 = vld [vmem:[%s7277_s5 + $0x28] sm:$0xff]  ;;  %v2043_v49 = vsub.f32 1.0, %v6643_v37 }
 0xce3   : > { %v2671_v58 = vor.u32 1.1754944e-38, %v2670_v16  ;;  %v2042_v52 = vsub.f32 1.0, %v6641_v30 }
 0xce4   : > { %v2647_v57 = vmul.f32 %v5172_v45, %v2646_v53  ;;  %v6874_v31 = vadd.f32 %v2675_v21, %v1929_v6  ;;  %v2687_v43 = vpack.c.bf16 %v2675_v21, %v2674_v14  ;;  %v2668_v14 = vand.u32 2147483647, %v2613_v22  ;;  %v2702_v21 = vpop.permute.xlu0 %2701 }
 0xce5   : > { %v2044_v6 = vsub.f32 1.0, %v6639_v3  ;;  %v2047_v13 = vadd.f32 1e-05, %v2043_v49 }
 0xce6   : > { %v2648_v26 = vadd.f32 %v5172_v45, %v2647_v57  ;;  %vm2669_vm12 = vcmp.eq.f32.partialorder %v2668_v14, 8.507059e+37  ;;  %v2046_v57 = vadd.f32 1e-05, %v2042_v52 }
 0xce7   : > { %v5174_v62 = vpop.eup %5173 }
 0xce8   : > { %v2660_v50 = vmul.f32 %v5174_v62, %v2613_v22  ;;  %v2652_v39 = vsel %vm2651_vm7, %v5172_v45, %v2648_v26  ;;  %vm2665_vm9 = vweird.f32 %v5174_v62  ;;  %v4897_v22 = vld [vmem:[%s7277_s5 + $0x20] sm:$0xff]  ;;  %v2697_v28 = vpop.permute.xlu2 %2696  ;;  %v2707_v26 = vpop.permute.xlu1 %2706  ;;  %v6901_v37 = vmul.f32 %v2046_v57, %v6632_v59 }
 0xce9   : > { %v2657_v20 = vsel %vm2654_vm8, %v2656_v63, %v2652_v39  ;;  %vm2666_vm11 = vmor %vm2664_vm10, %vm2665_vm9  ;;  %v6898_v63 = vmul.f32 %v2047_v13, %v6630_v18 }
 0xcea   : > { %v2661_v60 = vsub.f32 1.0, %v2660_v50  ;;  %v2676_v55 = vmul.f32 %v2657_v20, %v2584_v5 }
 0xcec   : > { %v2662_v42 = vmul.f32 %v5174_v62, %v2661_v60  ;;  %v6879_v46 = vadd.f32 %v2676_v55, %v1930_v40 }
 0xcee   : > { %v2663_v17 = vadd.f32 %v5174_v62, %v2662_v42 }
 0xcf0   : > { %v2667_v45 = vsel %vm2666_vm11, %v5174_v62, %v2663_v17  ;;  %v2712_v50 = vpop.permute.xlu2 %2711 }
 0xcf1   : > { %v2672_v24 = vsel %vm2669_vm12, %v2671_v58, %v2667_v45 }
 0xcf2   : > { %v2677_v11 = vmul.f32 %v2672_v24, %v2586_v33 }
 0xcf4   : > { %v6884_v35 = vadd.f32 %v2677_v11, %v1931_v48  ;;  %v2688_v19 = vpack.c.bf16 %v2677_v11, %v2676_v55 }
 0xcf6   : > { %2736 = vmatpush.bf16.msrb.mxu2 %v2688_v19 }
 0xcfa   : > { %2737 = vmatpush.bf16.msrb.mxu2 %v2687_v43  ;;  %v2048_v43 = vadd.f32 1e-05, %v2044_v6 }
 0xcfc   : > { %v6905_v3 = vmul.f32 %v2048_v43, %v6635_v9 }
 0xcfd   : > { %4645 = vmatmul.msk.bf16.vlgmr.msrb.gmra.mxu2 %vm463_vm0, %v4897_v22 }
 0xd0d   : > { %4646 = vmatmul.msk.bf16.gmra.mxu2 %vm463_vm0, %v4898_v54 }
 0xd80   : > { %v2739_v15 = vpop.f32.mrf.mxu2 }
 0xd81   : > { %v2740_v62 = vadd.f32 %v2739_v15, %v2697_v28 }
 0xd83   : > { %v2749_v40 = vmul.f32 %v2740_v62, %v6901_v37 }
 0xd88   : > { %v2741_v7 = vpop.f32.mrf.mxu2 }
 0xd89   : > { %v2742_v61 = vadd.f32 %v2741_v7, %v2702_v21 }
 0xd8b   : > { %v2750_v30 = vmul.f32 %v2742_v61, %v6898_v63 }
 0xd8d   : > { %v2753_v18 = vmax.f32 %v2749_v40, %v2750_v30 }
 0xd90   : > { %v2744_v53 = vpop.f32.mrf.mxu2 }
 0xd91   : > { %v2745_v5 = vadd.f32 %v2744_v53, %v2707_v26 }
 0xd93   : > { %v2751_v60 = vmul.f32 %v2745_v5, %v6905_v3 }
 0xd98   : > { %v2746_v39 = vpop.f32.mrf.mxu2 }
 0xd99   : > { %v2747_v20 = vadd.f32 %v2746_v39, %v2712_v50 }
 0xd9b   : > { %v2752_v55 = vmul.f32 %v2747_v20, %v6652_v29 }
 0xd9d   : > { %v2754_v16 = vmax.f32 %v2751_v60, %v2752_v55 }
 0xd9f   : > { %v2755_v42 = vmax.f32 %v2753_v18, %v2754_v16 }
 0xda1   : > { %v2756_v14 = vrot.slane %v2755_v42, 4 }
 0xda3   : > { %v2757_v17 = vmax.f32 %v2755_v42, %v2756_v14 }
 0xda5   : > { %v2758_v56 = vrot.slane %v2757_v17, 2 }
 0xda7   : > { %v2759_v59 = vmax.f32 %v2757_v17, %v2758_v56  ;;  %v5339_v56 = vld [vmem:[%s7275_s3] sm:$0xff] }
 0xda9   : > { %v2760_v58 = vrot.slane %v2759_v59, 1 }
 0xdab   : > { %v2761_v33 = vmax.f32 %v2759_v59, %v2760_v58  ;;  %v5340_v59 = vld [vmem:[%s7275_s3 + $0x8] sm:$0xff]  ;;  %v5341_v58 = vld [vmem:[%s7275_s3 + $0x10] sm:$0xff] }
 0xdad   : > { %v2762_v45 = vsub.f32 %v2749_v40, %v2761_v33  ;;  %v2763_v24 = vsub.f32 %v2750_v30, %v2761_v33  ;;  %v2764_v9 = vsub.f32 %v2751_v60, %v2761_v33  ;;  %v2765_v48 = vsub.f32 %v2752_v55, %v2761_v33 }
 0xdaf   : > { %v2766_v11 = vmul.f32 1.442695, %v2762_v45  ;;  %v2768_v19 = vmul.f32 1.442695, %v2763_v24  ;;  %v2770_v22 = vmul.f32 1.442695, %v2764_v9 }
 0xdb0   : > { %v2772_v54 = vmul.f32 1.442695, %v2765_v48 }
 0xdb1   : > { %5175 = vpow2.f32 %v2766_v11 }
 0xdb2   : > { %5177 = vpow2.f32 %v2768_v19 }
 0xdb3   : > { %5179 = vpow2.f32 %v2770_v22 }
 0xdb4   : > { %5181 = vpow2.f32 %v2772_v54 }
 0xdb7   : > { %v5176_v15 = vpop.eup %5175 }
 0xdb8   : > { %v5178_v7 = vpop.eup %5177 }
 0xdb9   : > { %v2774_v28 = vadd.f32 %v5178_v7, %v5176_v15  ;;  %v5180_v49 = vpop.eup %5179 }
 0xdba   : > { %v5182_v52 = vpop.eup %5181 }
 0xdbb   : > { %v2775_v53 = vadd.f32 %v5180_v49, %v2774_v28 }
 0xdbd   : > { %v2776_v6 = vadd.f32 %v5182_v52, %v2775_v53 }
 0xdbf   : > { %v2777_v13 = vrot.slane %v2776_v6, 4 }
 0xdc1   : > { %v2778_v21 = vadd.f32 %v2777_v13, %v2776_v6 }
 0xdc3   : > { %v2779_v57 = vrot.slane %v2778_v21, 2 }
 0xdc5   : > { %v2780_v61 = vadd.f32 %v2779_v57, %v2778_v21 }
 0xdc7   : > { %v2781_v43 = vrot.slane %v2780_v61, 1 }
 0xdc9   : > { %v2782_v26 = vadd.f32 %v2781_v43, %v2780_v61 }
 0xdcb   : > { %5183 = vrcp.f32 %v2782_v26 }
 0xdd1   : > { %v5184_v62 = vpop.eup %5183 }
 0xdd2   : > { %v6910_v5 = vmul.f32 %v5184_v62, %v5180_v49  ;;  %v2787_v50 = vmul.f32 %v5184_v62, %v5182_v52  ;;  %v6912_v39 = vmul.f32 %v5184_v62, %v5176_v15  ;;  %v6914_v30 = vmul.f32 %v5184_v62, %v5178_v7 }
 0xdd4   : > { %v2790_v20 = vmul.f32 %v6910_v5, %v5672_v0  ;;  %v2791_v40 = vmul.f32 %v2787_v50, %v5674_v1  ;;  %v2795_v60 = vsub.f32 1.0, %v2787_v50  ;;  %v2788_v18 = vmul.f32 %v6912_v39, %v5686_v12 }
 0xdd5   : > { %v2789_v16 = vmul.f32 %v6914_v30, %v5684_v10 }
 0xdd6   : > { %v2805_v55 = vpack.c.bf16 %v2791_v40, %v2790_v20  ;;  %v2799_v42 = vadd.f32 1e-05, %v2795_v60 }
 0xdd7   : > { %v2804_v14 = vpack.c.bf16 %v2789_v16, %v2788_v18 }
 0xdd8   : > { %2812 = vmatpush.bf16.msrb.mxu3 %v2805_v55  ;;  %v6924_v17 = vmul.f32 %v2799_v42, %v6652_v29  ;;  %v5342_v29 = vld [vmem:[%s7275_s3 + $0x18] sm:$0xff] }
 0xddc   : > { %2813 = vmatpush.bf16.msrb.mxu3 %v2804_v14 }
 0xddf   : > { %4647 = vmatmul.msk.bf16.vlgmr.msrb.gmra.mxu3 %vm463_vm0, %v5339_v56 }
 0xdef   : > { %4648 = vmatmul.msk.bf16.gmra.mxu3 %vm463_vm0, %v5340_v59 }
 0xdff   : > { %4649 = vmatmul.msk.bf16.gmra.mxu3 %vm463_vm0, %v5341_v58 }
 0xe0f   : > { %4650 = vmatmul.msk.bf16.gmra.mxu3 %vm463_vm0, %v5342_v29 }
 0xe62   : > { %v2815_v33 = vpop.f32.mrf.mxu3 }
 0xe6a   : > { %v2817_v45 = vpop.f32.mrf.mxu3 }
 0xe72   : > { %v6942_v24 = vpop.f32.mrf.mxu3 }
 0xe7a   : > { %v6944_v9 = vpop.f32.mrf.mxu3 }
 0xe82   : > { %v2825_v48 = vpop.f32.mrf.mxu3 }
 0xe83   : > { %v2826_v11 = vadd.f32 %v2825_v48, %v5905_v27 }
 0xe85   : > { %v4651_v19 = vmul.f32 -1.442695, %v2826_v11 }
 0xe87   : > { %5185 = vpow2.f32 %v4651_v19 }
 0xe8a   : > { %v2827_v22 = vpop.f32.mrf.mxu3 }
 0xe8b   : > { %v2828_v54 = vadd.f32 %v2827_v22, %v5917_v32 }
 0xe8d   : > { %v5186_v15 = vpop.eup %5185  ;;  %v4652_v7 = vmul.f32 -1.442695, %v2828_v54 }
 0xe8e   : > { %v2847_v28 = vadd.f32 1.0, %v5186_v15 }
 0xe8f   : > { %5187 = vpow2.f32 %v4652_v7 }
 0xe90   : > { %5189 = vrcp.f32 %v2847_v28  ;;  %v2862_v42 = vand.u32 2147483648, %v2847_v28  ;;  %vm2856_vm14 = vweird.f32 %v2847_v28  ;;  %v2860_v14 = vand.u32 2147483647, %v2847_v28 }
 0xe92   : > { %v2830_v49 = vpop.f32.mrf.mxu3  ;;  %v2863_v19 = vor.u32 1.1754944e-38, %v2862_v42  ;;  %vm2861_vm3 = vcmp.eq.f32.partialorder %v2860_v14, 8.507059e+37 }
 0xe93   : > { %v2831_v53 = vadd.f32 %v2830_v49, %v5897_v23 }
 0xe95   : > { %v5188_v52 = vpop.eup %5187  ;;  %v4653_v6 = vmul.f32 -1.442695, %v2831_v53 }
 0xe96   : > { %v5190_v13 = vpop.eup %5189  ;;  %v2848_v21 = vadd.f32 1.0, %v5188_v52  ;;  %v2816_v52 = vadd.f32 %v2815_v33, %v5998_v51 }
 0xe97   : > { %v2852_v57 = vmul.f32 %v5190_v13, %v2847_v28  ;;  %5191 = vpow2.f32 %v4653_v6  ;;  %vm2857_vm13 = vweird.f32 %v5190_v13  ;;  %v2818_v6 = vadd.f32 %v2817_v45, %v5994_v44 }
 0xe98   : > { %5193 = vrcp.f32 %v2848_v21  ;;  %vm6950_vm15 = vmor %vm2856_vm14, %vm2857_vm13  ;;  %v2877_v58 = vand.u32 2147483648, %v2848_v21  ;;  %v2875_v48 = vand.u32 2147483647, %v2848_v21  ;;  %vm2871_vm2 = vweird.f32 %v2848_v21 }
 0xe99   : > { %v2853_v61 = vsub.f32 1.0, %v2852_v57 }
 0xe9a   : > { %v2832_v43 = vpop.f32.mrf.mxu3  ;;  %v2878_v53 = vor.u32 1.1754944e-38, %v2877_v58  ;;  %vm2876_vm5 = vcmp.eq.f32.partialorder %v2875_v48, 8.507059e+37 }
 0xe9b   : > { %v2833_v26 = vadd.f32 %v2832_v43, %v5934_v47  ;;  %v2854_v62 = vmul.f32 %v5190_v13, %v2853_v61 }
 0xe9d   : > { %v5192_v50 = vpop.eup %5191  ;;  %v4654_v20 = vmul.f32 -1.442695, %v2833_v26  ;;  %v2855_v18 = vadd.f32 %v5190_v13, %v2854_v62 }
 0xe9e   : > { %v5194_v40 = vpop.eup %5193  ;;  %v2849_v60 = vadd.f32 1.0, %v5192_v50 }
 0xe9f   : > { %v2867_v55 = vmul.f32 %v5194_v40, %v2848_v21  ;;  %5195 = vpow2.f32 %v4654_v20  ;;  %vm2872_vm1 = vweird.f32 %v5194_v40  ;;  %v2859_v29 = vsel %vm6950_vm15, %v5190_v13, %v2855_v18 }
 0xea0   : > { %5197 = vrcp.f32 %v2849_v60  ;;  %vm2873_vm4 = vmor %vm2871_vm2, %vm2872_vm1  ;;  %v2864_v28 = vsel %vm2861_vm3, %v2863_v19, %v2859_v29  ;;  %vm2886_vm7 = vweird.f32 %v2849_v60  ;;  %v2890_v18 = vand.u32 2147483647, %v2849_v60  ;;  %v7355_v29 = vld [vmem:[#allocation6_spill] sm:$0xff] }
 0xea1   : > { %v2868_v16 = vsub.f32 1.0, %v2867_v55  ;;  %v2911_v61 = vmul.f32 %v2864_v28, %v2816_v52  ;;  %v2892_v55 = vand.u32 2147483648, %v2849_v60  ;;  %v2821_v48 = vadd.f32 %v6942_v24, %v7355_v29  ;;  %v5344_v24 = vld [vmem:[%s7275_s3 + $0x28] sm:$0xff]  ;;  %v5346_v28 = vld [vmem:[%s7275_s3 + $0x38] sm:$0xff] }
 0xea2   : > { %vm2891_vm11 = vcmp.eq.f32.partialorder %v2890_v18, 8.507059e+37 }
 0xea3   : > { %v2869_v59 = vmul.f32 %v5194_v40, %v2868_v16  ;;  %v2893_v14 = vor.u32 1.1754944e-38, %v2892_v55 }
 0xea5   : > { %v5196_v11 = vpop.eup %5195  ;;  %v2870_v22 = vadd.f32 %v5194_v40, %v2869_v59 }
 0xea6   : > { %v5198_v54 = vpop.eup %5197  ;;  %v2850_v15 = vadd.f32 1.0, %v5196_v11  ;;  %v2823_v11 = vadd.f32 %v6944_v9, %v5977_v34  ;;  %v5345_v9 = vld [vmem:[%s7275_s3 + $0x30] sm:$0xff] }
 0xea7   : > { %v2882_v7 = vmul.f32 %v5198_v54, %v2849_v60  ;;  %v2874_v49 = vsel %vm2873_vm4, %v5194_v40, %v2870_v22  ;;  %vm2887_vm6 = vweird.f32 %v5198_v54 }
 0xea8   : > { %5199 = vrcp.f32 %v2850_v15  ;;  %v2879_v57 = vsel %vm2876_vm5, %v2878_v53, %v2874_v49  ;;  %vm2888_vm8 = vmor %vm2886_vm7, %vm2887_vm6  ;;  %v2907_v33 = vand.u32 2147483648, %v2850_v15  ;;  %v2905_v42 = vand.u32 2147483647, %v2850_v15 }
 0xea9   : > { %v2883_v13 = vsub.f32 1.0, %v2882_v7  ;;  %v2912_v43 = vmul.f32 %v2879_v57, %v2818_v6  ;;  %vm2901_vm10 = vweird.f32 %v2850_v15 }
 0xeaa   : > { %v2908_v58 = vor.u32 1.1754944e-38, %v2907_v33  ;;  %vm2906_vm13 = vcmp.eq.f32.partialorder %v2905_v42, 8.507059e+37 }
 0xeab   : > { %v2884_v26 = vmul.f32 %v5198_v54, %v2883_v13  ;;  %v2915_v21 = vpack.c.bf16 %v2912_v43, %v2911_v61 }
 0xead   : > { %v2885_v20 = vadd.f32 %v5198_v54, %v2884_v26 }
 0xeae   : > { %v5200_v62 = vpop.eup %5199 }
 0xeaf   : > { %v2897_v50 = vmul.f32 %v5200_v62, %v2850_v15  ;;  %v2889_v45 = vsel %vm2888_vm8, %v5198_v54, %v2885_v20  ;;  %vm2902_vm9 = vweird.f32 %v5200_v62  ;;  %v5343_v15 = vld [vmem:[%s7275_s3 + $0x20] sm:$0xff] }
 0xeb0   : > { %v2894_v59 = vsel %vm2891_vm11, %v2893_v14, %v2889_v45  ;;  %vm2903_vm12 = vmor %vm2901_vm10, %vm2902_vm9 }
 0xeb1   : > { %v2898_v40 = vsub.f32 1.0, %v2897_v50  ;;  %v2913_v22 = vmul.f32 %v2894_v59, %v2821_v48 }
 0xeb3   : > { %v2899_v16 = vmul.f32 %v5200_v62, %v2898_v40 }
 0xeb5   : > { %v2900_v56 = vadd.f32 %v5200_v62, %v2899_v16 }
 0xeb7   : > { %v2904_v60 = vsel %vm2903_vm12, %v5200_v62, %v2900_v56 }
 0xeb8   : > { %v2909_v19 = vsel %vm2906_vm13, %v2908_v58, %v2904_v60 }
 0xeb9   : > { %v2914_v54 = vmul.f32 %v2909_v19, %v2823_v11 }
 0xebb   : > { %v2916_v7 = vpack.c.bf16 %v2914_v54, %v2913_v22 }
 0xebd   : > { %2923 = vmatpush.bf16.msra.mxu0 %v2916_v7 }
 0xec1   : > { %2924 = vmatpush.bf16.msra.mxu0 %v2915_v21 }
 0xec4   : > { %4655 = vmatmul.msk.bf16.vlgmr.msra.gmra.mxu0 %vm463_vm0, %v5343_v15 }
 0xed4   : > { %4656 = vmatmul.msk.bf16.gmra.mxu0 %vm463_vm0, %v5344_v24 }
 0xee4   : > { %4657 = vmatmul.msk.bf16.gmra.mxu0 %vm463_vm0, %v5345_v9 }
 0xef4   : > { %4658 = vmatmul.msk.bf16.gmra.mxu0 %vm463_vm0, %v5346_v28 }
 0xf41   : > { %v2926_v49 = vpop.f32.mrf.mxu0 }
 0xf49   : > { %v2928_v53 = vpop.f32.mrf.mxu0 }
 0xf51   : > { %v6978_v52 = vpop.f32.mrf.mxu0 }
 0xf59   : > { %v6980_v6 = vpop.f32.mrf.mxu0 }
 0xf61   : > { %v2936_v13 = vpop.f32.mrf.mxu0 }
 0xf62   : > { %v2937_v57 = vadd.f32 %v2936_v13, %v6026_v4 }
 0xf64   : > { %v4659_v61 = vmul.f32 -1.442695, %v2937_v57 }
 0xf66   : > { %5201 = vpow2.f32 %v4659_v61 }
 0xf69   : > { %v2938_v43 = vpop.f32.mrf.mxu0 }
 0xf6a   : > { %v2939_v26 = vadd.f32 %v2938_v43, %v6029_v8 }
 0xf6c   : > { %v5202_v21 = vpop.eup %5201  ;;  %v4660_v62 = vmul.f32 -1.442695, %v2939_v26 }
 0xf6d   : > { %v2958_v50 = vadd.f32 1.0, %v5202_v21 }
 0xf6e   : > { %5203 = vpow2.f32 %v4660_v62 }
 0xf6f   : > { %5205 = vrcp.f32 %v2958_v50  ;;  %v2973_v7 = vand.u32 2147483648, %v2958_v50  ;;  %vm2967_vm15 = vweird.f32 %v2958_v50  ;;  %v2971_v15 = vand.u32 2147483647, %v2958_v50 }
 0xf71   : > { %v2941_v20 = vpop.f32.mrf.mxu0  ;;  %v2974_v43 = vor.u32 1.1754944e-38, %v2973_v7  ;;  %vm2972_vm4 = vcmp.eq.f32.partialorder %v2971_v15, 8.507059e+37 }
 0xf72   : > { %v2942_v55 = vadd.f32 %v2941_v20, %v6024_v2 }
 0xf74   : > { %v5204_v40 = vpop.eup %5203  ;;  %v4661_v18 = vmul.f32 -1.442695, %v2942_v55 }
 0xf75   : > { %v5206_v33 = vpop.eup %5205  ;;  %v2959_v16 = vadd.f32 1.0, %v5204_v40 }
 0xf76   : > { %v2963_v45 = vmul.f32 %v5206_v33, %v2958_v50  ;;  %5207 = vpow2.f32 %v4661_v18  ;;  %vm2968_vm14 = vweird.f32 %v5206_v33  ;;  %v2927_v18 = vadd.f32 %v2926_v49, %v6100_v41 }
 0xf77   : > { %5209 = vrcp.f32 %v2959_v16  ;;  %vm6986_vm1 = vmor %vm2967_vm15, %vm2968_vm14  ;;  %v2988_v28 = vand.u32 2147483648, %v2959_v16  ;;  %v2986_v57 = vand.u32 2147483647, %v2959_v16  ;;  %vm2982_vm3 = vweird.f32 %v2959_v16 }
 0xf78   : > { %v2964_v42 = vsub.f32 1.0, %v2963_v45  ;;  %v2929_v45 = vadd.f32 %v2928_v53, %v6096_v36 }
 0xf79   : > { %v2943_v14 = vpop.f32.mrf.mxu0  ;;  %v2989_v40 = vor.u32 1.1754944e-38, %v2988_v28  ;;  %vm2987_vm6 = vcmp.eq.f32.partialorder %v2986_v57, 8.507059e+37  ;;  %v7358_v57 = vld [vmem:[#allocation7_spill] sm:$0xff] }
 0xf7a   : > { %v2944_v56 = vadd.f32 %v2943_v14, %v6037_v25  ;;  %v2965_v59 = vmul.f32 %v5206_v33, %v2964_v42 }
 0xf7c   : > { %v5208_v58 = vpop.eup %5207  ;;  %v4662_v48 = vmul.f32 -1.442695, %v2944_v56  ;;  %v2966_v22 = vadd.f32 %v5206_v33, %v2965_v59 }
 0xf7d   : > { %v5210_v11 = vpop.eup %5209  ;;  %v2960_v60 = vadd.f32 1.0, %v5208_v58 }
 0xf7e   : > { %v2978_v19 = vmul.f32 %v5210_v11, %v2959_v16  ;;  %5211 = vpow2.f32 %v4662_v48  ;;  %vm2983_vm2 = vweird.f32 %v5210_v11  ;;  %v2970_v13 = vsel %vm6986_vm1, %v5206_v33, %v2966_v22 }
 0xf7f   : > { %5213 = vrcp.f32 %v2960_v60  ;;  %vm2984_vm5 = vmor %vm2982_vm3, %vm2983_vm2  ;;  %v2975_v20 = vsel %vm2972_vm4, %v2974_v43, %v2970_v13  ;;  %v3003_v22 = vand.u32 2147483648, %v2960_v60  ;;  %vm2997_vm8 = vweird.f32 %v2960_v60  ;;  %v7359_v43 = vld [vmem:[#allocation8_spill] sm:$0xff] }
 0xf80   : > { %v2979_v54 = vsub.f32 1.0, %v2978_v19  ;;  %v3022_v14 = vmul.f32 %v2975_v20, %v2927_v18 }
 0xf81   : > { %v3004_v24 = vor.u32 1.1754944e-38, %v3003_v22 }
 0xf82   : > { %v2980_v9 = vmul.f32 %v5210_v11, %v2979_v54  ;;  %v3001_v54 = vand.u32 2147483647, %v2960_v60 }
 0xf84   : > { %v5212_v61 = vpop.eup %5211  ;;  %v2981_v26 = vadd.f32 %v5210_v11, %v2980_v9  ;;  %vm3002_vm12 = vcmp.eq.f32.partialorder %v3001_v54, 8.507059e+37 }
 0xf85   : > { %v5214_v21 = vpop.eup %5213  ;;  %v2961_v62 = vadd.f32 1.0, %v5212_v61  ;;  %v2932_v61 = vadd.f32 %v6978_v52, %v7358_v57  ;;  %v4900_v52 = vld [vmem:[%s7275_s3 + $0x108] sm:$0xff] }
 0xf86   : > { %v2993_v50 = vmul.f32 %v5214_v21, %v2960_v60  ;;  %v2985_v55 = vsel %vm2984_vm5, %v5210_v11, %v2981_v26  ;;  %vm2998_vm7 = vweird.f32 %v5214_v21  ;;  %v2934_v26 = vadd.f32 %v6980_v6, %v7359_v43  ;;  %v4901_v6 = vld [vmem:[%s7275_s3 + $0x110] sm:$0xff] }
 0xf87   : > { %5215 = vrcp.f32 %v2961_v62  ;;  %v2990_v42 = vsel %vm2987_vm6, %v2989_v40, %v2985_v55  ;;  %vm2999_vm9 = vmor %vm2997_vm8, %vm2998_vm7  ;;  %v3018_v49 = vand.u32 2147483648, %v2961_v62  ;;  %v3016_v15 = vand.u32 2147483647, %v2961_v62  ;;  %v4902_v40 = vld [vmem:[%s7275_s3 + $0x118] sm:$0xff] }
 0xf88   : > { %v2994_v33 = vsub.f32 1.0, %v2993_v50  ;;  %v3023_v56 = vmul.f32 %v2990_v42, %v2929_v45  ;;  %vm3012_vm11 = vweird.f32 %v2961_v62 }
 0xf89   : > { %v3019_v13 = vor.u32 1.1754944e-38, %v3018_v49  ;;  %vm3017_vm14 = vcmp.eq.f32.partialorder %v3016_v15, 8.507059e+37 }
 0xf8a   : > { %v2995_v59 = vmul.f32 %v5214_v21, %v2994_v33  ;;  %v3035_v16 = vpack.c.bf16 %v3023_v56, %v3022_v14  ;;  %v3079_v14 = vpop.permute.xlu0 %3078  ;;  %v3069_v56 = vpop.permute.xlu2 %3068 }
 0xf8c   : > { %v2996_v19 = vadd.f32 %v5214_v21, %v2995_v59 }
 0xf8d   : > { %v5216_v58 = vpop.eup %5215 }
 0xf8e   : > { %v3008_v48 = vmul.f32 %v5216_v58, %v2961_v62  ;;  %v3000_v53 = vsel %vm2999_vm9, %v5214_v21, %v2996_v19  ;;  %vm3013_vm10 = vweird.f32 %v5216_v58  ;;  %v4899_v62 = vld [vmem:[%s7275_s3 + $0x100] sm:$0xff] }
 0xf8f   : > { %v3005_v28 = vsel %vm3002_vm12, %v3004_v24, %v3000_v53  ;;  %vm3014_vm13 = vmor %vm3012_vm11, %vm3013_vm10  ;;  %v3084_v53 = vpop.permute.xlu1 %3083 }
 0xf90   : > { %v3009_v11 = vsub.f32 1.0, %v3008_v48  ;;  %v3024_v20 = vmul.f32 %v3005_v28, %v2932_v61 }
 0xf92   : > { %v3010_v7 = vmul.f32 %v5216_v58, %v3009_v11  ;;  %v3074_v48 = vpop.permute.xlu0 %3073 }
 0xf94   : > { %v3011_v9 = vadd.f32 %v5216_v58, %v3010_v7 }
 0xf96   : > { %v3015_v60 = vsel %vm3014_vm13, %v5216_v58, %v3011_v9 }
 0xf97   : > { %v3020_v50 = vsel %vm3017_vm14, %v3019_v13, %v3015_v60 }
 0xf98   : > { %v3025_v21 = vmul.f32 %v3020_v50, %v2934_v26 }
 0xf9a   : > { %v3036_v55 = vpack.c.bf16 %v3025_v21, %v3024_v20 }
 0xf9c   : > { %3124 = vmatpush.bf16.msra.mxu1 %v3036_v55  ;;  %v7022_v55 = vpop.permute.xlu1 %3058 }
 0xfa0   : > { %3125 = vmatpush.bf16.msra.mxu1 %v3035_v16 }
 0xfa3   : > { %4695 = vmatmul.msk.bf16.vlgmr.msra.gmra.mxu1 %vm463_vm0, %v4899_v62 }
 0xfb3   : > { %4696 = vmatmul.msk.bf16.gmra.mxu1 %vm463_vm0, %v4900_v52 }
 0xfc3   : > { %4697 = vmatmul.msk.bf16.gmra.mxu1 %vm463_vm0, %v4901_v6 }
 0xfd3   : > { %4698 = vmatmul.msk.bf16.gmra.mxu1 %vm463_vm0, %v4902_v40 }
0x1020   : > { %v7014_v18 = vpop.f32.mrf.mxu1 }
0x1028   : > { %v7016_v45 = vpop.f32.mrf.mxu1 }
0x1030   : > { %v7018_v33 = vpop.f32.mrf.mxu1 }
0x1038   : > { %v7020_v42 = vpop.f32.mrf.mxu1 }
0x1040   : > { %v3137_v59 = vpop.f32.mrf.mxu1 }
0x1041   : > { %v3138_v16 = vadd.f32 %v3137_v59, %v3069_v56 }
0x1043   : > { %v4699_v58 = vmul.f32 -1.442695, %v3138_v16 }
0x1045   : > { %5217 = vpow2.f32 %v4699_v58 }
0x1048   : > { %v3139_v19 = vpop.f32.mrf.mxu1 }
0x1049   : > { %v3140_v22 = vadd.f32 %v3139_v19, %v3074_v48 }
0x104b   : > { %v5218_v11 = vpop.eup %5217  ;;  %v4700_v54 = vmul.f32 -1.442695, %v3140_v22 }
0x104c   : > { %v3159_v49 = vadd.f32 1.0, %v5218_v11 }
0x104d   : > { %5219 = vpow2.f32 %v4700_v54 }
0x104e   : > { %5221 = vrcp.f32 %v3159_v49  ;;  %v3174_v59 = vand.u32 2147483648, %v3159_v49  ;;  %vm3168_vm1 = vweird.f32 %v3159_v49  ;;  %v3172_v16 = vand.u32 2147483647, %v3159_v49 }
0x1050   : > { %v3142_v7 = vpop.f32.mrf.mxu1  ;;  %vm3173_vm5 = vcmp.eq.f32.partialorder %v3172_v16, 8.507059e+37 }
0x1051   : > { %v3143_v15 = vadd.f32 %v3142_v7, %v3079_v14  ;;  %v3175_v7 = vor.u32 1.1754944e-38, %v3174_v59 }
0x1053   : > { %v5220_v24 = vpop.eup %5219  ;;  %v4701_v9 = vmul.f32 -1.442695, %v3143_v15 }
0x1054   : > { %v5222_v28 = vpop.eup %5221  ;;  %v3160_v13 = vadd.f32 1.0, %v5220_v24 }
0x1055   : > { %v3164_v61 = vmul.f32 %v5222_v28, %v3159_v49  ;;  %5223 = vpow2.f32 %v4701_v9  ;;  %vm3169_vm15 = vweird.f32 %v5222_v28  ;;  %v3054_v49 = vpop.permute.xlu1 %3053  ;;  %v3049_v9 = vpop.permute.xlu0 %3048 }
0x1056   : > { %5225 = vrcp.f32 %v3160_v13  ;;  %vm7024_vm2 = vmor %vm3168_vm1, %vm3169_vm15  ;;  %v3189_v19 = vand.u32 2147483648, %v3160_v13  ;;  %v3187_v11 = vand.u32 2147483647, %v3160_v13  ;;  %vm3183_vm4 = vweird.f32 %v3160_v13 }
0x1057   : > { %v3165_v26 = vsub.f32 1.0, %v3164_v61 }
0x1058   : > { %v3144_v60 = vpop.f32.mrf.mxu1  ;;  %vm3188_vm7 = vcmp.eq.f32.partialorder %v3187_v11, 8.507059e+37 }
0x1059   : > { %v3145_v50 = vadd.f32 %v3144_v60, %v3084_v53  ;;  %v3166_v20 = vmul.f32 %v5222_v28, %v3165_v26 }
0x105b   : > { %v5224_v21 = vpop.eup %5223  ;;  %v4702_v62 = vmul.f32 -1.442695, %v3145_v50  ;;  %v3167_v14 = vadd.f32 %v5222_v28, %v3166_v20  ;;  %v3190_v50 = vor.u32 1.1754944e-38, %v3189_v19  ;;  %v3128_v20 = vadd.f32 %v7014_v18, %v3049_v9 }
0x105c   : > { %v5226_v52 = vpop.eup %5225  ;;  %v3161_v6 = vadd.f32 1.0, %v5224_v21  ;;  %v3130_v21 = vadd.f32 %v7016_v45, %v3054_v49 }
0x105d   : > { %v3179_v40 = vmul.f32 %v5226_v52, %v3160_v13  ;;  %5227 = vpow2.f32 %v4702_v62  ;;  %vm3184_vm3 = vweird.f32 %v5226_v52  ;;  %v3171_v22 = vsel %vm7024_vm2, %v5222_v28, %v3167_v14 }
0x105e   : > { %5229 = vrcp.f32 %v3161_v6  ;;  %vm3185_vm6 = vmor %vm3183_vm4, %vm3184_vm3  ;;  %v3176_v26 = vsel %vm3173_vm5, %v3175_v7, %v3171_v22  ;;  %vm3198_vm9 = vweird.f32 %v3161_v6  ;;  %v3202_v19 = vand.u32 2147483647, %v3161_v6 }
0x105f   : > { %v3180_v56 = vsub.f32 1.0, %v3179_v40  ;;  %v3223_v40 = vmul.f32 %v3176_v26, %v3128_v20 }
0x1060   : > { %vm3203_vm13 = vcmp.eq.f32.partialorder %v3202_v19, 8.507059e+37 }
0x1061   : > { %v3181_v48 = vmul.f32 %v5226_v52, %v3180_v56 }
0x1063   : > { %v5228_v54 = vpop.eup %5227  ;;  %v3182_v53 = vadd.f32 %v5226_v52, %v3181_v48  ;;  %v3204_v48 = vand.u32 2147483648, %v3161_v6 }
0x1064   : > { %v5230_v15 = vpop.eup %5229  ;;  %v3162_v24 = vadd.f32 1.0, %v5228_v54 }
0x1065   : > { %v3194_v61 = vmul.f32 %v5230_v15, %v3161_v6  ;;  %v3186_v60 = vsel %vm3185_vm6, %v5226_v52, %v3182_v53  ;;  %vm3199_vm8 = vweird.f32 %v5230_v15  ;;  %v3205_v54 = vor.u32 1.1754944e-38, %v3204_v48  ;;  %v3064_v53 = vpop.permute.xlu2 %3063 }
0x1066   : > { %5231 = vrcp.f32 %v3162_v24  ;;  %v3191_v62 = vsel %vm3188_vm7, %v3190_v50, %v3186_v60  ;;  %vm3200_vm10 = vmor %vm3198_vm9, %vm3199_vm8  ;;  %v3219_v18 = vand.u32 2147483648, %v3162_v24  ;;  %v3217_v11 = vand.u32 2147483647, %v3162_v24 }
0x1067   : > { %v3195_v28 = vsub.f32 1.0, %v3194_v61  ;;  %v3224_v13 = vmul.f32 %v3191_v62, %v3130_v21  ;;  %vm3213_vm12 = vweird.f32 %v3162_v24  ;;  %v3133_v61 = vadd.f32 %v7018_v33, %v7022_v55  ;;  %v4904_v33 = vld [vmem:[%s7275_s3 + $0x128] sm:$0xff]  ;;  %v4906_v55 = vld [vmem:[%s7275_s3 + $0x138] sm:$0xff] }
0x1068   : > { %v3220_v9 = vor.u32 1.1754944e-38, %v3219_v18  ;;  %v3135_v26 = vadd.f32 %v7020_v42, %v3064_v53  ;;  %vm3218_vm15 = vcmp.eq.f32.partialorder %v3217_v11, 8.507059e+37  ;;  %v4905_v42 = vld [vmem:[%s7275_s3 + $0x130] sm:$0xff]  ;;  %v3285_v11 = vpop.permute.xlu0 %3284 }
0x1069   : > { %v3196_v14 = vmul.f32 %v5230_v15, %v3195_v28  ;;  %v3236_v56 = vpack.c.bf16 %v3224_v13, %v3223_v40 }
0x106b   : > { %v3197_v58 = vadd.f32 %v5230_v15, %v3196_v14  ;;  %v3270_v14 = vpop.permute.xlu1 %3269 }
0x106c   : > { %v5232_v59 = vpop.eup %5231 }
0x106d   : > { %v3209_v16 = vmul.f32 %v5232_v59, %v3162_v24  ;;  %v3201_v45 = vsel %vm3200_vm10, %v5230_v15, %v3197_v58  ;;  %vm3214_vm11 = vweird.f32 %v5232_v59  ;;  %v4903_v24 = vld [vmem:[%s7275_s3 + $0x120] sm:$0xff]  ;;  %v3280_v13 = vpop.permute.xlu2 %3279 }
0x106e   : > { %v3206_v49 = vsel %vm3203_vm13, %v3205_v54, %v3201_v45  ;;  %vm3215_vm14 = vmor %vm3213_vm12, %vm3214_vm11 }
0x106f   : > { %v3210_v52 = vsub.f32 1.0, %v3209_v16  ;;  %v3225_v50 = vmul.f32 %v3206_v49, %v3133_v61 }
0x1071   : > { %v3211_v22 = vmul.f32 %v5232_v59, %v3210_v52 }
0x1073   : > { %v3212_v7 = vadd.f32 %v5232_v59, %v3211_v22 }
0x1075   : > { %v3216_v6 = vsel %vm3215_vm14, %v5232_v59, %v3212_v7  ;;  %v3275_v58 = vpop.permute.xlu2 %3274 }
0x1076   : > { %v3221_v60 = vsel %vm3218_vm15, %v3220_v9, %v3216_v6 }
0x1077   : > { %v3226_v15 = vmul.f32 %v3221_v60, %v3135_v26 }
0x1079   : > { %v3237_v20 = vpack.c.bf16 %v3226_v15, %v3225_v50 }
0x107b   : > { %3325 = vmatpush.bf16.msra.mxu2 %v3237_v20 }
0x107f   : > { %3326 = vmatpush.bf16.msra.mxu2 %v3236_v56 }
0x1082   : > { %4735 = vmatmul.msk.bf16.vlgmr.msra.gmra.mxu2 %vm463_vm0, %v4903_v24 }
0x1092   : > { %4736 = vmatmul.msk.bf16.gmra.mxu2 %vm463_vm0, %v4904_v33  ;;  %v3260_v33 = vpop.permute.xlu0 %3259 }
0x10a2   : > { %4737 = vmatmul.msk.bf16.gmra.mxu2 %vm463_vm0, %v4905_v42 }
0x10b2   : > { %4738 = vmatmul.msk.bf16.gmra.mxu2 %vm463_vm0, %v4906_v55 }
0x1105   : > { %v3328_v21 = vpop.f32.mrf.mxu2 }
0x110d   : > { %v7051_v28 = vpop.f32.mrf.mxu2 }
0x1115   : > { %v7053_v62 = vpop.f32.mrf.mxu2 }
0x111d   : > { %v7055_v40 = vpop.f32.mrf.mxu2 }
0x1125   : > { %v3338_v56 = vpop.f32.mrf.mxu2 }
0x1126   : > { %v3339_v59 = vadd.f32 %v3338_v56, %v3270_v14  ;;  %v3250_v56 = vpop.permute.xlu2 %3249 }
0x1128   : > { %v4739_v16 = vmul.f32 -1.442695, %v3339_v59 }
0x112a   : > { %5233 = vpow2.f32 %v4739_v16 }
0x112d   : > { %v3340_v48 = vpop.f32.mrf.mxu2 }
0x112e   : > { %v3341_v52 = vadd.f32 %v3340_v48, %v3275_v58  ;;  %v3329_v48 = vadd.f32 %v3328_v21, %v3250_v56 }
0x1130   : > { %v5234_v19 = vpop.eup %5233  ;;  %v4740_v18 = vmul.f32 -1.442695, %v3341_v52 }
0x1131   : > { %v3360_v22 = vadd.f32 1.0, %v5234_v19 }
0x1132   : > { %5235 = vpow2.f32 %v4740_v18 }
0x1133   : > { %5237 = vrcp.f32 %v3360_v22  ;;  %v3375_v15 = vand.u32 2147483648, %v3360_v22  ;;  %v3373_v20 = vand.u32 2147483647, %v3360_v22  ;;  %vm3369_vm2 = vweird.f32 %v3360_v22 }
0x1135   : > { %v3343_v45 = vpop.f32.mrf.mxu2  ;;  %v3376_v58 = vor.u32 1.1754944e-38, %v3375_v15  ;;  %vm3374_vm4 = vcmp.eq.f32.partialorder %v3373_v20, 8.507059e+37 }
0x1136   : > { %v3344_v54 = vadd.f32 %v3343_v45, %v3280_v13 }
0x1138   : > { %v5236_v7 = vpop.eup %5235  ;;  %v4741_v53 = vmul.f32 -1.442695, %v3344_v54 }
0x1139   : > { %v5238_v49 = vpop.eup %5237  ;;  %v3361_v9 = vadd.f32 1.0, %v5236_v7 }
0x113a   : > { %v3365_v61 = vmul.f32 %v5238_v49, %v3360_v22  ;;  %5239 = vpow2.f32 %v4741_v53  ;;  %vm3370_vm1 = vweird.f32 %v5238_v49 }
0x113b   : > { %5241 = vrcp.f32 %v3361_v9  ;;  %vm3371_vm3 = vmor %vm3369_vm2, %vm3370_vm1  ;;  %v3388_v54 = vand.u32 2147483647, %v3361_v9  ;;  %vm3384_vm6 = vweird.f32 %v3361_v9 }
0x113c   : > { %v3366_v26 = vsub.f32 1.0, %v3365_v61 }
0x113d   : > { %v3345_v6 = vpop.f32.mrf.mxu2  ;;  %vm3389_vm8 = vcmp.eq.f32.partialorder %v3388_v54, 8.507059e+37 }
0x113e   : > { %v3346_v60 = vadd.f32 %v3345_v6, %v3285_v11  ;;  %v3367_v50 = vmul.f32 %v5238_v49, %v3366_v26  ;;  %v3390_v11 = vand.u32 2147483648, %v3361_v9 }
0x1140   : > { %v5240_v24 = vpop.eup %5239  ;;  %v4742_v42 = vmul.f32 -1.442695, %v3346_v60  ;;  %v3368_v55 = vadd.f32 %v5238_v49, %v3367_v50  ;;  %v3391_v60 = vor.u32 1.1754944e-38, %v3390_v11 }
0x1141   : > { %v5242_v13 = vpop.eup %5241  ;;  %v3362_v14 = vadd.f32 1.0, %v5240_v24 }
0x1142   : > { %v3380_v59 = vmul.f32 %v5242_v13, %v3361_v9  ;;  %5243 = vpow2.f32 %v4742_v42  ;;  %v3372_v16 = vsel %vm3371_vm3, %v5238_v49, %v3368_v55  ;;  %vm3385_vm5 = vweird.f32 %v5242_v13  ;;  %v3255_v49 = vpop.permute.xlu0 %3254 }
0x1143   : > { %5245 = vrcp.f32 %v3362_v14  ;;  %v3377_v19 = vsel %vm3374_vm4, %v3376_v58, %v3372_v16  ;;  %vm3386_vm7 = vmor %vm3384_vm6, %vm3385_vm5  ;;  %v3331_v50 = vadd.f32 %v7051_v28, %v3255_v49  ;;  %v3405_v24 = vand.u32 2147483648, %v3362_v14 }
0x1144   : > { %v3381_v52 = vsub.f32 1.0, %v3380_v59  ;;  %v3424_v18 = vmul.f32 %v3377_v19, %v3329_v48  ;;  %v3403_v55 = vand.u32 2147483647, %v3362_v14  ;;  %vm3399_vm10 = vweird.f32 %v3362_v14 }
0x1145   : > { %v3334_v28 = vadd.f32 %v7053_v62, %v3260_v33 }
0x1146   : > { %v3382_v45 = vmul.f32 %v5242_v13, %v3381_v52  ;;  %v7058_v22 = vadd.f32 %v3424_v18, %v6869_v38  ;;  %vm3404_vm12 = vcmp.eq.f32.partialorder %v3403_v55, 8.507059e+37 }
0x1148   : > { %v5244_v7 = vpop.eup %5243  ;;  %v3383_v53 = vadd.f32 %v5242_v13, %v3382_v45 }
0x1149   : > { %v5246_v61 = vpop.eup %5245  ;;  %v3363_v26 = vadd.f32 1.0, %v5244_v7 }
0x114a   : > { %v3395_v21 = vmul.f32 %v5246_v61, %v3362_v14  ;;  %v3387_v6 = vsel %vm3386_vm7, %v5242_v13, %v3383_v53  ;;  %vm3400_vm9 = vweird.f32 %v5246_v61  ;;  %v3406_v13 = vor.u32 1.1754944e-38, %v3405_v24 }
0x114b   : > { %5247 = vrcp.f32 %v3363_v26  ;;  %v3392_v20 = vsel %vm3389_vm8, %v3391_v60, %v3387_v6  ;;  %vm3401_vm11 = vmor %vm3399_vm10, %vm3400_vm9  ;;  %v3420_v11 = vand.u32 2147483648, %v3363_v26  ;;  %v3418_v7 = vand.u32 2147483647, %v3363_v26 }
0x114c   : > { %v3396_v15 = vsub.f32 1.0, %v3395_v21  ;;  %v3425_v42 = vmul.f32 %v3392_v20, %v3331_v50  ;;  %vm3414_vm14 = vweird.f32 %v3363_v26  ;;  %v2792_v60 = vsub.f32 1.0, %v6912_v39 }
0x114d   : > { %v3421_v53 = vor.u32 1.1754944e-38, %v3420_v11  ;;  %vm3419_vm1 = vcmp.eq.f32.partialorder %v3418_v7, 8.507059e+37 }
0x114e   : > { %v3397_v38 = vmul.f32 %v5246_v61, %v3396_v15  ;;  %v7062_v9 = vadd.f32 %v3425_v42, %v6874_v31  ;;  %v3437_v56 = vpack.c.bf16 %v3425_v42, %v3424_v18  ;;  %v3265_v18 = vpop.permute.xlu1 %3264  ;;  %v2796_v50 = vadd.f32 1e-05, %v2792_v60  ;;  %v3452_v42 = vpop.permute.xlu2 %3451 }
0x114f   : > { %v3336_v62 = vadd.f32 %v7055_v40, %v3265_v18  ;;  %v4908_v40 = vld [vmem:[%s7277_s5 + $0x38] sm:$0xff] }
0x1150   : > { %v3398_v59 = vadd.f32 %v5246_v61, %v3397_v38  ;;  %v2800_v55 = vmul.f32 %v2796_v50, %v6901_v37 }
0x1151   : > { %v5248_v16 = vpop.eup %5247 }
0x1152   : > { %v3410_v58 = vmul.f32 %v5248_v16, %v3363_v26  ;;  %v3402_v48 = vsel %vm3401_vm11, %v5246_v61, %v3398_v59  ;;  %vm3415_vm13 = vweird.f32 %v5248_v16 }
0x1153   : > { %v3407_v52 = vsel %vm3404_vm12, %v3406_v13, %v3402_v48  ;;  %vm3416_vm15 = vmor %vm3414_vm14, %vm3415_vm13  ;;  %v2794_v48 = vsub.f32 1.0, %v6910_v5 }
0x1154   : > { %v3411_v19 = vsub.f32 1.0, %v3410_v58  ;;  %v3426_v45 = vmul.f32 %v3407_v52, %v3334_v28  ;;  %v3457_v52 = vpop.permute.xlu0 %3456 }
0x1155   : > { %v2798_v39 = vadd.f32 1e-05, %v2794_v48 }
0x1156   : > { %v3412_v54 = vmul.f32 %v5248_v16, %v3411_v19  ;;  %v7066_v31 = vadd.f32 %v3426_v45, %v6879_v46  ;;  %v4907_v46 = vld [vmem:[%s7277_s5 + $0x30] sm:$0xff]  ;;  %v3447_v20 = vpop.permute.xlu1 %3446 }
0x1157   : > { %v2802_v11 = vmul.f32 %v2798_v39, %v6905_v3 }
0x1158   : > { %v3413_v14 = vadd.f32 %v5248_v16, %v3412_v54 }
0x115a   : > { %v3417_v33 = vsel %vm3416_vm15, %v5248_v16, %v3413_v14 }
0x115b   : > { %v3422_v61 = vsel %vm3419_vm1, %v3421_v53, %v3417_v33 }
0x115c   : > { %v3427_v49 = vmul.f32 %v3422_v61, %v3336_v62 }
0x115e   : > { %v7070_v21 = vadd.f32 %v3427_v49, %v6884_v35  ;;  %v3438_v6 = vpack.c.bf16 %v3427_v49, %v3426_v45  ;;  %v2793_v35 = vsub.f32 1.0, %v6914_v30  ;;  %v3462_v19 = vpop.permute.xlu1 %3461 }
0x1160   : > { %3486 = vmatpush.bf16.msra.mxu3 %v3438_v6  ;;  %v2797_v15 = vadd.f32 1e-05, %v2793_v35 }
0x1164   : > { %3487 = vmatpush.bf16.msra.mxu3 %v3437_v56  ;;  %v2801_v56 = vmul.f32 %v2797_v15, %v6898_v63 }
0x1167   : > { %4759 = vmatmul.msk.bf16.vlgmr.msra.gmra.mxu3 %vm463_vm0, %v4907_v46 }
0x1177   : > { %4760 = vmatmul.msk.bf16.gmra.mxu3 %vm463_vm0, %v4908_v40 }
0x11ea   : > { %v3489_v26 = vpop.f32.mrf.mxu3 }
0x11eb   : > { %v3490_v24 = vadd.f32 %v3489_v26, %v3447_v20 }
0x11ed   : > { %v3499_v16 = vmul.f32 %v3490_v24, %v2800_v55 }
0x11f2   : > { %v3491_v38 = vpop.f32.mrf.mxu3 }
0x11f3   : > { %v3492_v59 = vadd.f32 %v3491_v38, %v3452_v42 }
0x11f5   : > { %v3500_v13 = vmul.f32 %v3492_v59, %v2801_v56 }
0x11f7   : > { %v3503_v28 = vmax.f32 %v3499_v16, %v3500_v13 }
0x11fa   : > { %v3494_v58 = vpop.f32.mrf.mxu3 }
0x11fb   : > { %v3495_v30 = vadd.f32 %v3494_v58, %v3457_v52 }
0x11fd   : > { %v3501_v7 = vmul.f32 %v3495_v30, %v2802_v11 }
0x1202   : > { %v3496_v45 = vpop.f32.mrf.mxu3 }
0x1203   : > { %v3497_v54 = vadd.f32 %v3496_v45, %v3462_v19 }
0x1205   : > { %v3502_v37 = vmul.f32 %v3497_v54, %v6924_v17 }
0x1207   : > { %v3504_v14 = vmax.f32 %v3501_v7, %v3502_v37 }
0x1209   : > { %v3505_v63 = vmax.f32 %v3503_v28, %v3504_v14  ;;  %v5347_v14 = vld [vmem:[%s7275_s3] sm:$0xff] }
0x120b   : > { %v3506_v18 = vrot.slane %v3505_v63, 4 }
0x120d   : > { %v3507_v53 = vmax.f32 %v3505_v63, %v3506_v18 }
0x120f   : > { %v3508_v62 = vrot.slane %v3507_v53, 2 }
0x1211   : > { %v3509_v33 = vmax.f32 %v3507_v53, %v3508_v62 }
0x1213   : > { %v3510_v61 = vrot.slane %v3509_v33, 1 }
0x1215   : > { %v3511_v49 = vmax.f32 %v3509_v33, %v3510_v61 }
0x1217   : > { %v3512_v5 = vsub.f32 %v3499_v16, %v3511_v49  ;;  %v3513_v6 = vsub.f32 %v3500_v13, %v3511_v49  ;;  %v3514_v46 = vsub.f32 %v3501_v7, %v3511_v49  ;;  %v3515_v40 = vsub.f32 %v3502_v37, %v3511_v49 }
0x1219   : > { %v3516_v26 = vmul.f32 1.442695, %v3512_v5  ;;  %v3518_v60 = vmul.f32 1.442695, %v3513_v6  ;;  %v3520_v35 = vmul.f32 1.442695, %v3514_v46 }
0x121a   : > { %v3522_v3 = vmul.f32 1.442695, %v3515_v40 }
0x121b   : > { %5249 = vpow2.f32 %v3516_v26 }
0x121c   : > { %5251 = vpow2.f32 %v3518_v60 }
0x121d   : > { %5253 = vpow2.f32 %v3520_v35 }
0x121e   : > { %5255 = vpow2.f32 %v3522_v3 }
0x1221   : > { %v5250_v17 = vpop.eup %5249 }
0x1222   : > { %v5252_v50 = vpop.eup %5251 }
0x1223   : > { %v3524_v15 = vadd.f32 %v5252_v50, %v5250_v17  ;;  %v5254_v20 = vpop.eup %5253 }
0x1224   : > { %v5256_v42 = vpop.eup %5255 }
0x1225   : > { %v3525_v24 = vadd.f32 %v5254_v20, %v3524_v15 }
0x1227   : > { %v3526_v38 = vadd.f32 %v5256_v42, %v3525_v24 }
0x1229   : > { %v3527_v55 = vrot.slane %v3526_v38, 4 }
0x122b   : > { %v3528_v56 = vadd.f32 %v3527_v55, %v3526_v38 }
0x122d   : > { %v3529_v59 = vrot.slane %v3528_v56, 2 }
0x122f   : > { %v3530_v16 = vadd.f32 %v3529_v59, %v3528_v56 }
0x1231   : > { %v3531_v13 = vrot.slane %v3530_v16, 1 }
0x1233   : > { %v3532_v28 = vadd.f32 %v3531_v13, %v3530_v16 }
0x1235   : > { %5257 = vrcp.f32 %v3532_v28 }
0x123b   : > { %v5258_v58 = vpop.eup %5257 }
0x123c   : > { %v3536_v48 = vmul.f32 %v5258_v58, %v5254_v20  ;;  %v3537_v39 = vmul.f32 %v5258_v58, %v5256_v42  ;;  %v3534_v52 = vmul.f32 %v5258_v58, %v5250_v17  ;;  %v3535_v30 = vmul.f32 %v5258_v58, %v5252_v50 }
0x123e   : > { %v3540_v19 = vmul.f32 %v3536_v48, %v5672_v0  ;;  %v3541_v45 = vmul.f32 %v3537_v39, %v5674_v1  ;;  %v3538_v11 = vmul.f32 %v3534_v52, %v5686_v12  ;;  %v3539_v54 = vmul.f32 %v3535_v30, %v5684_v10  ;;  %v5348_v0 = vld [vmem:[%s7275_s3 + $0x8] sm:$0xff]  ;;  %v5349_v1 = vld [vmem:[%s7275_s3 + $0x10] sm:$0xff]  ;;  %v5350_v10 = vld [vmem:[%s7275_s3 + $0x18] sm:$0xff] }
0x1240   : > { %v3543_v7 = vpack.c.bf16 %v3541_v45, %v3540_v19  ;;  %v3542_v37 = vpack.c.bf16 %v3539_v54, %v3538_v11 }
0x1242   : > { %3550 = vmatpush.bf16.msrb.mxu0 %v3543_v7 }
0x1246   : > { %3551 = vmatpush.bf16.msrb.mxu0 %v3542_v37 }
0x1249   : > { %4761 = vmatmul.msk.bf16.vlgmr.msrb.gmra.mxu0 %vm463_vm0, %v5347_v14 }
0x1259   : > { %4762 = vmatmul.msk.bf16.gmra.mxu0 %vm463_vm0, %v5348_v0 }
0x1269   : > { %4763 = vmatmul.msk.bf16.gmra.mxu0 %vm463_vm0, %v5349_v1 }
0x1279   : > { %4764 = vmatmul.msk.bf16.gmra.mxu0 %vm463_vm0, %v5350_v10 }
0x12c6   : > { %v3553_v12 = vpop.f32.mrf.mxu0 }
0x12c7   : > { %v3554_v1 = vadd.f32 %v3553_v12, %v5998_v51 }
0x12ce   : > { %v3555_v63 = vpop.f32.mrf.mxu0 }
0x12cf   : > { %v3556_v10 = vadd.f32 %v3555_v63, %v5994_v44 }
0x12d6   : > { %v7107_v18 = vpop.f32.mrf.mxu0 }
0x12de   : > { %v7109_v53 = vpop.f32.mrf.mxu0 }
0x12e6   : > { %v3563_v62 = vpop.f32.mrf.mxu0 }
0x12e7   : > { %v3564_v33 = vadd.f32 %v3563_v62, %v5905_v27 }
0x12e9   : > { %v4765_v61 = vmul.f32 -1.442695, %v3564_v33 }
0x12eb   : > { %5259 = vpow2.f32 %v4765_v61 }
0x12ee   : > { %v3565_v49 = vpop.f32.mrf.mxu0 }
0x12ef   : > { %v3566_v5 = vadd.f32 %v3565_v49, %v5917_v32 }
0x12f1   : > { %v5260_v6 = vpop.eup %5259  ;;  %v4766_v46 = vmul.f32 -1.442695, %v3566_v5 }
0x12f2   : > { %v3585_v40 = vadd.f32 1.0, %v5260_v6 }
0x12f3   : > { %5261 = vpow2.f32 %v4766_v46 }
0x12f4   : > { %5263 = vrcp.f32 %v3585_v40  ;;  %v3600_v13 = vand.u32 2147483648, %v3585_v40  ;;  %vm3594_vm3 = vweird.f32 %v3585_v40  ;;  %v3598_v28 = vand.u32 2147483647, %v3585_v40 }
0x12f6   : > { %v3568_v26 = vpop.f32.mrf.mxu0  ;;  %v3601_v19 = vor.u32 1.1754944e-38, %v3600_v13  ;;  %vm3599_vm7 = vcmp.eq.f32.partialorder %v3598_v28, 8.507059e+37 }
0x12f7   : > { %v3569_v60 = vadd.f32 %v3568_v26, %v5897_v23 }
0x12f9   : > { %v5262_v35 = vpop.eup %5261  ;;  %v4767_v3 = vmul.f32 -1.442695, %v3569_v60 }
0x12fa   : > { %v5264_v17 = vpop.eup %5263  ;;  %v3586_v50 = vadd.f32 1.0, %v5262_v35 }
0x12fb   : > { %v3590_v15 = vmul.f32 %v5264_v17, %v3585_v40  ;;  %5265 = vpow2.f32 %v4767_v3  ;;  %vm3595_vm2 = vweird.f32 %v5264_v17 }
0x12fc   : > { %5267 = vrcp.f32 %v3586_v50  ;;  %vm7115_vm4 = vmor %vm3594_vm3, %vm3595_vm2  ;;  %v3613_v52 = vand.u32 2147483647, %v3586_v50  ;;  %vm3609_vm6 = vweird.f32 %v3586_v50 }
0x12fd   : > { %v3591_v27 = vsub.f32 1.0, %v3590_v15 }
0x12fe   : > { %v3570_v20 = vpop.f32.mrf.mxu0  ;;  %vm3614_vm9 = vcmp.eq.f32.partialorder %v3613_v52, 8.507059e+37 }
0x12ff   : > { %v3571_v24 = vadd.f32 %v3570_v20, %v5934_v47  ;;  %v3592_v32 = vmul.f32 %v5264_v17, %v3591_v27  ;;  %v3615_v47 = vand.u32 2147483648, %v3586_v50  ;;  %v3559_v20 = vadd.f32 %v7107_v18, %v7355_v29  ;;  %v5352_v29 = vld [vmem:[%s7275_s3 + $0x28] sm:$0xff]  ;;  %v5354_v18 = vld [vmem:[%s7275_s3 + $0x38] sm:$0xff] }
0x1301   : > { %v5266_v42 = vpop.eup %5265  ;;  %v4768_v38 = vmul.f32 -1.442695, %v3571_v24  ;;  %v3593_v23 = vadd.f32 %v5264_v17, %v3592_v32  ;;  %v3616_v0 = vor.u32 1.1754944e-38, %v3615_v47  ;;  %v3561_v24 = vadd.f32 %v7109_v53, %v5977_v34  ;;  %v5353_v34 = vld [vmem:[%s7275_s3 + $0x30] sm:$0xff] }
0x1302   : > { %v5268_v55 = vpop.eup %5267  ;;  %v3587_v56 = vadd.f32 1.0, %v5266_v42 }
0x1303   : > { %v3605_v59 = vmul.f32 %v5268_v55, %v3586_v50  ;;  %5269 = vpow2.f32 %v4768_v38  ;;  %vm3610_vm5 = vweird.f32 %v5268_v55  ;;  %v3597_v39 = vsel %vm7115_vm4, %v5264_v17, %v3593_v23 }
0x1304   : > { %5271 = vrcp.f32 %v3587_v56  ;;  %vm3611_vm8 = vmor %vm3609_vm6, %vm3610_vm5  ;;  %v3602_v37 = vsel %vm3599_vm7, %v3601_v19, %v3597_v39  ;;  %v3630_v60 = vand.u32 2147483648, %v3587_v56  ;;  %vm3624_vm11 = vweird.f32 %v3587_v56 }
0x1305   : > { %v3606_v16 = vsub.f32 1.0, %v3605_v59  ;;  %v3649_v61 = vmul.f32 %v3602_v37, %v3554_v1  ;;  %v3628_v3 = vand.u32 2147483647, %v3587_v56  ;;  %v5351_v59 = vld [vmem:[%s7275_s3 + $0x20] sm:$0xff] }
0x1306   : > { %v3631_v17 = vor.u32 1.1754944e-38, %v3630_v60 }
0x1307   : > { %v3607_v48 = vmul.f32 %v5268_v55, %v3606_v16  ;;  %vm3629_vm15 = vcmp.eq.f32.partialorder %v3628_v3, 8.507059e+37 }
0x1309   : > { %v5270_v30 = vpop.eup %5269  ;;  %v3608_v45 = vadd.f32 %v5268_v55, %v3607_v48 }
0x130a   : > { %v5272_v11 = vpop.eup %5271  ;;  %v3588_v54 = vadd.f32 1.0, %v5270_v30 }
0x130b   : > { %v3620_v7 = vmul.f32 %v5272_v11, %v3587_v56  ;;  %v3612_v14 = vsel %vm3611_vm8, %v5268_v55, %v3608_v45  ;;  %vm3625_vm10 = vweird.f32 %v5272_v11 }
0x130c   : > { %5273 = vrcp.f32 %v3588_v54  ;;  %v3617_v33 = vsel %vm3614_vm9, %v3616_v0, %v3612_v14  ;;  %vm3626_vm12 = vmor %vm3624_vm11, %vm3625_vm10  ;;  %v3645_v51 = vand.u32 2147483648, %v3588_v54  ;;  %v3643_v63 = vand.u32 2147483647, %v3588_v54 }
0x130d   : > { %v3621_v62 = vsub.f32 1.0, %v3620_v7  ;;  %v3650_v49 = vmul.f32 %v3617_v33, %v3556_v10  ;;  %vm3639_vm14 = vweird.f32 %v3588_v54 }
0x130e   : > { %v3646_v27 = vor.u32 1.1754944e-38, %v3645_v51  ;;  %vm3644_vm2 = vcmp.eq.f32.partialorder %v3643_v63, 8.507059e+37 }
0x130f   : > { %v3622_v5 = vmul.f32 %v5272_v11, %v3621_v62  ;;  %v3653_v6 = vpack.c.bf16 %v3650_v49, %v3649_v61 }
0x1311   : > { %v3623_v26 = vadd.f32 %v5272_v11, %v3622_v5 }
0x1312   : > { %v5274_v46 = vpop.eup %5273 }
0x1313   : > { %v3635_v40 = vmul.f32 %v5274_v46, %v3588_v54  ;;  %v3627_v44 = vsel %vm3626_vm12, %v5272_v11, %v3623_v26  ;;  %vm3640_vm13 = vweird.f32 %v5274_v46 }
0x1314   : > { %v3632_v15 = vsel %vm3629_vm15, %v3631_v17, %v3627_v44  ;;  %vm3641_vm1 = vmor %vm3639_vm14, %vm3640_vm13 }
0x1315   : > { %v3636_v35 = vsub.f32 1.0, %v3635_v40  ;;  %v3651_v38 = vmul.f32 %v3632_v15, %v3559_v20 }
0x1317   : > { %v3637_v12 = vmul.f32 %v5274_v46, %v3636_v35 }
0x1319   : > { %v3638_v50 = vadd.f32 %v5274_v46, %v3637_v12 }
0x131b   : > { %v3642_v32 = vsel %vm3641_vm1, %v5274_v46, %v3638_v50 }
0x131c   : > { %v3647_v42 = vsel %vm3644_vm2, %v3646_v27, %v3642_v32 }
0x131d   : > { %v3652_v55 = vmul.f32 %v3647_v42, %v3561_v24 }
0x131f   : > { %v3654_v56 = vpack.c.bf16 %v3652_v55, %v3651_v38 }
0x1321   : > { %3661 = vmatpush.bf16.msrb.mxu1 %v3654_v56 }
0x1325   : > { %3662 = vmatpush.bf16.msrb.mxu1 %v3653_v6 }
0x1328   : > { %4769 = vmatmul.msk.bf16.vlgmr.msrb.gmra.mxu1 %vm463_vm0, %v5351_v59 }
0x1338   : > { %4770 = vmatmul.msk.bf16.gmra.mxu1 %vm463_vm0, %v5352_v29 }
0x1348   : > { %4771 = vmatmul.msk.bf16.gmra.mxu1 %vm463_vm0, %v5353_v34 }
0x1358   : > { %4772 = vmatmul.msk.bf16.gmra.mxu1 %vm463_vm0, %v5354_v18 }
0x13a5   : > { %v3664_v53 = vpop.f32.mrf.mxu1 }
0x13a6   : > { %v3665_v24 = vadd.f32 %v3664_v53, %v6100_v41 }
0x13ad   : > { %v3666_v23 = vpop.f32.mrf.mxu1 }
0x13ae   : > { %v3667_v32 = vadd.f32 %v3666_v23, %v6096_v36 }
0x13b5   : > { %v7143_v16 = vpop.f32.mrf.mxu1 }
0x13bd   : > { %v7145_v13 = vpop.f32.mrf.mxu1 }
0x13c5   : > { %v3674_v28 = vpop.f32.mrf.mxu1 }
0x13c6   : > { %v3675_v58 = vadd.f32 %v3674_v28, %v6026_v4 }
0x13c8   : > { %v4773_v48 = vmul.f32 -1.442695, %v3675_v58 }
0x13ca   : > { %5275 = vpow2.f32 %v4773_v48 }
0x13cd   : > { %v3676_v47 = vpop.f32.mrf.mxu1 }
0x13ce   : > { %v3677_v39 = vadd.f32 %v3676_v47, %v6029_v8 }
0x13d0   : > { %v5276_v52 = vpop.eup %5275  ;;  %v4774_v30 = vmul.f32 -1.442695, %v3677_v39 }
0x13d1   : > { %v3696_v19 = vadd.f32 1.0, %v5276_v52 }
0x13d2   : > { %5277 = vpow2.f32 %v4774_v30 }
0x13d3   : > { %5279 = vrcp.f32 %v3696_v19  ;;  %v3711_v46 = vand.u32 2147483648, %v3696_v19  ;;  %vm3705_vm4 = vweird.f32 %v3696_v19  ;;  %v3709_v40 = vand.u32 2147483647, %v3696_v19 }
0x13d5   : > { %v3679_v45 = vpop.f32.mrf.mxu1  ;;  %v3712_v12 = vor.u32 1.1754944e-38, %v3711_v46  ;;  %vm3710_vm8 = vcmp.eq.f32.partialorder %v3709_v40, 8.507059e+37 }
0x13d6   : > { %v3680_v11 = vadd.f32 %v3679_v45, %v6024_v2  ;;  %v3670_v45 = vadd.f32 %v7143_v16, %v7358_v57  ;;  %v4910_v57 = vld [vmem:[%s7275_s3 + $0x148] sm:$0xff]  ;;  %v4912_v16 = vld [vmem:[%s7275_s3 + $0x158] sm:$0xff] }
0x13d8   : > { %v5278_v54 = vpop.eup %5277  ;;  %v4775_v7 = vmul.f32 -1.442695, %v3680_v11  ;;  %v3672_v11 = vadd.f32 %v7145_v13, %v7359_v43  ;;  %v4911_v43 = vld [vmem:[%s7275_s3 + $0x150] sm:$0xff] }
0x13d9   : > { %v5280_v37 = vpop.eup %5279  ;;  %v3697_v14 = vadd.f32 1.0, %v5278_v54 }
0x13da   : > { %v3701_v0 = vmul.f32 %v5280_v37, %v3696_v19  ;;  %5281 = vpow2.f32 %v4775_v7  ;;  %vm3706_vm3 = vweird.f32 %v5280_v37 }
0x13db   : > { %5283 = vrcp.f32 %v3697_v14  ;;  %vm7151_vm5 = vmor %vm3705_vm4, %vm3706_vm3  ;;  %v3724_v3 = vand.u32 2147483647, %v3697_v14  ;;  %vm3720_vm7 = vweird.f32 %v3697_v14 }
0x13dc   : > { %v3702_v4 = vsub.f32 1.0, %v3701_v0 }
0x13dd   : > { %v3681_v1 = vpop.f32.mrf.mxu1  ;;  %vm3725_vm10 = vcmp.eq.f32.partialorder %v3724_v3, 8.507059e+37 }
0x13de   : > { %v3682_v10 = vadd.f32 %v3681_v1, %v6037_v25  ;;  %v3703_v8 = vmul.f32 %v5280_v37, %v3702_v4  ;;  %v3726_v25 = vand.u32 2147483648, %v3697_v14  ;;  %v4909_v4 = vld [vmem:[%s7275_s3 + $0x140] sm:$0xff] }
0x13e0   : > { %v5282_v62 = vpop.eup %5281  ;;  %v4776_v33 = vmul.f32 -1.442695, %v3682_v10  ;;  %v3704_v2 = vadd.f32 %v5280_v37, %v3703_v8  ;;  %v3727_v20 = vor.u32 1.1754944e-38, %v3726_v25 }
0x13e1   : > { %v5284_v61 = vpop.eup %5283  ;;  %v3698_v49 = vadd.f32 1.0, %v5282_v62  ;;  %v3817_v62 = vpop.permute.xlu2 %3816 }
0x13e2   : > { %v3716_v5 = vmul.f32 %v5284_v61, %v3697_v14  ;;  %5285 = vpow2.f32 %v4776_v33  ;;  %vm3721_vm6 = vweird.f32 %v5284_v61  ;;  %v3708_v35 = vsel %vm7151_vm5, %v5280_v37, %v3704_v2  ;;  %v3807_v33 = vpop.permute.xlu1 %3806 }
0x13e3   : > { %5287 = vrcp.f32 %v3698_v49  ;;  %vm3722_vm9 = vmor %vm3720_vm7, %vm3721_vm6  ;;  %v3713_v15 = vsel %vm3710_vm8, %v3712_v12, %v3708_v35  ;;  %v3741_v58 = vand.u32 2147483648, %v3698_v49  ;;  %vm3735_vm12 = vweird.f32 %v3698_v49  ;;  %v3822_v35 = vpop.permute.xlu0 %3821 }
0x13e4   : > { %v3717_v6 = vsub.f32 1.0, %v3716_v5  ;;  %v3760_v55 = vmul.f32 %v3713_v15, %v3665_v24  ;;  %v3739_v47 = vand.u32 2147483647, %v3698_v49 }
0x13e5   : > { %v3742_v39 = vor.u32 1.1754944e-38, %v3741_v58 }
0x13e6   : > { %v3718_v60 = vmul.f32 %v5284_v61, %v3717_v6  ;;  %vm3740_vm1 = vcmp.eq.f32.partialorder %v3739_v47, 8.507059e+37 }
0x13e8   : > { %v5286_v51 = vpop.eup %5285  ;;  %v3719_v44 = vadd.f32 %v5284_v61, %v3718_v60 }
0x13e9   : > { %v5288_v63 = vpop.eup %5287  ;;  %v3699_v17 = vadd.f32 1.0, %v5286_v51  ;;  %v3812_v2 = vpop.permute.xlu2 %3811 }
0x13ea   : > { %v3731_v50 = vmul.f32 %v5288_v63, %v3698_v49  ;;  %v3723_v27 = vsel %vm3722_vm9, %v5284_v61, %v3719_v44  ;;  %vm3736_vm11 = vweird.f32 %v5288_v63 }
0x13eb   : > { %5289 = vrcp.f32 %v3699_v17  ;;  %v3728_v38 = vsel %vm3725_vm10, %v3727_v20, %v3723_v27  ;;  %vm3737_vm13 = vmor %vm3735_vm12, %vm3736_vm11  ;;  %v3756_v41 = vand.u32 2147483648, %v3699_v17  ;;  %v3754_v23 = vand.u32 2147483647, %v3699_v17 }
0x13ec   : > { %v3732_v42 = vsub.f32 1.0, %v3731_v50  ;;  %v3761_v56 = vmul.f32 %v3728_v38, %v3667_v32  ;;  %vm3750_vm15 = vweird.f32 %v3699_v17  ;;  %v7187_v32 = vpop.permute.xlu0 %3796 }
0x13ed   : > { %v3757_v19 = vor.u32 1.1754944e-38, %v3756_v41  ;;  %vm3755_vm3 = vcmp.eq.f32.partialorder %v3754_v23, 8.507059e+37 }
0x13ee   : > { %v3733_v59 = vmul.f32 %v5288_v63, %v3732_v42  ;;  %v3773_v29 = vpack.c.bf16 %v3761_v56, %v3760_v55 }
0x13f0   : > { %v3734_v28 = vadd.f32 %v5288_v63, %v3733_v59 }
0x13f1   : > { %v5290_v34 = vpop.eup %5289 }
0x13f2   : > { %v3746_v18 = vmul.f32 %v5290_v34, %v3699_v17  ;;  %v3738_v36 = vsel %vm3737_vm13, %v5288_v63, %v3734_v28  ;;  %vm3751_vm14 = vweird.f32 %v5290_v34 }
0x13f3   : > { %v3743_v30 = vsel %vm3740_vm1, %v3742_v39, %v3738_v36  ;;  %vm3752_vm2 = vmor %vm3750_vm15, %vm3751_vm14 }
0x13f4   : > { %v3747_v48 = vsub.f32 1.0, %v3746_v18  ;;  %v3762_v37 = vmul.f32 %v3743_v30, %v3670_v45  ;;  %v3787_v30 = vpop.permute.xlu2 %3786 }
0x13f6   : > { %v3748_v53 = vmul.f32 %v5290_v34, %v3747_v48 }
0x13f8   : > { %v3749_v52 = vadd.f32 %v5290_v34, %v3748_v53 }
0x13fa   : > { %v3753_v54 = vsel %vm3752_vm2, %v5290_v34, %v3749_v52 }
0x13fb   : > { %v3758_v7 = vsel %vm3755_vm3, %v3757_v19, %v3753_v54  ;;  %v3792_v19 = vpop.permute.xlu0 %3791 }
0x13fc   : > { %v3763_v14 = vmul.f32 %v3758_v7, %v3672_v11 }
0x13fe   : > { %v3774_v0 = vpack.c.bf16 %v3763_v14, %v3762_v37 }
0x1400   : > { %3862 = vmatpush.bf16.msrb.mxu2 %v3774_v0 }
0x1404   : > { %3863 = vmatpush.bf16.msrb.mxu2 %v3773_v29 }
0x1407   : > { %4809 = vmatmul.msk.bf16.vlgmr.msrb.gmra.mxu2 %vm463_vm0, %v4909_v4 }
0x1417   : > { %4810 = vmatmul.msk.bf16.gmra.mxu2 %vm463_vm0, %v4910_v57 }
0x1427   : > { %4811 = vmatmul.msk.bf16.gmra.mxu2 %vm463_vm0, %v4911_v43 }
0x1437   : > { %4812 = vmatmul.msk.bf16.gmra.mxu2 %vm463_vm0, %v4912_v16 }
0x148a   : > { %v7179_v13 = vpop.f32.mrf.mxu2 }
0x148b   : > { %v3866_v37 = vadd.f32 %v7179_v13, %v3787_v30 }
0x1492   : > { %v7181_v1 = vpop.f32.mrf.mxu2 }
0x1493   : > { %v3868_v14 = vadd.f32 %v7181_v1, %v3792_v19 }
0x149a   : > { %v7183_v10 = vpop.f32.mrf.mxu2 }
0x14a2   : > { %v7185_v8 = vpop.f32.mrf.mxu2 }
0x14aa   : > { %v3875_v61 = vpop.f32.mrf.mxu2 }
0x14ab   : > { %v3876_v49 = vadd.f32 %v3875_v61, %v3807_v33 }
0x14ad   : > { %v4813_v5 = vmul.f32 -1.442695, %v3876_v49 }
0x14af   : > { %5291 = vpow2.f32 %v4813_v5 }
0x14b2   : > { %v3877_v6 = vpop.f32.mrf.mxu2 }
0x14b3   : > { %v3878_v46 = vadd.f32 %v3877_v6, %v3812_v2 }
0x14b5   : > { %v5292_v40 = vpop.eup %5291  ;;  %v4814_v26 = vmul.f32 -1.442695, %v3878_v46 }
0x14b6   : > { %v3897_v60 = vadd.f32 1.0, %v5292_v40 }
0x14b7   : > { %5293 = vpow2.f32 %v4814_v26 }
0x14b8   : > { %5295 = vrcp.f32 %v3897_v60  ;;  %v3912_v34 = vand.u32 2147483648, %v3897_v60  ;;  %vm3906_vm5 = vweird.f32 %v3897_v60  ;;  %v3910_v18 = vand.u32 2147483647, %v3897_v60 }
0x14ba   : > { %v3880_v25 = vpop.f32.mrf.mxu2  ;;  %v3913_v36 = vor.u32 1.1754944e-38, %v3912_v34  ;;  %vm3911_vm9 = vcmp.eq.f32.partialorder %v3910_v18, 8.507059e+37  ;;  %v4013_v34 = vpop.permute.xlu2 %4012 }
0x14bb   : > { %v3881_v3 = vadd.f32 %v3880_v25, %v3817_v62  ;;  %v3802_v25 = vpop.permute.xlu1 %3801 }
0x14bd   : > { %v5294_v51 = vpop.eup %5293  ;;  %v4815_v12 = vmul.f32 -1.442695, %v3881_v3 }
0x14be   : > { %v5296_v44 = vpop.eup %5295  ;;  %v3898_v63 = vadd.f32 1.0, %v5294_v51  ;;  %v3871_v51 = vadd.f32 %v7183_v10, %v7187_v32  ;;  %v4914_v10 = vld [vmem:[%s7275_s3 + $0x168] sm:$0xff] }
0x14bf   : > { %v3902_v17 = vmul.f32 %v5296_v44, %v3897_v60  ;;  %5297 = vpow2.f32 %v4815_v12  ;;  %vm3907_vm4 = vweird.f32 %v5296_v44  ;;  %v3873_v12 = vadd.f32 %v7185_v8, %v3802_v25  ;;  %v4915_v8 = vld [vmem:[%s7275_s3 + $0x170] sm:$0xff] }
0x14c0   : > { %5299 = vrcp.f32 %v3898_v63  ;;  %vm7189_vm6 = vmor %vm3906_vm5, %vm3907_vm4  ;;  %v3927_v48 = vand.u32 2147483648, %v3898_v63  ;;  %v3925_v41 = vand.u32 2147483647, %v3898_v63  ;;  %vm3921_vm8 = vweird.f32 %v3898_v63 }
0x14c1   : > { %v3903_v50 = vsub.f32 1.0, %v3902_v17 }
0x14c2   : > { %v3882_v15 = vpop.f32.mrf.mxu2  ;;  %v3928_v7 = vor.u32 1.1754944e-38, %v3927_v48  ;;  %vm3926_vm11 = vcmp.eq.f32.partialorder %v3925_v41, 8.507059e+37  ;;  %v4018_v41 = vpop.permute.xlu0 %4017 }
0x14c3   : > { %v3883_v27 = vadd.f32 %v3882_v15, %v3822_v35  ;;  %v3904_v20 = vmul.f32 %v5296_v44, %v3903_v50 }
0x14c5   : > { %v5298_v24 = vpop.eup %5297  ;;  %v4816_v42 = vmul.f32 -1.442695, %v3883_v27  ;;  %v3905_v59 = vadd.f32 %v5296_v44, %v3904_v20  ;;  %v4913_v27 = vld [vmem:[%s7275_s3 + $0x160] sm:$0xff]  ;;  %v4916_v20 = vld [vmem:[%s7275_s3 + $0x178] sm:$0xff] }
0x14c6   : > { %v5300_v38 = vpop.eup %5299  ;;  %v3899_v55 = vadd.f32 1.0, %v5298_v24 }
0x14c7   : > { %v3917_v56 = vmul.f32 %v5300_v38, %v3898_v63  ;;  %5301 = vpow2.f32 %v4816_v42  ;;  %vm3922_vm7 = vweird.f32 %v5300_v38  ;;  %v3909_v47 = vsel %vm7189_vm6, %v5296_v44, %v3905_v59 }
0x14c8   : > { %5303 = vrcp.f32 %v3899_v55  ;;  %vm3923_vm10 = vmor %vm3921_vm8, %vm3922_vm7  ;;  %v3914_v11 = vsel %vm3911_vm9, %v3913_v36, %v3909_v47  ;;  %v3942_v5 = vand.u32 2147483648, %v3899_v55  ;;  %vm3936_vm13 = vweird.f32 %v3899_v55 }
0x14c9   : > { %v3918_v29 = vsub.f32 1.0, %v3917_v56  ;;  %v3961_v57 = vmul.f32 %v3914_v11, %v3866_v37  ;;  %v3940_v6 = vand.u32 2147483647, %v3899_v55 }
0x14ca   : > { %v3943_v26 = vor.u32 1.1754944e-38, %v3942_v5 }
0x14cb   : > { %v3919_v58 = vmul.f32 %v5300_v38, %v3918_v29  ;;  %vm3941_vm2 = vcmp.eq.f32.partialorder %v3940_v6, 8.507059e+37 }
0x14cd   : > { %v5302_v53 = vpop.eup %5301  ;;  %v3920_v23 = vadd.f32 %v5300_v38, %v3919_v58 }
0x14ce   : > { %v5304_v39 = vpop.eup %5303  ;;  %v3900_v52 = vadd.f32 1.0, %v5302_v53 }
0x14cf   : > { %v3932_v45 = vmul.f32 %v5304_v39, %v3899_v55  ;;  %v3924_v54 = vsel %vm3923_vm10, %v5300_v38, %v3920_v23  ;;  %vm3937_vm12 = vweird.f32 %v5304_v39  ;;  %v4008_v55 = vpop.permute.xlu1 %4007 }
0x14d0   : > { %5305 = vrcp.f32 %v3900_v52  ;;  %v3929_v4 = vsel %vm3926_vm11, %v3928_v7, %v3924_v54  ;;  %vm3938_vm14 = vmor %vm3936_vm13, %vm3937_vm12  ;;  %v3957_v13 = vand.u32 2147483648, %v3900_v52  ;;  %v3955_v40 = vand.u32 2147483647, %v3900_v52 }
0x14d1   : > { %v3933_v0 = vsub.f32 1.0, %v3932_v45  ;;  %v3962_v43 = vmul.f32 %v3929_v4, %v3868_v14  ;;  %vm3951_vm1 = vweird.f32 %v3900_v52 }
0x14d2   : > { %v3958_v3 = vor.u32 1.1754944e-38, %v3957_v13  ;;  %vm3956_vm4 = vcmp.eq.f32.partialorder %v3955_v40, 8.507059e+37 }
0x14d3   : > { %v3934_v16 = vmul.f32 %v5304_v39, %v3933_v0  ;;  %v3974_v62 = vpack.c.bf16 %v3962_v43, %v3961_v57  ;;  %v3988_v57 = vpop.permute.xlu2 %3987 }
0x14d5   : > { %v3935_v49 = vadd.f32 %v5304_v39, %v3934_v16 }
0x14d6   : > { %v5306_v33 = vpop.eup %5305 }
0x14d7   : > { %v3947_v61 = vmul.f32 %v5306_v33, %v3900_v52  ;;  %v3939_v1 = vsel %vm3938_vm14, %v5304_v39, %v3935_v49  ;;  %vm3952_vm15 = vweird.f32 %v5306_v33  ;;  %v4023_v11 = vpop.permute.xlu1 %4022 }
0x14d8   : > { %v3944_v35 = vsel %vm3941_vm2, %v3943_v26, %v3939_v1  ;;  %vm3953_vm3 = vmor %vm3951_vm1, %vm3952_vm15 }
0x14d9   : > { %v3948_v2 = vsub.f32 1.0, %v3947_v61  ;;  %v3963_v17 = vmul.f32 %v3944_v35, %v3871_v51  ;;  %v3993_v51 = vpop.permute.xlu0 %3992 }
0x14db   : > { %v3949_v46 = vmul.f32 %v5306_v33, %v3948_v2 }
0x14dd   : > { %v3950_v60 = vadd.f32 %v5306_v33, %v3949_v46 }
0x14df   : > { %v3954_v44 = vsel %vm3953_vm3, %v5306_v33, %v3950_v60 }
0x14e0   : > { %v3959_v63 = vsel %vm3956_vm4, %v3958_v3, %v3954_v44 }
0x14e1   : > { %v3964_v50 = vmul.f32 %v3959_v63, %v3873_v12 }
0x14e3   : > { %v3975_v15 = vpack.c.bf16 %v3964_v50, %v3963_v17 }
0x14e5   : > { %4063 = vmatpush.bf16.msrb.mxu3 %v3975_v15 }
0x14e9   : > { %4064 = vmatpush.bf16.msrb.mxu3 %v3974_v62 }
0x14ec   : > { %4849 = vmatmul.msk.bf16.vlgmr.msrb.gmra.mxu3 %vm463_vm0, %v4913_v27 }
0x14fc   : > { %4850 = vmatmul.msk.bf16.gmra.mxu3 %vm463_vm0, %v4914_v10 }
0x150c   : > { %4851 = vmatmul.msk.bf16.gmra.mxu3 %vm463_vm0, %v4915_v8 }
0x151c   : > { %4852 = vmatmul.msk.bf16.gmra.mxu3 %vm463_vm0, %v4916_v20 }
0x156f   : > { %v4066_v24 = vpop.f32.mrf.mxu3 }
0x1570   : > { %v4067_v33 = vadd.f32 %v4066_v24, %v3988_v57 }
0x1577   : > { %v7216_v32 = vpop.f32.mrf.mxu3 }
0x1578   : > { %v4069_v63 = vadd.f32 %v7216_v32, %v3993_v51 }
0x157f   : > { %v7218_v42 = vpop.f32.mrf.mxu3 }
0x1587   : > { %v7220_v38 = vpop.f32.mrf.mxu3 }
0x158f   : > { %v4076_v56 = vpop.f32.mrf.mxu3 }
0x1590   : > { %v4077_v59 = vadd.f32 %v4076_v56, %v4008_v55 }
0x1592   : > { %v4853_v29 = vmul.f32 -1.442695, %v4077_v59  ;;  %v3998_v59 = vpop.permute.xlu1 %3997 }
0x1594   : > { %5307 = vpow2.f32 %v4853_v29  ;;  %v4072_v29 = vadd.f32 %v7218_v42, %v3998_v59  ;;  %v4003_v42 = vpop.permute.xlu2 %4002 }
0x1597   : > { %v4078_v18 = vpop.f32.mrf.mxu3 }
0x1598   : > { %v4079_v28 = vadd.f32 %v4078_v18, %v4013_v34 }
0x159a   : > { %v5308_v58 = vpop.eup %5307  ;;  %v4854_v48 = vmul.f32 -1.442695, %v4079_v28 }
0x159b   : > { %v4098_v47 = vadd.f32 1.0, %v5308_v58 }
0x159c   : > { %5309 = vpow2.f32 %v4854_v48 }
0x159d   : > { %5311 = vrcp.f32 %v4098_v47  ;;  %v4113_v54 = vand.u32 2147483648, %v4098_v47  ;;  %v4111_v14 = vand.u32 2147483647, %v4098_v47  ;;  %vm4107_vm5 = vweird.f32 %v4098_v47 }
0x159f   : > { %v4081_v53 = vpop.f32.mrf.mxu3  ;;  %v4114_v61 = vor.u32 1.1754944e-38, %v4113_v54  ;;  %vm4112_vm7 = vcmp.eq.f32.partialorder %v4111_v14, 8.507059e+37 }
0x15a0   : > { %v4082_v36 = vadd.f32 %v4081_v53, %v4018_v41 }
0x15a2   : > { %v5310_v23 = vpop.eup %5309  ;;  %v4855_v39 = vmul.f32 -1.442695, %v4082_v36 }
0x15a3   : > { %v5312_v52 = vpop.eup %5311  ;;  %v4099_v30 = vadd.f32 1.0, %v5310_v23 }
0x15a4   : > { %v4103_v19 = vmul.f32 %v5312_v52, %v4098_v47  ;;  %5313 = vpow2.f32 %v4855_v39  ;;  %vm4108_vm0 = vweird.f32 %v5312_v52  ;;  %v4074_v39 = vadd.f32 %v7220_v38, %v4003_v42 }
0x15a5   : > { %5315 = vrcp.f32 %v4099_v30  ;;  %vm4109_vm6 = vmor %vm4107_vm5, %vm4108_vm0  ;;  %v4128_v1 = vand.u32 2147483648, %v4099_v30  ;;  %v4126_v60 = vand.u32 2147483647, %v4099_v30  ;;  %vm4122_vm9 = vweird.f32 %v4099_v30 }
0x15a6   : > { %v4104_v45 = vsub.f32 1.0, %v4103_v19 }
0x15a7   : > { %v4083_v7 = vpop.f32.mrf.mxu3  ;;  %v4129_v12 = vor.u32 1.1754944e-38, %v4128_v1  ;;  %vm4127_vm11 = vcmp.eq.f32.partialorder %v4126_v60, 8.507059e+37 }
0x15a8   : > { %v4105_v37 = vmul.f32 %v5312_v52, %v4104_v45  ;;  %v4084_v0 = vadd.f32 %v4083_v7, %v4023_v11 }
0x15aa   : > { %v5314_v4 = vpop.eup %5313  ;;  %v4106_v43 = vadd.f32 %v5312_v52, %v4105_v37  ;;  %v4856_v16 = vmul.f32 -1.442695, %v4084_v0 }
0x15ab   : > { %v5316_v62 = vpop.eup %5315  ;;  %v4100_v49 = vadd.f32 1.0, %v5314_v4 }
0x15ac   : > { %v4110_v5 = vsel %vm4109_vm6, %v5312_v52, %v4106_v43  ;;  %v4118_v2 = vmul.f32 %v5316_v62, %v4099_v30  ;;  %5317 = vpow2.f32 %v4856_v16  ;;  %vm4123_vm8 = vweird.f32 %v5316_v62 }
0x15ad   : > { %v4115_v6 = vsel %vm4112_vm7, %v4114_v61, %v4110_v5  ;;  %5319 = vrcp.f32 %v4100_v49  ;;  %vm4124_vm10 = vmor %vm4122_vm9, %vm4123_vm8  ;;  %v4143_v10 = vand.u32 2147483648, %v4100_v49  ;;  %v4141_v24 = vand.u32 2147483647, %v4100_v49 }
0x15ae   : > { %v4162_v13 = vmul.f32 %v4115_v6, %v4067_v33  ;;  %v4119_v46 = vsub.f32 1.0, %v4118_v2  ;;  %vm4137_vm13 = vweird.f32 %v4100_v49 }
0x15af   : > { %v4144_v32 = vor.u32 1.1754944e-38, %v4143_v10  ;;  %vm4142_vm15 = vcmp.eq.f32.partialorder %v4141_v24, 8.507059e+37 }
0x15b0   : > { %v4166_v40 = vadd.f32 %v4162_v13, %v7058_v22  ;;  %v4120_v26 = vmul.f32 %v5316_v62, %v4119_v46 }
0x15b2   : > { %v5318_v25 = vpop.eup %5317  ;;  %4170 = vst [vmem:[%s7224_s17] sm:$0xff] %v4166_v40  ;;  %v4121_v35 = vadd.f32 %v5316_v62, %v4120_v26 }
0x15b3   : > { %v5320_v3 = vpop.eup %5319  ;;  %v4101_v44 = vadd.f32 1.0, %v5318_v25 }
0x15b4   : > { %v4125_v17 = vsel %vm4124_vm10, %v5316_v62, %v4121_v35  ;;  %v4133_v22 = vmul.f32 %v5320_v3, %v4100_v49  ;;  %vm4138_vm12 = vweird.f32 %v5320_v3 }
0x15b5   : > { %v4130_v50 = vsel %vm4127_vm11, %v4129_v12, %v4125_v17  ;;  %5321 = vrcp.f32 %v4101_v44  ;;  %vm4139_vm14 = vmor %vm4137_vm13, %vm4138_vm12  ;;  %v4158_v48 = vand.u32 2147483648, %v4101_v44  ;;  %v4156_v53 = vand.u32 2147483647, %v4101_v44 }
0x15b6   : > { %v4163_v15 = vmul.f32 %v4130_v50, %v4069_v63  ;;  %v4134_v27 = vsub.f32 1.0, %v4133_v22  ;;  %vm4152_vm2 = vweird.f32 %v4101_v44 }
0x15b7   : > { %v4159_v23 = vor.u32 1.1754944e-38, %v4158_v48  ;;  %vm4157_vm4 = vcmp.eq.f32.partialorder %v4156_v53, 8.507059e+37 }
0x15b8   : > { %v4167_v8 = vadd.f32 %v4163_v15, %v7062_v9  ;;  %v4135_v20 = vmul.f32 %v5320_v3, %v4134_v27 }
0x15ba   : > { %4171 = vst [vmem:[%s7224_s17 + $0x8] sm:$0xff] %v4167_v8  ;;  %v4136_v55 = vadd.f32 %v5320_v3, %v4135_v20 }
0x15bb   : > { %v5322_v56 = vpop.eup %5321 }
0x15bc   : > { %v4140_v34 = vsel %vm4139_vm14, %v5320_v3, %v4136_v55  ;;  %v4148_v18 = vmul.f32 %v5322_v56, %v4101_v44  ;;  %vm4153_vm1 = vweird.f32 %v5322_v56 }
0x15bd   : > { %v4145_v28 = vsel %vm4142_vm15, %v4144_v32, %v4140_v34  ;;  %vm4154_vm3 = vmor %vm4152_vm2, %vm4153_vm1 }
0x15be   : > { %v4164_v9 = vmul.f32 %v4145_v28, %v4072_v29  ;;  %v4149_v58 = vsub.f32 1.0, %v4148_v18 }
0x15c0   : > { %v4168_v47 = vadd.f32 %v4164_v9, %v7066_v31  ;;  %v4150_v41 = vmul.f32 %v5322_v56, %v4149_v58 }
0x15c2   : > { %4172 = vst [vmem:[%s7224_s17 + $0x10] sm:$0xff] %v4168_v47  ;;  %v4151_v36 = vadd.f32 %v5322_v56, %v4150_v41 }
0x15c4   : > { %v4155_v31 = vsel %vm4154_vm3, %v5322_v56, %v4151_v36 }
0x15c5   : > { %v4160_v52 = vsel %vm4157_vm4, %v4159_v23, %v4155_v31 }
0x15c6   : > { %v4165_v30 = vmul.f32 %v4160_v52, %v4074_v39 }
0x15c8   : > { %v4169_v19 = vadd.f32 %v4165_v30, %v7070_v21 }
0x15ca   : > { %4173 = vst [vmem:[%s7224_s17 + $0x18] sm:$0xff] %v4169_v19 }
0x15cb   : > { %5382 = shalt.err (!%p5379_p5)
}
0x15cc   : > { %s5420_s22 = smov 128   ;;  %s5421_s17 = smov 256  }
0x15cd   : > { %s5422_s18 = smov 8  }
0x15ce   : > { %4917 = dma.vmem_to_hbm [thread:$0]  (%p5501_p6), %s4187_s21, 512, %s4189_s28, %s4175_s23, %s5420_s22, %s5421_s17, %s5422_s18  }
0x15cf PF: > { %s4203_s19 = sand.u32 1, %s5405_s24   ;;  %p4920_p7 = pnand %p4259_p9, %p5505_p8 }
0x15d0   : > { %s4204_s20 = scalar_lea.sflag [#allocation4], %s4203_s19 }
0x15d1   : > { %p4921_p10 = pneg %p4920_p7 }
0x15d3   : > { %5400 = dma.done.wait (%p4921_p10), %s4204_s20, 512  }
0x15d4   : > { %5402 = vsyncadd (%p4921_p10), %s4204_s20, 4294966784  ;;  %p17_p11 = scmp.ge.s32.totalorder %s5486_s30, 4   ;;  %s7368_s24 = smov %s5409_s25 }
0x15d5   : > { %s7369_s25 = smov %s5413_s26  ;;  %s7370_s26 = smov %s5499_s10 }
0x15d6   : > { %s7371_s27 = smov %s5486_s30  ;;  %19 = sbr.rel (!%p17_p11) target bundleno = 3 (0x3), region = 154 }
0x15db   :  { %4210 = vsyncpa [#allocation4], 1 }
0x15dc   :  { %4212 = vsyncpa [#allocation4 + $0x1], 1 }

</bundles_post_ra>
